<compile_context>
chip_gen: v6e
topology: v6e:2x2x1
jax: 0.10.0
libtpu: 0.0.40
codegen_flags: <defaults>
</compile_context>

<pallas_src>
import functools

import jax
import jax.numpy as jnp
from jax.experimental import pallas as pl
from jax.experimental.pallas import tpu as pltpu


def _leaky(v):
    return jnp.where(v > 0, v, 0.01 * v)


def _disc3_kernel(num_cls, seq_w, act_dtype,
                  x_ref, lab_ref, emb_ref,
                  wcx_ref, bcx_ref, wcl_ref, bcl_ref,
                  wc2x_ref, wc2l_ref, bc2_ref, wc3_ref, bc3_ref,
                  w1_ref, b1_ref, w2_ref, b2_ref, w3_ref, b3_ref,
                  o_ref):
    m = x_ref.shape[0]
    tb = m // seq_w

    # ---- boundary masks built in-kernel (no constant DMA) -------------------
    pos = jax.lax.broadcasted_iota(jnp.int32, (m, 1), 0) % seq_w
    nf = (pos != 0).astype(act_dtype)            # kills tap t-1 at time 0
    nl = (pos != seq_w - 1).astype(act_dtype)    # kills tap t+1 at time W-1

    def shift_prev(a):                           # row t <- a[t-1], zero at t==0
        return pltpu.roll(a, 1, axis=0) * nf

    def shift_next(a):                           # row t <- a[t+1], zero at t==W-1
        return pltpu.roll(a, m - 1, axis=0) * nl

    def conv3_acc(a, w_ref):
        """3-tap 'same' Conv1d as three accumulating bf16 dots (f32 acc), no concat.

        a: [M, Cin] activations; w_ref: [3, Cin, Cout] bf16 (tap-major)."""
        bf = lambda v: v.astype(jnp.bfloat16)
        out = jnp.dot(bf(a), w_ref[1], preferred_element_type=jnp.float32)
        out = out + jnp.dot(bf(shift_prev(a)), w_ref[0],
                            preferred_element_type=jnp.float32)
        out = out + jnp.dot(bf(shift_next(a)), w_ref[2],
                            preferred_element_type=jnp.float32)
        return out

    x = x_ref[...].astype(act_dtype)             # [M, 1]

    # ---- conv_x: Cin == 1 -> three broadcast mul-adds on the VPU ------------
    wcx = wcx_ref[...].astype(act_dtype)         # [3, 32]
    x_feat = _leaky(shift_prev(x) * wcx[0:1, :] + x * wcx[1:2, :]
                    + shift_next(x) * wcx[2:3, :] + bcx_ref[...]).astype(act_dtype)

    # ---- label embedding: select-accumulate (num_cls small, pure VPU) -------
    lab = lab_ref[...]                           # [M, 1] i32
    emb = emb_ref[...].astype(act_dtype)         # [num_cls, 32]
    embedded = (lab == 0).astype(act_dtype) * emb[0:1, :]
    for c in range(1, num_cls):                  # static unroll
        embedded = embedded + (lab == c).astype(act_dtype) * emb[c:c + 1, :]

    label_feat = _leaky(conv3_acc(embedded, wcl_ref)
                        + bcl_ref[...]).astype(act_dtype)          # [M, 32]

    # conv2 over cat([x_feat, label_feat], channel) == sum of two half-convs
    c2 = _leaky(conv3_acc(x_feat, wc2x_ref) + conv3_acc(label_feat, wc2l_ref)
                + bc2_ref[...]).astype(act_dtype)                  # [M, 64]
    c3 = _leaky(conv3_acc(c2, wc3_ref) + bc3_ref[...])             # [M, 128] f32

    # ---- temporal mean: reshape + sublane sum (no pooling matmul) -----------
    pooled = jnp.sum(c3.reshape(tb, seq_w, c3.shape[-1]), axis=1) * (1.0 / seq_w)

    # ---- FC head (widths padded to lane multiples; math unchanged) ----------
    h1 = _leaky(jnp.dot(pooled.astype(jnp.bfloat16), w1_ref[...],
                        preferred_element_type=jnp.float32) + b1_ref[...])
    h2 = jnp.maximum(jnp.dot(h1.astype(jnp.bfloat16), w2_ref[...],
                             preferred_element_type=jnp.float32) + b2_ref[...], 0.0)
    logits = jnp.dot(h2.astype(jnp.bfloat16), w3_ref[...],
                     preferred_element_type=jnp.float32) + b3_ref[...]
    o_ref[...] = 1.0 / (1.0 + jnp.exp(-logits))  # lane-dense [tb, 128] store


def _pick_batch_tile(B, W, batch_tile, target_rows=2048):
    """Pick a batch tile: divides B, 8-aligned (or == B), ~target_rows rows per
    grid step, grid length >= 2 (and even if possible) so v7x's 2 TCs both work."""
    if batch_tile is not None:
        ok = (B % batch_tile == 0) and (batch_tile % 8 == 0 or batch_tile == B)
        return batch_tile if ok else B
    best, best_score = B, None
    for tb in range(1, B + 1):
        if B % tb:
            continue
        if not (tb % 8 == 0 or tb == B):
            continue
        g = B // tb
        score = (0 if g >= 2 else 1,            # keep both v7x TCs busy
                 0 if g % 2 == 0 else 1,        # even grid splits cleanly
                 abs(tb * W - target_rows))     # amortize per-step overhead
        if best_score is None or score < best_score:
            best, best_score = tb, score
    return best


def discriminator3(x, labels, params, *, batch_tile=None, act_dtype=jnp.float32):
    """x: [B, W, 1] f32, labels: [B, W] int32 -> [B, out_size] f32.

    act_dtype: element-wise compute dtype. Keep f32 on v5e (no bf16 VPU);
    jnp.bfloat16 is recommended on v6e/v7x."""
    B, W, _ = x.shape
    num_cls = params["emb"].shape[0]
    out_size = params["w3"].shape[1]

    tb = _pick_batch_tile(B, W, batch_tile)
    m = tb * W
    grid = (B // tb,)

    # flattened inputs: rows = (sample, time)
    x2d = x.reshape(B * W, 1).astype(jnp.float32)
    lab2d = labels.reshape(B * W, 1).astype(jnp.int32)

    def row(b, pad_to=None):            # [C] -> [1, C] f32, optional zero-pad
        b = b.reshape(1, -1).astype(jnp.float32)
        if pad_to is not None and b.shape[1] < pad_to:
            b = jnp.pad(b, ((0, 0), (0, pad_to - b.shape[1])))
        return b

    def bf(w):
        return w.astype(jnp.bfloat16)

    # FC widths padded to lane multiples (padded rows/cols are zero -> same math)
    hid = params["w1"].shape[1]
    hp = ((hid + 127) // 128) * 128
    op = ((out_size + 127) // 128) * 128
    w1 = bf(jnp.pad(params["w1"], ((0, 0), (0, hp - hid))))
    w2 = bf(jnp.pad(params["w2"], ((0, hp - hid), (0, hp - hid))))
    w3 = bf(jnp.pad(params["w3"], ((0, hp - hid), (0, op - out_size))))

    # conv2 over cat([x_feat, label_feat]) == sum of two half-convs (no concat)
    wc2x = bf(params["wc2"][:, :32, :])
    wc2l = bf(params["wc2"][:, 32:, :])

    args = (
        x2d, lab2d,
        params["emb"].astype(jnp.float32),
        params["wcx"].reshape(3, -1).astype(jnp.float32), row(params["bcx"]),
        bf(params["wcl"]), row(params["bcl"]),
        wc2x, wc2l, row(params["bc2"]),
        bf(params["wc3"]), row(params["bc3"]),
        w1, row(params["b1"], hp),
        w2, row(params["b2"], hp),
        w3, row(params["b3"], op),
    )

    def const_spec(a):                  # full array, same block every grid step
        return pl.BlockSpec(a.shape, lambda *_: (0,) * a.ndim)

    in_specs = [
        pl.BlockSpec((m, 1), lambda i: (i, 0)),     # x rows of batch tile i
        pl.BlockSpec((m, 1), lambda i: (i, 0)),     # label rows of batch tile i
    ] + [const_spec(a) for a in args[2:]]

    out = pl.pallas_call(
        functools.partial(_disc3_kernel, num_cls, W, act_dtype),
        out_shape=jax.ShapeDtypeStruct((B, op), jnp.float32),
        grid=grid,
        in_specs=in_specs,
        out_specs=pl.BlockSpec((tb, op), lambda i: (i, 0)),
        compiler_params=pltpu.CompilerParams(
            dimension_semantics=("parallel",),      # batch tiles across TCs (v7x)
            vmem_limit_bytes=48 * 1024 * 1024,      # v7x-safe (64 MiB physical)
        ),
    )(*args)
    return out[:, :out_size]


def init_params(key, num_cls, out_size):
    """Conv weights stored as [K, Cin, Cout] (torch [Cout, Cin, K].transpose(2,1,0)),
    Linear weights as [in, out] (torch weight.T)."""
    ks = jax.random.split(key, 12)

    def rnd(k, shape, scale):
        return (scale * jax.random.normal(k, shape)).astype(jnp.float32)

    return dict(
        emb=rnd(ks[0], (num_cls, 32), 1.0),          # nn.Embedding(num_cls, 32)
        wcx=rnd(ks[1], (3, 1, 32), 0.5),             # Conv1d(1, 32, 3, padding='same')
        bcx=rnd(ks[2], (32,), 0.1),
        wcl=rnd(ks[3], (3, 32, 32), 0.1),            # Conv1d(32, 32, 3)
        bcl=rnd(ks[4], (32,), 0.1),
        wc2=rnd(ks[5], (3, 64, 64), 0.08),           # Conv1d(64, 64, 3)
        bc2=rnd(ks[6], (64,), 0.1),
        wc3=rnd(ks[7], (3, 64, 128), 0.08),          # Conv1d(64, 128, 3)
        bc3=rnd(ks[8], (128,), 0.1),
        w1=rnd(ks[9], (128, 220), 0.05),             # Linear(128, 220)
        b1=jnp.zeros((220,), jnp.float32),
        w2=rnd(ks[10], (220, 220), 0.05),            # Linear(220, 220)
        b2=jnp.zeros((220,), jnp.float32),
        w3=rnd(ks[11], (220, out_size), 0.05),       # Linear(220, out_size)
        b3=jnp.zeros((out_size,), jnp.float32),
    )


def ref_forward(x, labels, p):
    """Pure-JAX f32 reference replicating the PyTorch forward (channels-last)."""
    def conv(inp, w, b):
        Bn, Wn, _ = inp.shape
        pad = jnp.pad(inp, ((0, 0), (1, 1), (0, 0)))
        out = jnp.zeros((Bn, Wn, w.shape[2]), jnp.float32)
        for t in range(3):
            out = out + jnp.einsum("bwc,cd->bwd", pad[:, t:t + Wn, :], w[t])
        return out + b[None, None, :]

    leaky = lambda v: jnp.where(v > 0, v, 0.01 * v)
    x_feat = leaky(conv(x, p["wcx"], p["bcx"]))
    embedded = p["emb"][labels]
    label_feat = leaky(conv(embedded, p["wcl"], p["bcl"]))
    combined = jnp.concatenate([x_feat, label_feat], axis=-1)
    c2 = leaky(conv(combined, p["wc2"], p["bc2"]))
    c3 = leaky(conv(c2, p["wc3"], p["bc3"]))
    pooled = jnp.mean(c3, axis=1)
    h1 = leaky(pooled @ p["w1"] + p["b1"])
    h2 = jnp.maximum(h1 @ p["w2"] + p["b2"], 0.0)
    return jax.nn.sigmoid(h2 @ p["w3"] + p["b3"])


if __name__ == "__main__":
    B, W, num_cls, out_size = 16, 16, 5, 5

    key = jax.random.PRNGKey(0)
    kx, kl, kp = jax.random.split(key, 3)
    x = jax.random.normal(kx, (B, W, 1), dtype=jnp.float32)             # [B, W, 1]
    labels = jax.random.randint(kl, (B, W), 0, num_cls, dtype=jnp.int32)
    params = init_params(kp, num_cls, out_size)

    out = jax.block_until_ready(discriminator3(x, labels, params))     # grid = (2,)
    ref = ref_forward(x, labels, params)

    assert out.shape == (B, out_size)
    err = float(jnp.max(jnp.abs(out - ref)))
    # bf16 MXU inputs (f32 accumulation) vs. the all-f32 reference -> small slack
    assert err < 2e-2, (err, out, ref)
    print("KERNEL_OK")
</pallas_src>

<mosaic_0001>
module attributes {stable_mosaic.version = 11 : i64} {
  func.func @_disc3_kernel(%arg0: i32, %arg1: memref<128x1xf32, #tpu.memory_space<vmem>>, %arg2: memref<128x1xi32, #tpu.memory_space<vmem>>, %arg3: memref<5x32xf32, #tpu.memory_space<vmem>>, %arg4: memref<3x32xf32, #tpu.memory_space<vmem>>, %arg5: memref<1x32xf32, #tpu.memory_space<vmem>>, %arg6: memref<3x32x32xbf16, #tpu.memory_space<vmem>>, %arg7: memref<1x32xf32, #tpu.memory_space<vmem>>, %arg8: memref<3x32x64xbf16, #tpu.memory_space<vmem>>, %arg9: memref<3x32x64xbf16, #tpu.memory_space<vmem>>, %arg10: memref<1x64xf32, #tpu.memory_space<vmem>>, %arg11: memref<3x64x128xbf16, #tpu.memory_space<vmem>>, %arg12: memref<1x128xf32, #tpu.memory_space<vmem>>, %arg13: memref<128x256xbf16, #tpu.memory_space<vmem>>, %arg14: memref<1x256xf32, #tpu.memory_space<vmem>>, %arg15: memref<256x256xbf16, #tpu.memory_space<vmem>>, %arg16: memref<1x256xf32, #tpu.memory_space<vmem>>, %arg17: memref<256x128xbf16, #tpu.memory_space<vmem>>, %arg18: memref<1x128xf32, #tpu.memory_space<vmem>>, %arg19: memref<8x128xf32, #tpu.memory_space<vmem>>) attributes {dimension_semantics = [#tpu.dimension_semantics<parallel>], iteration_bounds = array<i64: 2>, scalar_prefetch = 0 : i64, scratch_operands = 0 : i64, tpu.core_type = #tpu.core_type<tc>, window_params = [{transform_indices = @transform_0, window_bounds = array<i64: 128, 1>}, {transform_indices = @transform_1, window_bounds = array<i64: 128, 1>}, {pipeline_mode = #tpu.pipeline_mode<synchronous>, transform_indices = @transform_2, window_bounds = array<i64: 5, 32>}, {pipeline_mode = #tpu.pipeline_mode<synchronous>, transform_indices = @transform_3, window_bounds = array<i64: 3, 32>}, {pipeline_mode = #tpu.pipeline_mode<synchronous>, transform_indices = @transform_4, window_bounds = array<i64: 1, 32>}, {pipeline_mode = #tpu.pipeline_mode<synchronous>, transform_indices = @transform_5, window_bounds = array<i64: 3, 32, 32>}, {pipeline_mode = #tpu.pipeline_mode<synchronous>, transform_indices = @transform_6, window_bounds = array<i64: 1, 32>}, {pipeline_mode = #tpu.pipeline_mode<synchronous>, transform_indices = @transform_7, window_bounds = array<i64: 3, 32, 64>}, {pipeline_mode = #tpu.pipeline_mode<synchronous>, transform_indices = @transform_8, window_bounds = array<i64: 3, 32, 64>}, {pipeline_mode = #tpu.pipeline_mode<synchronous>, transform_indices = @transform_9, window_bounds = array<i64: 1, 64>}, {pipeline_mode = #tpu.pipeline_mode<synchronous>, transform_indices = @transform_10, window_bounds = array<i64: 3, 64, 128>}, {pipeline_mode = #tpu.pipeline_mode<synchronous>, transform_indices = @transform_11, window_bounds = array<i64: 1, 128>}, {pipeline_mode = #tpu.pipeline_mode<synchronous>, transform_indices = @transform_12, window_bounds = array<i64: 128, 256>}, {pipeline_mode = #tpu.pipeline_mode<synchronous>, transform_indices = @transform_13, window_bounds = array<i64: 1, 256>}, {pipeline_mode = #tpu.pipeline_mode<synchronous>, transform_indices = @transform_14, window_bounds = array<i64: 256, 256>}, {pipeline_mode = #tpu.pipeline_mode<synchronous>, transform_indices = @transform_15, window_bounds = array<i64: 1, 256>}, {pipeline_mode = #tpu.pipeline_mode<synchronous>, transform_indices = @transform_16, window_bounds = array<i64: 256, 128>}, {pipeline_mode = #tpu.pipeline_mode<synchronous>, transform_indices = @transform_17, window_bounds = array<i64: 1, 128>}, {transform_indices = @transform_18, window_bounds = array<i64: 8, 128>}]} {
    %0 = tpu.iota {dimensions = array<i32: 0>} : vector<128x1xi32>
    %c16_i32 = arith.constant 16 : i32
    %c0_i32 = arith.constant 0 : i32
    %1 = arith.cmpi eq, %c16_i32, %c0_i32 : i32
    %c1_i32 = arith.constant 1 : i32
    %2 = arith.select %1, %c1_i32, %c16_i32 : i32
    %3 = vector.broadcast %2 : i32 to vector<128x1xi32>
    %4 = arith.remsi %0, %3 : vector<128x1xi32>
    %c0_i32_0 = arith.constant 0 : i32
    %5 = vector.broadcast %c0_i32_0 : i32 to vector<128x1xi32>
    %6 = arith.cmpi ne, %4, %5 : vector<128x1xi32>
    %c0_i32_1 = arith.constant 0 : i32
    %7 = vector.broadcast %c0_i32_1 : i32 to vector<128x1xi32>
    %8 = arith.cmpi slt, %4, %7 : vector<128x1xi32>
    %c0_i32_2 = arith.constant 0 : i32
    %9 = arith.cmpi slt, %2, %c0_i32_2 : i32
    %10 = vector.broadcast %9 : i1 to vector<128x1xi1>
    %11 = vector.broadcast %10 : vector<128x1xi1> to vector<128x1xi1>
    %12 = arith.xori %8, %11 : vector<128x1xi1>
    %13 = arith.andi %12, %6 : vector<128x1xi1>
    %14 = vector.broadcast %2 : i32 to vector<128x1xi32>
    %15 = arith.addi %4, %14 : vector<128x1xi32>
    %16 = arith.select %13, %15, %4 : vector<128x1xi1>, vector<128x1xi32>
    %c0_i32_3 = arith.constant 0 : i32
    %17 = vector.broadcast %c0_i32_3 : i32 to vector<128x1xi32>
    %18 = arith.cmpi ne, %16, %17 : vector<128x1xi32>
    %19 = arith.extui %18 : vector<128x1xi1> to vector<128x1xi32>
    %20 = arith.sitofp %19 : vector<128x1xi32> to vector<128x1xf32>
    %c15_i32 = arith.constant 15 : i32
    %21 = vector.broadcast %c15_i32 : i32 to vector<128x1xi32>
    %22 = arith.cmpi ne, %16, %21 : vector<128x1xi32>
    %23 = arith.extui %22 : vector<128x1xi1> to vector<128x1xi32>
    %24 = arith.sitofp %23 : vector<128x1xi32> to vector<128x1xf32>
    %c0 = arith.constant 0 : index
    %c0_4 = arith.constant 0 : index
    %25 = vector.load %arg1[%c0, %c0_4] : memref<128x1xf32, #tpu.memory_space<vmem>>, vector<128x1xf32>
    %c0_5 = arith.constant 0 : index
    %c0_6 = arith.constant 0 : index
    %26 = vector.load %arg4[%c0_5, %c0_6] : memref<3x32xf32, #tpu.memory_space<vmem>>, vector<3x32xf32>
    %c1_i32_7 = arith.constant 1 : i32
    %27 = tpu.dynamic_rotate %25 by %c1_i32_7 dim 0 : vector<128x1xf32>, i32 -> vector<128x1xf32>
    %28 = arith.mulf %27, %20 : vector<128x1xf32>
    %29 = vector.extract_strided_slice %26 {offsets = [0, 0], sizes = [1, 32], strides = [1, 1]} : vector<3x32xf32> to vector<1x32xf32>
    %30 = vector.broadcast %28 : vector<128x1xf32> to vector<128x32xf32>
    %31 = vector.broadcast %29 : vector<1x32xf32> to vector<128x32xf32>
    %32 = arith.mulf %30, %31 : vector<128x32xf32>
    %33 = vector.extract_strided_slice %26 {offsets = [1, 0], sizes = [1, 32], strides = [1, 1]} : vector<3x32xf32> to vector<1x32xf32>
    %34 = vector.broadcast %25 : vector<128x1xf32> to vector<128x32xf32>
    %35 = vector.broadcast %33 : vector<1x32xf32> to vector<128x32xf32>
    %36 = arith.mulf %34, %35 : vector<128x32xf32>
    %37 = arith.addf %32, %36 : vector<128x32xf32>
    %c127_i32 = arith.constant 127 : i32
    %38 = tpu.dynamic_rotate %25 by %c127_i32 dim 0 : vector<128x1xf32>, i32 -> vector<128x1xf32>
    %39 = arith.mulf %38, %24 : vector<128x1xf32>
    %40 = vector.extract_strided_slice %26 {offsets = [2, 0], sizes = [1, 32], strides = [1, 1]} : vector<3x32xf32> to vector<1x32xf32>
    %41 = vector.broadcast %39 : vector<128x1xf32> to vector<128x32xf32>
    %42 = vector.broadcast %40 : vector<1x32xf32> to vector<128x32xf32>
    %43 = arith.mulf %41, %42 : vector<128x32xf32>
    %44 = arith.addf %37, %43 : vector<128x32xf32>
    %c0_8 = arith.constant 0 : index
    %c0_9 = arith.constant 0 : index
    %45 = vector.load %arg5[%c0_8, %c0_9] : memref<1x32xf32, #tpu.memory_space<vmem>>, vector<1x32xf32>
    %46 = vector.broadcast %45 : vector<1x32xf32> to vector<128x32xf32>
    %47 = arith.addf %44, %46 : vector<128x32xf32>
    %cst = arith.constant 0.000000e+00 : f32
    %48 = vector.broadcast %cst : f32 to vector<128x32xf32>
    %49 = arith.cmpf ogt, %47, %48 : vector<128x32xf32>
    %cst_10 = arith.constant 0.00999999977 : f32
    %50 = vector.broadcast %cst_10 : f32 to vector<128x32xf32>
    %51 = arith.mulf %50, %47 : vector<128x32xf32>
    %52 = arith.select %49, %47, %51 : vector<128x32xi1>, vector<128x32xf32>
    %c0_11 = arith.constant 0 : index
    %c0_12 = arith.constant 0 : index
    %53 = vector.load %arg2[%c0_11, %c0_12] : memref<128x1xi32, #tpu.memory_space<vmem>>, vector<128x1xi32>
    %c0_13 = arith.constant 0 : index
    %c0_14 = arith.constant 0 : index
    %54 = vector.load %arg3[%c0_13, %c0_14] : memref<5x32xf32, #tpu.memory_space<vmem>>, vector<5x32xf32>
    %c0_i32_15 = arith.constant 0 : i32
    %55 = vector.broadcast %c0_i32_15 : i32 to vector<128x1xi32>
    %56 = arith.cmpi eq, %53, %55 : vector<128x1xi32>
    %57 = arith.extui %56 : vector<128x1xi1> to vector<128x1xi32>
    %58 = arith.sitofp %57 : vector<128x1xi32> to vector<128x1xf32>
    %59 = vector.extract_strided_slice %54 {offsets = [0, 0], sizes = [1, 32], strides = [1, 1]} : vector<5x32xf32> to vector<1x32xf32>
    %60 = vector.broadcast %58 : vector<128x1xf32> to vector<128x32xf32>
    %61 = vector.broadcast %59 : vector<1x32xf32> to vector<128x32xf32>
    %62 = arith.mulf %60, %61 : vector<128x32xf32>
    %c1_i32_16 = arith.constant 1 : i32
    %63 = vector.broadcast %c1_i32_16 : i32 to vector<128x1xi32>
    %64 = arith.cmpi eq, %53, %63 : vector<128x1xi32>
    %65 = arith.extui %64 : vector<128x1xi1> to vector<128x1xi32>
    %66 = arith.sitofp %65 : vector<128x1xi32> to vector<128x1xf32>
    %67 = vector.extract_strided_slice %54 {offsets = [1, 0], sizes = [1, 32], strides = [1, 1]} : vector<5x32xf32> to vector<1x32xf32>
    %68 = vector.broadcast %66 : vector<128x1xf32> to vector<128x32xf32>
    %69 = vector.broadcast %67 : vector<1x32xf32> to vector<128x32xf32>
    %70 = arith.mulf %68, %69 : vector<128x32xf32>
    %71 = arith.addf %62, %70 : vector<128x32xf32>
    %c2_i32 = arith.constant 2 : i32
    %72 = vector.broadcast %c2_i32 : i32 to vector<128x1xi32>
    %73 = arith.cmpi eq, %53, %72 : vector<128x1xi32>
    %74 = arith.extui %73 : vector<128x1xi1> to vector<128x1xi32>
    %75 = arith.sitofp %74 : vector<128x1xi32> to vector<128x1xf32>
    %76 = vector.extract_strided_slice %54 {offsets = [2, 0], sizes = [1, 32], strides = [1, 1]} : vector<5x32xf32> to vector<1x32xf32>
    %77 = vector.broadcast %75 : vector<128x1xf32> to vector<128x32xf32>
    %78 = vector.broadcast %76 : vector<1x32xf32> to vector<128x32xf32>
    %79 = arith.mulf %77, %78 : vector<128x32xf32>
    %80 = arith.addf %71, %79 : vector<128x32xf32>
    %c3_i32 = arith.constant 3 : i32
    %81 = vector.broadcast %c3_i32 : i32 to vector<128x1xi32>
    %82 = arith.cmpi eq, %53, %81 : vector<128x1xi32>
    %83 = arith.extui %82 : vector<128x1xi1> to vector<128x1xi32>
    %84 = arith.sitofp %83 : vector<128x1xi32> to vector<128x1xf32>
    %85 = vector.extract_strided_slice %54 {offsets = [3, 0], sizes = [1, 32], strides = [1, 1]} : vector<5x32xf32> to vector<1x32xf32>
    %86 = vector.broadcast %84 : vector<128x1xf32> to vector<128x32xf32>
    %87 = vector.broadcast %85 : vector<1x32xf32> to vector<128x32xf32>
    %88 = arith.mulf %86, %87 : vector<128x32xf32>
    %89 = arith.addf %80, %88 : vector<128x32xf32>
    %c4_i32 = arith.constant 4 : i32
    %90 = vector.broadcast %c4_i32 : i32 to vector<128x1xi32>
    %91 = arith.cmpi eq, %53, %90 : vector<128x1xi32>
    %92 = arith.extui %91 : vector<128x1xi1> to vector<128x1xi32>
    %93 = arith.sitofp %92 : vector<128x1xi32> to vector<128x1xf32>
    %94 = vector.extract_strided_slice %54 {offsets = [4, 0], sizes = [1, 32], strides = [1, 1]} : vector<5x32xf32> to vector<1x32xf32>
    %95 = vector.broadcast %93 : vector<128x1xf32> to vector<128x32xf32>
    %96 = vector.broadcast %94 : vector<1x32xf32> to vector<128x32xf32>
    %97 = arith.mulf %95, %96 : vector<128x32xf32>
    %98 = arith.addf %89, %97 : vector<128x32xf32>
    %99 = arith.truncf %98 : vector<128x32xf32> to vector<128x32xbf16>
    %c1 = arith.constant 1 : index
    %c0_17 = arith.constant 0 : index
    %c0_18 = arith.constant 0 : index
    %100 = vector.load %arg6[%c1, %c0_17, %c0_18] : memref<3x32x32xbf16, #tpu.memory_space<vmem>>, vector<1x32x32xbf16>
    %101 = vector.shape_cast %100 : vector<1x32x32xbf16> to vector<32x32xbf16>
    %cst_19 = arith.constant dense<0.000000e+00> : vector<128x32xf32>
    %102 = tpu.matmul %99, %101, %cst_19 {dimension_numbers = #tpu.dot_dimension_numbers<[1], [0], [0], [1], [0, 0, 1, 1], [], []>} : vector<128x32xbf16>, vector<32x32xbf16>, vector<128x32xf32> -> vector<128x32xf32>
    %c1_i32_20 = arith.constant 1 : i32
    %103 = tpu.dynamic_rotate %98 by %c1_i32_20 dim 0 : vector<128x32xf32>, i32 -> vector<128x32xf32>
    %104 = vector.broadcast %20 : vector<128x1xf32> to vector<128x32xf32>
    %105 = arith.mulf %103, %104 : vector<128x32xf32>
    %106 = arith.truncf %105 : vector<128x32xf32> to vector<128x32xbf16>
    %c0_21 = arith.constant 0 : index
    %c0_22 = arith.constant 0 : index
    %c0_23 = arith.constant 0 : index
    %107 = vector.load %arg6[%c0_21, %c0_22, %c0_23] : memref<3x32x32xbf16, #tpu.memory_space<vmem>>, vector<1x32x32xbf16>
    %108 = vector.shape_cast %107 : vector<1x32x32xbf16> to vector<32x32xbf16>
    %cst_24 = arith.constant dense<0.000000e+00> : vector<128x32xf32>
    %109 = tpu.matmul %106, %108, %cst_24 {dimension_numbers = #tpu.dot_dimension_numbers<[1], [0], [0], [1], [0, 0, 1, 1], [], []>} : vector<128x32xbf16>, vector<32x32xbf16>, vector<128x32xf32> -> vector<128x32xf32>
    %110 = arith.addf %102, %109 : vector<128x32xf32>
    %c127_i32_25 = arith.constant 127 : i32
    %111 = tpu.dynamic_rotate %98 by %c127_i32_25 dim 0 : vector<128x32xf32>, i32 -> vector<128x32xf32>
    %112 = vector.broadcast %24 : vector<128x1xf32> to vector<128x32xf32>
    %113 = arith.mulf %111, %112 : vector<128x32xf32>
    %114 = arith.truncf %113 : vector<128x32xf32> to vector<128x32xbf16>
    %c2 = arith.constant 2 : index
    %c0_26 = arith.constant 0 : index
    %c0_27 = arith.constant 0 : index
    %115 = vector.load %arg6[%c2, %c0_26, %c0_27] : memref<3x32x32xbf16, #tpu.memory_space<vmem>>, vector<1x32x32xbf16>
    %116 = vector.shape_cast %115 : vector<1x32x32xbf16> to vector<32x32xbf16>
    %cst_28 = arith.constant dense<0.000000e+00> : vector<128x32xf32>
    %117 = tpu.matmul %114, %116, %cst_28 {dimension_numbers = #tpu.dot_dimension_numbers<[1], [0], [0], [1], [0, 0, 1, 1], [], []>} : vector<128x32xbf16>, vector<32x32xbf16>, vector<128x32xf32> -> vector<128x32xf32>
    %118 = arith.addf %110, %117 : vector<128x32xf32>
    %c0_29 = arith.constant 0 : index
    %c0_30 = arith.constant 0 : index
    %119 = vector.load %arg7[%c0_29, %c0_30] : memref<1x32xf32, #tpu.memory_space<vmem>>, vector<1x32xf32>
    %120 = vector.broadcast %119 : vector<1x32xf32> to vector<128x32xf32>
    %121 = arith.addf %118, %120 : vector<128x32xf32>
    %cst_31 = arith.constant 0.000000e+00 : f32
    %122 = vector.broadcast %cst_31 : f32 to vector<128x32xf32>
    %123 = arith.cmpf ogt, %121, %122 : vector<128x32xf32>
    %cst_32 = arith.constant 0.00999999977 : f32
    %124 = vector.broadcast %cst_32 : f32 to vector<128x32xf32>
    %125 = arith.mulf %124, %121 : vector<128x32xf32>
    %126 = arith.select %123, %121, %125 : vector<128x32xi1>, vector<128x32xf32>
    %127 = arith.truncf %52 : vector<128x32xf32> to vector<128x32xbf16>
    %c1_33 = arith.constant 1 : index
    %c0_34 = arith.constant 0 : index
    %c0_35 = arith.constant 0 : index
    %128 = vector.load %arg8[%c1_33, %c0_34, %c0_35] : memref<3x32x64xbf16, #tpu.memory_space<vmem>>, vector<1x32x64xbf16>
    %129 = vector.shape_cast %128 : vector<1x32x64xbf16> to vector<32x64xbf16>
    %cst_36 = arith.constant dense<0.000000e+00> : vector<128x64xf32>
    %130 = tpu.matmul %127, %129, %cst_36 {dimension_numbers = #tpu.dot_dimension_numbers<[1], [0], [0], [1], [0, 0, 1, 1], [], []>} : vector<128x32xbf16>, vector<32x64xbf16>, vector<128x64xf32> -> vector<128x64xf32>
    %c1_i32_37 = arith.constant 1 : i32
    %131 = tpu.dynamic_rotate %52 by %c1_i32_37 dim 0 : vector<128x32xf32>, i32 -> vector<128x32xf32>
    %132 = vector.broadcast %20 : vector<128x1xf32> to vector<128x32xf32>
    %133 = arith.mulf %131, %132 : vector<128x32xf32>
    %134 = arith.truncf %133 : vector<128x32xf32> to vector<128x32xbf16>
    %c0_38 = arith.constant 0 : index
    %c0_39 = arith.constant 0 : index
    %c0_40 = arith.constant 0 : index
    %135 = vector.load %arg8[%c0_38, %c0_39, %c0_40] : memref<3x32x64xbf16, #tpu.memory_space<vmem>>, vector<1x32x64xbf16>
    %136 = vector.shape_cast %135 : vector<1x32x64xbf16> to vector<32x64xbf16>
    %cst_41 = arith.constant dense<0.000000e+00> : vector<128x64xf32>
    %137 = tpu.matmul %134, %136, %cst_41 {dimension_numbers = #tpu.dot_dimension_numbers<[1], [0], [0], [1], [0, 0, 1, 1], [], []>} : vector<128x32xbf16>, vector<32x64xbf16>, vector<128x64xf32> -> vector<128x64xf32>
    %138 = arith.addf %130, %137 : vector<128x64xf32>
    %c127_i32_42 = arith.constant 127 : i32
    %139 = tpu.dynamic_rotate %52 by %c127_i32_42 dim 0 : vector<128x32xf32>, i32 -> vector<128x32xf32>
    %140 = vector.broadcast %24 : vector<128x1xf32> to vector<128x32xf32>
    %141 = arith.mulf %139, %140 : vector<128x32xf32>
    %142 = arith.truncf %141 : vector<128x32xf32> to vector<128x32xbf16>
    %c2_43 = arith.constant 2 : index
    %c0_44 = arith.constant 0 : index
    %c0_45 = arith.constant 0 : index
    %143 = vector.load %arg8[%c2_43, %c0_44, %c0_45] : memref<3x32x64xbf16, #tpu.memory_space<vmem>>, vector<1x32x64xbf16>
    %144 = vector.shape_cast %143 : vector<1x32x64xbf16> to vector<32x64xbf16>
    %cst_46 = arith.constant dense<0.000000e+00> : vector<128x64xf32>
    %145 = tpu.matmul %142, %144, %cst_46 {dimension_numbers = #tpu.dot_dimension_numbers<[1], [0], [0], [1], [0, 0, 1, 1], [], []>} : vector<128x32xbf16>, vector<32x64xbf16>, vector<128x64xf32> -> vector<128x64xf32>
    %146 = arith.addf %138, %145 : vector<128x64xf32>
    %147 = arith.truncf %126 : vector<128x32xf32> to vector<128x32xbf16>
    %c1_47 = arith.constant 1 : index
    %c0_48 = arith.constant 0 : index
    %c0_49 = arith.constant 0 : index
    %148 = vector.load %arg9[%c1_47, %c0_48, %c0_49] : memref<3x32x64xbf16, #tpu.memory_space<vmem>>, vector<1x32x64xbf16>
    %149 = vector.shape_cast %148 : vector<1x32x64xbf16> to vector<32x64xbf16>
    %cst_50 = arith.constant dense<0.000000e+00> : vector<128x64xf32>
    %150 = tpu.matmul %147, %149, %cst_50 {dimension_numbers = #tpu.dot_dimension_numbers<[1], [0], [0], [1], [0, 0, 1, 1], [], []>} : vector<128x32xbf16>, vector<32x64xbf16>, vector<128x64xf32> -> vector<128x64xf32>
    %c1_i32_51 = arith.constant 1 : i32
    %151 = tpu.dynamic_rotate %126 by %c1_i32_51 dim 0 : vector<128x32xf32>, i32 -> vector<128x32xf32>
    %152 = vector.broadcast %20 : vector<128x1xf32> to vector<128x32xf32>
    %153 = arith.mulf %151, %152 : vector<128x32xf32>
    %154 = arith.truncf %153 : vector<128x32xf32> to vector<128x32xbf16>
    %c0_52 = arith.constant 0 : index
    %c0_53 = arith.constant 0 : index
    %c0_54 = arith.constant 0 : index
    %155 = vector.load %arg9[%c0_52, %c0_53, %c0_54] : memref<3x32x64xbf16, #tpu.memory_space<vmem>>, vector<1x32x64xbf16>
    %156 = vector.shape_cast %155 : vector<1x32x64xbf16> to vector<32x64xbf16>
    %cst_55 = arith.constant dense<0.000000e+00> : vector<128x64xf32>
    %157 = tpu.matmul %154, %156, %cst_55 {dimension_numbers = #tpu.dot_dimension_numbers<[1], [0], [0], [1], [0, 0, 1, 1], [], []>} : vector<128x32xbf16>, vector<32x64xbf16>, vector<128x64xf32> -> vector<128x64xf32>
    %158 = arith.addf %150, %157 : vector<128x64xf32>
    %c127_i32_56 = arith.constant 127 : i32
    %159 = tpu.dynamic_rotate %126 by %c127_i32_56 dim 0 : vector<128x32xf32>, i32 -> vector<128x32xf32>
    %160 = vector.broadcast %24 : vector<128x1xf32> to vector<128x32xf32>
    %161 = arith.mulf %159, %160 : vector<128x32xf32>
    %162 = arith.truncf %161 : vector<128x32xf32> to vector<128x32xbf16>
    %c2_57 = arith.constant 2 : index
    %c0_58 = arith.constant 0 : index
    %c0_59 = arith.constant 0 : index
    %163 = vector.load %arg9[%c2_57, %c0_58, %c0_59] : memref<3x32x64xbf16, #tpu.memory_space<vmem>>, vector<1x32x64xbf16>
    %164 = vector.shape_cast %163 : vector<1x32x64xbf16> to vector<32x64xbf16>
    %cst_60 = arith.constant dense<0.000000e+00> : vector<128x64xf32>
    %165 = tpu.matmul %162, %164, %cst_60 {dimension_numbers = #tpu.dot_dimension_numbers<[1], [0], [0], [1], [0, 0, 1, 1], [], []>} : vector<128x32xbf16>, vector<32x64xbf16>, vector<128x64xf32> -> vector<128x64xf32>
    %166 = arith.addf %158, %165 : vector<128x64xf32>
    %167 = arith.addf %146, %166 : vector<128x64xf32>
    %c0_61 = arith.constant 0 : index
    %c0_62 = arith.constant 0 : index
    %168 = vector.load %arg10[%c0_61, %c0_62] : memref<1x64xf32, #tpu.memory_space<vmem>>, vector<1x64xf32>
    %169 = vector.broadcast %168 : vector<1x64xf32> to vector<128x64xf32>
    %170 = arith.addf %167, %169 : vector<128x64xf32>
    %cst_63 = arith.constant 0.000000e+00 : f32
    %171 = vector.broadcast %cst_63 : f32 to vector<128x64xf32>
    %172 = arith.cmpf ogt, %170, %171 : vector<128x64xf32>
    %cst_64 = arith.constant 0.00999999977 : f32
    %173 = vector.broadcast %cst_64 : f32 to vector<128x64xf32>
    %174 = arith.mulf %173, %170 : vector<128x64xf32>
    %175 = arith.select %172, %170, %174 : vector<128x64xi1>, vector<128x64xf32>
    %176 = arith.truncf %175 : vector<128x64xf32> to vector<128x64xbf16>
    %c1_65 = arith.constant 1 : index
    %c0_66 = arith.constant 0 : index
    %c0_67 = arith.constant 0 : index
    %177 = vector.load %arg11[%c1_65, %c0_66, %c0_67] : memref<3x64x128xbf16, #tpu.memory_space<vmem>>, vector<1x64x128xbf16>
    %178 = vector.shape_cast %177 : vector<1x64x128xbf16> to vector<64x128xbf16>
    %cst_68 = arith.constant dense<0.000000e+00> : vector<128x128xf32>
    %179 = tpu.matmul %176, %178, %cst_68 {dimension_numbers = #tpu.dot_dimension_numbers<[1], [0], [0], [1], [0, 0, 1, 1], [], []>} : vector<128x64xbf16>, vector<64x128xbf16>, vector<128x128xf32> -> vector<128x128xf32>
    %c1_i32_69 = arith.constant 1 : i32
    %180 = tpu.dynamic_rotate %175 by %c1_i32_69 dim 0 : vector<128x64xf32>, i32 -> vector<128x64xf32>
    %181 = vector.broadcast %20 : vector<128x1xf32> to vector<128x64xf32>
    %182 = arith.mulf %180, %181 : vector<128x64xf32>
    %183 = arith.truncf %182 : vector<128x64xf32> to vector<128x64xbf16>
    %c0_70 = arith.constant 0 : index
    %c0_71 = arith.constant 0 : index
    %c0_72 = arith.constant 0 : index
    %184 = vector.load %arg11[%c0_70, %c0_71, %c0_72] : memref<3x64x128xbf16, #tpu.memory_space<vmem>>, vector<1x64x128xbf16>
    %185 = vector.shape_cast %184 : vector<1x64x128xbf16> to vector<64x128xbf16>
    %cst_73 = arith.constant dense<0.000000e+00> : vector<128x128xf32>
    %186 = tpu.matmul %183, %185, %cst_73 {dimension_numbers = #tpu.dot_dimension_numbers<[1], [0], [0], [1], [0, 0, 1, 1], [], []>} : vector<128x64xbf16>, vector<64x128xbf16>, vector<128x128xf32> -> vector<128x128xf32>
    %187 = arith.addf %179, %186 : vector<128x128xf32>
    %c127_i32_74 = arith.constant 127 : i32
    %188 = tpu.dynamic_rotate %175 by %c127_i32_74 dim 0 : vector<128x64xf32>, i32 -> vector<128x64xf32>
    %189 = vector.broadcast %24 : vector<128x1xf32> to vector<128x64xf32>
    %190 = arith.mulf %188, %189 : vector<128x64xf32>
    %191 = arith.truncf %190 : vector<128x64xf32> to vector<128x64xbf16>
    %c2_75 = arith.constant 2 : index
    %c0_76 = arith.constant 0 : index
    %c0_77 = arith.constant 0 : index
    %192 = vector.load %arg11[%c2_75, %c0_76, %c0_77] : memref<3x64x128xbf16, #tpu.memory_space<vmem>>, vector<1x64x128xbf16>
    %193 = vector.shape_cast %192 : vector<1x64x128xbf16> to vector<64x128xbf16>
    %cst_78 = arith.constant dense<0.000000e+00> : vector<128x128xf32>
    %194 = tpu.matmul %191, %193, %cst_78 {dimension_numbers = #tpu.dot_dimension_numbers<[1], [0], [0], [1], [0, 0, 1, 1], [], []>} : vector<128x64xbf16>, vector<64x128xbf16>, vector<128x128xf32> -> vector<128x128xf32>
    %195 = arith.addf %187, %194 : vector<128x128xf32>
    %c0_79 = arith.constant 0 : index
    %c0_80 = arith.constant 0 : index
    %196 = vector.load %arg12[%c0_79, %c0_80] : memref<1x128xf32, #tpu.memory_space<vmem>>, vector<1x128xf32>
    %197 = vector.broadcast %196 : vector<1x128xf32> to vector<128x128xf32>
    %198 = arith.addf %195, %197 : vector<128x128xf32>
    %cst_81 = arith.constant 0.000000e+00 : f32
    %199 = vector.broadcast %cst_81 : f32 to vector<128x128xf32>
    %200 = arith.cmpf ogt, %198, %199 : vector<128x128xf32>
    %cst_82 = arith.constant 0.00999999977 : f32
    %201 = vector.broadcast %cst_82 : f32 to vector<128x128xf32>
    %202 = arith.mulf %201, %198 : vector<128x128xf32>
    %203 = arith.select %200, %198, %202 : vector<128x128xi1>, vector<128x128xf32>
    %204 = vector.shape_cast %203 : vector<128x128xf32> to vector<8x16x128xf32>
    %cst_83 = arith.constant dense<0.000000e+00> : vector<8x128xf32>
    %205 = vector.multi_reduction <add>, %204, %cst_83 [1] : vector<8x16x128xf32> to vector<8x128xf32>
    %cst_84 = arith.constant 6.250000e-02 : f32
    %206 = vector.broadcast %cst_84 : f32 to vector<8x128xf32>
    %207 = arith.mulf %205, %206 : vector<8x128xf32>
    %208 = arith.truncf %207 : vector<8x128xf32> to vector<8x128xbf16>
    %c0_85 = arith.constant 0 : index
    %c0_86 = arith.constant 0 : index
    %209 = vector.load %arg13[%c0_85, %c0_86] : memref<128x256xbf16, #tpu.memory_space<vmem>>, vector<128x256xbf16>
    %cst_87 = arith.constant dense<0.000000e+00> : vector<8x256xf32>
    %210 = tpu.matmul %208, %209, %cst_87 {dimension_numbers = #tpu.dot_dimension_numbers<[1], [0], [0], [1], [0, 0, 1, 1], [], []>} : vector<8x128xbf16>, vector<128x256xbf16>, vector<8x256xf32> -> vector<8x256xf32>
    %c0_88 = arith.constant 0 : index
    %c0_89 = arith.constant 0 : index
    %211 = vector.load %arg14[%c0_88, %c0_89] : memref<1x256xf32, #tpu.memory_space<vmem>>, vector<1x256xf32>
    %212 = vector.broadcast %211 : vector<1x256xf32> to vector<8x256xf32>
    %213 = arith.addf %210, %212 : vector<8x256xf32>
    %cst_90 = arith.constant 0.000000e+00 : f32
    %214 = vector.broadcast %cst_90 : f32 to vector<8x256xf32>
    %215 = arith.cmpf ogt, %213, %214 : vector<8x256xf32>
    %cst_91 = arith.constant 0.00999999977 : f32
    %216 = vector.broadcast %cst_91 : f32 to vector<8x256xf32>
    %217 = arith.mulf %216, %213 : vector<8x256xf32>
    %218 = arith.select %215, %213, %217 : vector<8x256xi1>, vector<8x256xf32>
    %219 = arith.truncf %218 : vector<8x256xf32> to vector<8x256xbf16>
    %c0_92 = arith.constant 0 : index
    %c0_93 = arith.constant 0 : index
    %220 = vector.load %arg15[%c0_92, %c0_93] : memref<256x256xbf16, #tpu.memory_space<vmem>>, vector<256x256xbf16>
    %cst_94 = arith.constant dense<0.000000e+00> : vector<8x256xf32>
    %221 = tpu.matmul %219, %220, %cst_94 {dimension_numbers = #tpu.dot_dimension_numbers<[1], [0], [0], [1], [0, 0, 1, 1], [], []>} : vector<8x256xbf16>, vector<256x256xbf16>, vector<8x256xf32> -> vector<8x256xf32>
    %c0_95 = arith.constant 0 : index
    %c0_96 = arith.constant 0 : index
    %222 = vector.load %arg16[%c0_95, %c0_96] : memref<1x256xf32, #tpu.memory_space<vmem>>, vector<1x256xf32>
    %223 = vector.broadcast %222 : vector<1x256xf32> to vector<8x256xf32>
    %224 = arith.addf %221, %223 : vector<8x256xf32>
    %cst_97 = arith.constant 0.000000e+00 : f32
    %225 = vector.broadcast %cst_97 : f32 to vector<8x256xf32>
    %226 = arith.maximumf %224, %225 : vector<8x256xf32>
    %227 = arith.truncf %226 : vector<8x256xf32> to vector<8x256xbf16>
    %c0_98 = arith.constant 0 : index
    %c0_99 = arith.constant 0 : index
    %228 = vector.load %arg17[%c0_98, %c0_99] : memref<256x128xbf16, #tpu.memory_space<vmem>>, vector<256x128xbf16>
    %cst_100 = arith.constant dense<0.000000e+00> : vector<8x128xf32>
    %229 = tpu.matmul %227, %228, %cst_100 {dimension_numbers = #tpu.dot_dimension_numbers<[1], [0], [0], [1], [0, 0, 1, 1], [], []>} : vector<8x256xbf16>, vector<256x128xbf16>, vector<8x128xf32> -> vector<8x128xf32>
    %c0_101 = arith.constant 0 : index
    %c0_102 = arith.constant 0 : index
    %230 = vector.load %arg18[%c0_101, %c0_102] : memref<1x128xf32, #tpu.memory_space<vmem>>, vector<1x128xf32>
    %231 = vector.broadcast %230 : vector<1x128xf32> to vector<8x128xf32>
    %232 = arith.addf %229, %231 : vector<8x128xf32>
    %cst_103 = arith.constant 0.000000e+00 : f32
    %233 = vector.broadcast %cst_103 : f32 to vector<8x128xf32>
    %234 = arith.subf %233, %232 : vector<8x128xf32>
    %235 = math.exp %234 : vector<8x128xf32>
    %cst_104 = arith.constant 1.000000e+00 : f32
    %236 = vector.broadcast %cst_104 : f32 to vector<8x128xf32>
    %237 = arith.addf %236, %235 : vector<8x128xf32>
    %cst_105 = arith.constant 1.000000e+00 : f32
    %238 = vector.broadcast %cst_105 : f32 to vector<8x128xf32>
    %239 = arith.divf %238, %237 : vector<8x128xf32>
    %c0_106 = arith.constant 0 : index
    %c0_107 = arith.constant 0 : index
    %240 = vector.load %arg19[%c0_106, %c0_107] : memref<8x128xf32, #tpu.memory_space<vmem>>, vector<8x128xf32>
    tpu.vector_store %arg19[%c0_106, %c0_107], %239 {strides = array<i32>} : memref<8x128xf32, #tpu.memory_space<vmem>>, vector<8x128xf32>,
    return
  }
  func.func @transform_0(%arg0: i32) -> (i32, i32) {
    %c0_i32 = arith.constant 0 : i32
    %c0_i32_0 = arith.constant 0 : i32
    return %arg0, %c0_i32 : i32, i32
  }
  func.func @transform_1(%arg0: i32) -> (i32, i32) {
    %c0_i32 = arith.constant 0 : i32
    %c0_i32_0 = arith.constant 0 : i32
    return %arg0, %c0_i32 : i32, i32
  }
  func.func @transform_2(%arg0: i32) -> (i32, i32) {
    %c0_i32 = arith.constant 0 : i32
    %c0_i32_0 = arith.constant 0 : i32
    %c0_i32_1 = arith.constant 0 : i32
    return %c0_i32, %c0_i32_0 : i32, i32
  }
  func.func @transform_3(%arg0: i32) -> (i32, i32) {
    %c0_i32 = arith.constant 0 : i32
    %c0_i32_0 = arith.constant 0 : i32
    %c0_i32_1 = arith.constant 0 : i32
    return %c0_i32, %c0_i32_0 : i32, i32
  }
  func.func @transform_4(%arg0: i32) -> (i32, i32) {
    %c0_i32 = arith.constant 0 : i32
    %c0_i32_0 = arith.constant 0 : i32
    %c0_i32_1 = arith.constant 0 : i32
    return %c0_i32, %c0_i32_0 : i32, i32
  }
  func.func @transform_5(%arg0: i32) -> (i32, i32, i32) {
    %c0_i32 = arith.constant 0 : i32
    %c0_i32_0 = arith.constant 0 : i32
    %c0_i32_1 = arith.constant 0 : i32
    %c0_i32_2 = arith.constant 0 : i32
    return %c0_i32, %c0_i32_0, %c0_i32_1 : i32, i32, i32
  }
  func.func @transform_6(%arg0: i32) -> (i32, i32) {
    %c0_i32 = arith.constant 0 : i32
    %c0_i32_0 = arith.constant 0 : i32
    %c0_i32_1 = arith.constant 0 : i32
    return %c0_i32, %c0_i32_0 : i32, i32
  }
  func.func @transform_7(%arg0: i32) -> (i32, i32, i32) {
    %c0_i32 = arith.constant 0 : i32
    %c0_i32_0 = arith.constant 0 : i32
    %c0_i32_1 = arith.constant 0 : i32
    %c0_i32_2 = arith.constant 0 : i32
    return %c0_i32, %c0_i32_0, %c0_i32_1 : i32, i32, i32
  }
  func.func @transform_8(%arg0: i32) -> (i32, i32, i32) {
    %c0_i32 = arith.constant 0 : i32
    %c0_i32_0 = arith.constant 0 : i32
    %c0_i32_1 = arith.constant 0 : i32
    %c0_i32_2 = arith.constant 0 : i32
    return %c0_i32, %c0_i32_0, %c0_i32_1 : i32, i32, i32
  }
  func.func @transform_9(%arg0: i32) -> (i32, i32) {
    %c0_i32 = arith.constant 0 : i32
    %c0_i32_0 = arith.constant 0 : i32
    %c0_i32_1 = arith.constant 0 : i32
    return %c0_i32, %c0_i32_0 : i32, i32
  }
  func.func @transform_10(%arg0: i32) -> (i32, i32, i32) {
    %c0_i32 = arith.constant 0 : i32
    %c0_i32_0 = arith.constant 0 : i32
    %c0_i32_1 = arith.constant 0 : i32
    %c0_i32_2 = arith.constant 0 : i32
    return %c0_i32, %c0_i32_0, %c0_i32_1 : i32, i32, i32
  }
  func.func @transform_11(%arg0: i32) -> (i32, i32) {
    %c0_i32 = arith.constant 0 : i32
    %c0_i32_0 = arith.constant 0 : i32
    %c0_i32_1 = arith.constant 0 : i32
    return %c0_i32, %c0_i32_0 : i32, i32
  }
  func.func @transform_12(%arg0: i32) -> (i32, i32) {
    %c0_i32 = arith.constant 0 : i32
    %c0_i32_0 = arith.constant 0 : i32
    %c0_i32_1 = arith.constant 0 : i32
    return %c0_i32, %c0_i32_0 : i32, i32
  }
  func.func @transform_13(%arg0: i32) -> (i32, i32) {
    %c0_i32 = arith.constant 0 : i32
    %c0_i32_0 = arith.constant 0 : i32
    %c0_i32_1 = arith.constant 0 : i32
    return %c0_i32, %c0_i32_0 : i32, i32
  }
  func.func @transform_14(%arg0: i32) -> (i32, i32) {
    %c0_i32 = arith.constant 0 : i32
    %c0_i32_0 = arith.constant 0 : i32
    %c0_i32_1 = arith.constant 0 : i32
    return %c0_i32, %c0_i32_0 : i32, i32
  }
  func.func @transform_15(%arg0: i32) -> (i32, i32) {
    %c0_i32 = arith.constant 0 : i32
    %c0_i32_0 = arith.constant 0 : i32
    %c0_i32_1 = arith.constant 0 : i32
    return %c0_i32, %c0_i32_0 : i32, i32
  }
  func.func @transform_16(%arg0: i32) -> (i32, i32) {
    %c0_i32 = arith.constant 0 : i32
    %c0_i32_0 = arith.constant 0 : i32
    %c0_i32_1 = arith.constant 0 : i32
    return %c0_i32, %c0_i32_0 : i32, i32
  }
  func.func @transform_17(%arg0: i32) -> (i32, i32) {
    %c0_i32 = arith.constant 0 : i32
    %c0_i32_0 = arith.constant 0 : i32
    %c0_i32_1 = arith.constant 0 : i32
    return %c0_i32, %c0_i32_0 : i32, i32
  }
  func.func @transform_18(%arg0: i32) -> (i32, i32) {
    %c0_i32 = arith.constant 0 : i32
    %c0_i32_0 = arith.constant 0 : i32
    return %arg0, %c0_i32 : i32, i32
  }
}

</mosaic_0001>

<bundles_post_ra>
// kernel: tpu_custom_call.1
= control target key start
LH: loop header
LB: loop body
LE: loop exit
PB: predicated region body
PF: predicated region fallthrough
CT: control target
= control target key end

     0   :  { %s9350_s0 = inlined_call_operand.vmem [shape: f32[256,1], index: 0, kind: input, shape index: {}]   ;;  %s9351_s1 = inlined_call_operand.vmem [shape: s32[256,1], index: 1, kind: input, shape index: {}]   ;;  %s9352_s2 = inlined_call_operand.hbm [shape: f32[5,32], index: 2, kind: input, shape index: {}]   ;;  %s9353_s3 = inlined_call_operand.vmem [shape: f32[3,32], index: 3, kind: input, shape index: {}]   ;;  %s9354_s4 = inlined_call_operand.vmem [shape: f32[1,32], index: 4, kind: input, shape index: {}]   ;;  %s9355_s5 = inlined_call_operand.hbm [shape: bf16[3,32,32], index: 5, kind: input, shape index: {}]   ;;  %s9356_s6 = inlined_call_operand.vmem [shape: f32[1,32], index: 6, kind: input, shape index: {}]   ;;  %s9357_s7 = inlined_call_operand.hbm [shape: bf16[3,32,64], index: 7, kind: input, shape index: {}]   ;;  %s9358_s8 = inlined_call_operand.hbm [shape: bf16[3,32,64], index: 8, kind: input, shape index: {}]   ;;  %s9359_s9 = inlined_call_operand.vmem [shape: f32[1,64], index: 9, kind: input, shape index: {}]   ;;  %s9360_s10 = inlined_call_operand.hbm [shape: bf16[3,64,128], index: 10, kind: input, shape index: {}]   ;;  %s9361_s11 = inlined_call_operand.vmem [shape: f32[1,128], index: 11, kind: input, shape index: {}]   ;;  %s9362_s12 = inlined_call_operand.vmem [shape: bf16[128,256], index: 12, kind: input, shape index: {}]   ;;  %s9363_s13 = inlined_call_operand.vmem [shape: f32[1,256], index: 13, kind: input, shape index: {}]   ;;  %s9364_s14 = inlined_call_operand.vmem [shape: bf16[256,256], index: 14, kind: input, shape index: {}]   ;;  %s9365_s15 = inlined_call_operand.vmem [shape: f32[1,256], index: 15, kind: input, shape index: {}]   ;;  %s9366_s16 = inlined_call_operand.vmem [shape: bf16[256,128], index: 16, kind: input, shape index: {}]   ;;  %s9367_s17 = inlined_call_operand.vmem [shape: f32[1,128], index: 17, kind: input, shape index: {}]   ;;  %s9368_s18 = inlined_call_operand.hbm [shape: f32[16,128], index: 18, kind: output, shape index: {}]  }
   0x1   :  { %9424 = sst [smem:[#allocation49_spill]] %s9350_s0 }
   0x2   :  { %9425 = sst [smem:[#allocation50_spill]] %s9351_s1 }
   0x3   :  { %9426 = sst [smem:[#allocation51_spill]] %s9352_s2 }
   0x4   :  { %9427 = sst [smem:[#allocation52_spill]] %s9368_s18 }
   0x5   :  { %23 = vsyncpa [#allocation3], 0 }
   0x6   :  { %24 = vsyncpa [#allocation6], 0 }
   0x7   :  { %25 = vsyncpa [#allocation9], 0 }
   0x8   :  { %26 = vsyncpa [#allocation4], 0 }
   0x9   :  { %28 = vsyncpa [#allocation4 + $0x1], 0  ;;  %s7057_s27 = smov 0   ;;  %s7059_s28 = smov 0  }
   0xa   :  { %s7061_s29 = smov 0   ;;  %s7063_s30 = smov 0  }
   0xb LB: > { %9428 = sst [smem:[#allocation16_spill]] %s6938_s27  ;;  %s7078_s0 = sadd.s32 4294967295, %s6950_s30   ;;  %s6950_s30 = sphi %s7063_s30, %s9539_s30   ;;  %s6946_s29 = sphi %s7061_s29, %s9541_s29   ;;  %s6942_s28 = sphi %s7059_s28, %s9543_s28   ;;  %s6938_s27 = sphi %s7057_s27, %s9542_s27  }
   0xc   : > { %9429 = sst [smem:[#allocation17_spill]] %s6946_s29  ;;  %s5616_s19 = sadd.s32 4294967294, %s6950_s30  }
   0xd   : > { %9430 = sst [smem:[#allocation18_spill]] %s6950_s30  ;;  %s7082_s1 = sadd.s32 1, %s6950_s30  }
   0xe   : > { %9431 = sst [smem:[#allocation19_spill]] %s7082_s1  ;;  %s429_s20 = sadd.s32 1, %s6946_s29 }
   0xf   : > { %s426_s21 = ssub.s32 %s6950_s30, %s7082_s1  ;;  %p439_p0 = scmp.ne.s32.totalorder %s6946_s29, %s6942_s28 }
  0x10   : > { %p427_p1 = scmp.eq.s32.totalorder %s426_s21, 0  ;;  %p440_p2 = scmp.eq.s32.totalorder %s7078_s0, 1 }
  0x11   : > { %p445_p3 = scmp.ne.s32.totalorder %s6942_s28, %s6938_s27  ;;  %p446_p4 = scmp.eq.s32.totalorder %s5616_s19, 1 }
  0x12   : > { %s7093_s22 = scalar_select %p427_p1, %s6946_s29, %s429_s20  }
  0x13   : > { %p7095_p5 = por %p440_p2, %p439_p0  ;;  %p7099_p6 = por %p446_p4, %p445_p3 }
  0x14   : > { %9432 = sst [smem:[#allocation20_spill]] %s7093_s22  ;;  %p5617_p7 = scmp.ge.s32.totalorder %s6950_s30, 1 }
  0x15   : > { %s9434_s23 = scalar_select %p7099_p6, 1, 0 }
  0x16   : > { %p453_p8 = scmp.lt.s32.totalorder %s6950_s30, 3  ;;  %p9376_p9 = scmp.eq.s32.totalorder %s7078_s0, 0 }
  0x17   : > { %9435 = sst [smem:[#allocation21_spill]] %s9434_s23  ;;  %s6952_s25 = smov [#allocation5]  }
  0x18   : > { %p7106_p10 = pnand %p5617_p7, %p453_p8  ;;  %s482_s26 = sshll.u32 %s6952_s25, 4  ;;  %s483_s26 = int_to_ptr.vmem [resolvable:$true] %s482_s26 }
  0x19   : > { %s6953_s20 = smov [#allocation8]   ;;  %s6954_s22 = smov [#allocation2]  }
  0x1a   : > { %p6352_p11 = pneg %p7106_p10  ;;  %s511_s21 = sshll.u32 %s6953_s20, 4  ;;  %s512_s21 = int_to_ptr.vmem [resolvable:$true] %s511_s21 }
  0x1b   : > { %s466_s29 = sshll.u32 %s6954_s22, 4  ;;  %s6759_s25 = scalar_lea.vmem %s483_s26, 768  ;;  %s467_s29 = int_to_ptr.vmem [resolvable:$true] %s466_s29 }
  0x1c   : > { %p7114_p12 = pnand %p9376_p9, %p6352_p11  ;;  %p6760_p0 = scmp.ne.s32.totalorder %s483_s26, %s6759_s25 }
  0x1d   : > { %p6767_p3 = scmp.lt.s32.totalorder %s483_s26, %s483_s26  ;;  %p6768_p4 = scmp.lt.s32.totalorder %s6759_s25, %s6759_s25 }
  0x1e   : > { %p7120_p13 = pneg %p7114_p12 }
  0x1f   : > { %p6769_p7 = por %p6768_p4, %p6767_p3 }
  0x20   : > { %p6762_p1 = pnand %p6760_p0, %p7120_p13 }
  0x22   : > { %p6763_p2 = pneg %p6762_p1 }
  0x24   : > { %p6770_p8 = pnand %p6769_p7, %p6763_p2 }
  0x26   : > { %6773 = shalt.err (!%p6770_p8)
}
  0x27   : > { %s9377_s20 = smov 64   ;;  %s9379_s22 = smov 4  }
  0x28   : > { %6358 = dma.hbm_to_vmem [thread:$0]  (!%p7114_p12), %s9355_s5, 768, %s483_s26, [#allocation6], %s9377_s20, %s9377_s20, %s9379_s22  }
  0x29   : > { %s6785_s30 = scalar_lea.vmem %s512_s21, 768  ;;  %p6793_p3 = scmp.lt.s32.totalorder %s512_s21, %s512_s21 }
  0x2a   : > { %p6786_p11 = scmp.ne.s32.totalorder %s512_s21, %s6785_s30  ;;  %p6794_p2 = scmp.lt.s32.totalorder %s6785_s30, %s6785_s30 }
  0x2c   : > { %p6788_p0 = pnand %p6786_p11, %p7120_p13  ;;  %p6795_p4 = por %p6794_p2, %p6793_p3 }
  0x2e   : > { %p6789_p1 = pneg %p6788_p0 }
  0x30   : > { %p6796_p7 = pnand %p6795_p4, %p6789_p1 }
  0x32   : > { %6799 = shalt.err (!%p6796_p7)
}
  0x33   : > { %6364 = dma.hbm_to_vmem [thread:$0]  (!%p7114_p12), %s9358_s8, 768, %s512_s21, [#allocation9], %s9377_s20, %s9377_s20, %s9379_s22  }
  0x34   : > { %s6811_s27 = scalar_lea.vmem %s467_s29, 128  ;;  %p6819_p9 = scmp.lt.s32.totalorder %s467_s29, %s467_s29 }
  0x35   : > { %p6812_p8 = scmp.ne.s32.totalorder %s467_s29, %s6811_s27  ;;  %p6820_p3 = scmp.lt.s32.totalorder %s6811_s27, %s6811_s27 }
  0x37   : > { %p6814_p11 = pnand %p6812_p8, %p7120_p13  ;;  %p6821_p1 = por %p6820_p3, %p6819_p9 }
  0x39   : > { %p6815_p0 = pneg %p6814_p11 }
  0x3b   : > { %p6822_p2 = pnand %p6821_p1, %p6815_p0 }
  0x3d   : > { %6825 = shalt.err (!%p6822_p2)
}
  0x3e   : > { %s9439_s26 = sld [smem:[#allocation51_spill]]  ;;  %s6957_s18 = smov [#allocation7]  }
  0x3f   : > { %s498_s21 = sshll.u32 %s6957_s18, 4  ;;  %s6958_s25 = smov [#allocation10]   ;;  %s499_s21 = int_to_ptr.vmem [resolvable:$true] %s498_s21 }
  0x40   : > { %s527_s20 = sshll.u32 %s6958_s25, 4  ;;  %s6837_s22 = scalar_lea.vmem %s499_s21, 768  ;;  %s528_s20 = int_to_ptr.vmem [resolvable:$true] %s527_s20 }
  0x41   : > { %p6838_p4 = scmp.ne.s32.totalorder %s499_s21, %s6837_s22  ;;  %p6845_p9 = scmp.lt.s32.totalorder %s499_s21, %s499_s21 }
  0x42   : > { %p6846_p11 = scmp.lt.s32.totalorder %s6837_s22, %s6837_s22 }
  0x43   : > { %p6840_p7 = pnand %p6838_p4, %p7120_p13 }
  0x44   : > { %6355 = dma.hbm_to_vmem [thread:$0]  (!%p7114_p12), %s9439_s26, 128, %s467_s29, [#allocation3]  }
  0x45   : > { %p6841_p8 = pneg %p6840_p7  ;;  %p6847_p0 = por %p6846_p11, %p6845_p9 }
  0x47   : > { %p6848_p3 = pnand %p6847_p0, %p6841_p8 }
  0x49   : > { %6851 = shalt.err (!%p6848_p3)
}
  0x4a   : > { %s9440_s27 = smov 4   ;;  %s9441_s30 = smov 64  }
  0x4b   : > { %6361 = dma.hbm_to_vmem [thread:$0]  (!%p7114_p12), %s9357_s7, 768, %s499_s21, [#allocation6], %s9441_s30, %s9441_s30, %s9440_s27  }
  0x4c   : > { %s6863_s26 = scalar_lea.vmem %s528_s20, 1536  ;;  %p6871_p7 = scmp.lt.s32.totalorder %s528_s20, %s528_s20 }
  0x4d   : > { %p6864_p1 = scmp.ne.s32.totalorder %s528_s20, %s6863_s26  ;;  %p6872_p9 = scmp.lt.s32.totalorder %s6863_s26, %s6863_s26 }
  0x4f   : > { %p6866_p2 = pnand %p6864_p1, %p7120_p13  ;;  %p6873_p8 = por %p6872_p9, %p6871_p7 }
  0x51   : > { %p6867_p4 = pneg %p6866_p2 }
  0x53   : > { %p6874_p11 = pnand %p6873_p8, %p6867_p4 }
  0x55   : > { %6877 = shalt.err (!%p6874_p11)
}
  0x56   : > { %6367 = dma.hbm_to_vmem [thread:$0]  (!%p7114_p12), %s9360_s10, 1536, %s528_s20, [#allocation9], %s9441_s30, %s9441_s30, %s9440_s27  }
  0x57   : > { %582 = sbr.rel (%p7106_p10) target bundleno = 1787 (0x6fb), region = 92 }
  0x5c   : > { %p9442_p13 = scmp.eq.s32.totalorder %s7078_s0, 0 }
  0x5e   : > { %6921 = dma.done.wait (%p9442_p13), [#allocation3], 128   ;;  %p9443_p0 = pmov %p9442_p13 }
  0x60   : > { %6923 = vsyncadd (%p9443_p0), [#allocation3], 4294967168  ;;  %p9444_p3 = pmov %p9443_p0 }
  0x61   : > { %p9445_p1 = pmov %p9443_p0 }
  0x62   : > { %6925 = dma.done.wait (%p9444_p3), [#allocation6], 1536  }
  0x63   : > { %6927 = vsyncadd (%p9445_p1), [#allocation6], 4294965760  ;;  %p9446_p2 = pmov %p9443_p0 }
  0x64   : > { %p9447_p12 = pmov %p9443_p0 }
  0x65   : > { %6929 = dma.done.wait (%p9446_p2), [#allocation9], 2304  }
  0x66   : > { %6931 = vsyncadd (%p9447_p12), [#allocation9], 4294964992  ;;  %s5631_s1 = sshll.u32 %s7078_s0, 4  ;;  %v9381_v0 = vmov 0   ;;  %s9448_s21 = sld [smem:[#allocation50_spill]]  ;;  %v9385_v5 = vmov 0.0  }
  0x67   : > { %6435 = vset.pattern.permute.xlu1 %v9381_v0  ;;  %6424 = vset.pattern.permute.xlu0 %v9381_v0  ;;  %p658_p10 = scmp.lt.s32.totalorder %s5631_s1, 31  ;;  %v6626_v57 = vld [vmem:[#allocation5 + $0x18] sm:$0xff]   ;;  %s9450_s29 = sld [smem:[#allocation49_spill]] }
  0x68   : > { %6098 = vmatprep.subr.bf16.mxu1 %v6626_v57  ;;  %s654_s22 = sand.u32 1, %s6942_s28  }
  0x69   : > { %s9545_s1 = smov (!%p658_p10, %s5631_s1), 31  ;;  %6099 = vmatpush3.bf16.msra.mxu1 %v6626_v57  ;;  %s5630_s18 = sshll.u32 %s654_s22, 3 }
  0x6a   : > { %s5632_s24 = sshll.u32 %s9545_s1, 3  ;;  %s5927_s1 = sshll.u32 %s7078_s0, 7 }
  0x6b   : > { %s5482_s30 = scalar_lea.sflag [#allocation4], %s654_s22 }
  0x6c   : > { %s7196_s25 = scalar_lea.vmem %s9448_s21, %s5632_s24 }
  0x6d   : > { %v7199_v1 = vld [vmem:[%s7196_s25 + $0x8] sm:$0xff]  ;;  %v7202_v2 = vld [vmem:[%s7196_s25 + $0x10] sm:$0xff]  ;;  %v1493_v3 = vld [vmem:[%s7196_s25] sm:$0xff]  ;;  %s7396_s23 = scalar_lea.vmem %s9450_s29, %s5632_s24  ;;  %s656_s24 = scalar_lea.vmem [#allocation11], %s5630_s18 }
  0x6e   : > { %vm1511_vm0 = vcmp.eq.s32.totalorder %v7199_v1, 0  ;;  %vm1512_vm1 = vcmp.eq.s32.totalorder %v7202_v2, 0  ;;  %v7208_v4 = vld [vmem:[%s7196_s25 + $0x78] sm:$0xff]  ;;  %vm1510_vm2 = vcmp.eq.s32.totalorder %v1493_v3, 0  ;;  %vm1659_vm3 = vcmp.eq.s32.totalorder %v7199_v1, 1  ;;  %v7247_v34 = vld [vmem:[%s7196_s25 + $0x28] sm:$0xff] }
  0x6f   : > { %v5653_v6 = vsel %vm1511_vm0, 1.0, %v9385_v5  ;;  %v5654_v7 = vsel %vm1512_vm1, 1.0, %v9385_v5  ;;  %vm1525_vm4 = vcmp.eq.s32.totalorder %v7208_v4, 0  ;;  %v5652_v8 = vsel %vm1510_vm2, 1.0, %v9385_v5  ;;  %v7216_v9 = vld [vmem:[%s7196_s25 + $0x18] sm:$0xff]  ;;  %v7254_v36 = vld [vmem:[%s7196_s25 + $0x30] sm:$0xff] }
  0x70   : > { %v6436_v10 = vpack.i.bf16 %v5654_v7, %v5653_v6  ;;  %v5667_v11 = vsel %vm1525_vm4, 1.0, %v9385_v5  ;;  %vm1660_vm5 = vcmp.eq.s32.totalorder %v7202_v2, 1  ;;  %v5669_v12 = vsel %vm1659_vm3, 1.0, %v9385_v5  ;;  %v7257_v38 = vld [vmem:[%s7196_s25 + $0x20] sm:$0xff]  ;;  %v7276_v50 = vld [vmem:[%s7196_s25 + $0x38] sm:$0xff]  ;;  %s5495_s19 = sshll.u32 %s656_s24, 4  ;;  %s5496_s19 = int_to_ptr.vmem [resolvable:$true] %s5495_s19 }
  0x71   : > { %v6425_v13 = vpack.i.bf16 %v5667_v11, %v5652_v8  ;;  %v5670_v14 = vsel %vm1660_vm5, 1.0, %v9385_v5  ;;  %vm1658_vm6 = vcmp.eq.s32.totalorder %v1493_v3, 1  ;;  %vm1673_vm7 = vcmp.eq.s32.totalorder %v7208_v4, 1  ;;  %v7302_v11 = vld [vmem:[%s7196_s25 + $0x50] sm:$0xff]  ;;  %s6878_s29 = scalar_lea.vmem %s5496_s19, 128 }
  0x72   : > { %6437 = vperm.xlu1 %6435, %v6436_v10   ;;  %v6441_v15 = vpack.i.bf16 %v5670_v14, %v5669_v12  ;;  %v5668_v16 = vsel %vm1658_vm6, 1.0, %v9385_v5  ;;  %v5683_v17 = vsel %vm1673_vm7, 1.0, %v9385_v5  ;;  %vm1513_vm8 = vcmp.eq.s32.totalorder %v7216_v9, 0  ;;  %v7299_v10 = vld [vmem:[%s7196_s25 + $0x48] sm:$0xff]  ;;  %v7309_v12 = vld [vmem:[%s7196_s25 + $0x40] sm:$0xff]  ;;  %p6879_p4 = scmp.ne.s32.totalorder %s5496_s19, %s6878_s29 }
  0x73   : > { %6426 = vperm.xlu0 %6424, %v6425_v13   ;;  %v6430_v18 = vpack.i.bf16 %v5683_v17, %v5668_v16  ;;  %v5655_v19 = vsel %vm1513_vm8, 1.0, %v9385_v5  ;;  %vm1661_vm9 = vcmp.eq.s32.totalorder %v7216_v9, 1  ;;  %vm1822_vm10 = vcmp.eq.s32.totalorder %v1493_v3, 2 }
  0x74   : > { %v5671_v20 = vsel %vm1661_vm9, 1.0, %v9385_v5  ;;  %vm1837_vm11 = vcmp.eq.s32.totalorder %v7208_v4, 2  ;;  %v5684_v21 = vsel %vm1822_vm10, 1.0, %v9385_v5  ;;  %vm1986_vm12 = vcmp.eq.s32.totalorder %v1493_v3, 3  ;;  %p6880_p7 = pnand %p6879_p4, %p7095_p5 }
  0x75   : > { %v5699_v22 = vsel %vm1837_vm11, 1.0, %v9385_v5  ;;  %vm2001_vm13 = vcmp.eq.s32.totalorder %v7208_v4, 3  ;;  %v6451_v23 = vpack.i.bf16 %v5671_v20, %v5655_v19  ;;  %v5700_v24 = vsel %vm1986_vm12, 1.0, %v9385_v5  ;;  %v6629_v19 = vld [vmem:[#allocation5] sm:$0xff]  }
  0x76   : > { %6442 = vperm.xlu1 %6435, %v6441_v15   ;;  %vm1823_vm14 = vcmp.eq.s32.totalorder %v7199_v1, 2  ;;  %vm1824_vm15 = vcmp.eq.s32.totalorder %v7202_v2, 2  ;;  %v6446_v25 = vpack.i.bf16 %v5699_v22, %v5684_v21  ;;  %v5715_v26 = vsel %vm2001_vm13, 1.0, %v9385_v5  ;;  %p6881_p9 = pneg %p6880_p7 }
  0x77   : > { %6431 = vperm.xlu0 %6424, %v6430_v18   ;;  %v5685_v27 = vsel %vm1823_vm14, 1.0, %v9385_v5  ;;  %vm1988_vm0 = vcmp.eq.s32.totalorder %v7202_v2, 3  ;;  %v5686_v28 = vsel %vm1824_vm15, 1.0, %v9385_v5  ;;  %vm2150_vm1 = vcmp.eq.s32.totalorder %v1493_v3, 4 }
  0x78   : > { %vm1825_vm2 = vcmp.eq.s32.totalorder %v7216_v9, 2  ;;  %vm1987_vm3 = vcmp.eq.s32.totalorder %v7199_v1, 3  ;;  %v6461_v29 = vpack.i.bf16 %v5715_v26, %v5700_v24  ;;  %v5702_v30 = vsel %vm1988_vm0, 1.0, %v9385_v5 }
  0x79   : > { %v6456_v31 = vpack.i.bf16 %v5686_v28, %v5685_v27  ;;  %v5716_v32 = vsel %vm2150_vm1, 1.0, %v9385_v5  ;;  %v5687_v33 = vsel %vm1825_vm2, 1.0, %v9385_v5  ;;  %vm2151_vm4 = vcmp.eq.s32.totalorder %v7199_v1, 4  ;;  %v6627_v1 = vld [vmem:[#allocation5 + $0x8] sm:$0xff]   ;;  %v7328_v27 = vld [vmem:[%s7196_s25 + $0x58] sm:$0xff] }
  0x7a   : > { %6452 = vperm.xlu1 %6435, %v6451_v23   ;;  %v5701_v35 = vsel %vm1987_vm3, 1.0, %v9385_v5  ;;  %vm2152_vm5 = vcmp.eq.s32.totalorder %v7202_v2, 4  ;;  %vm1989_vm6 = vcmp.eq.s32.totalorder %v7216_v9, 3  ;;  %vm2165_vm7 = vcmp.eq.s32.totalorder %v7208_v4, 4  ;;  %v6628_v4 = vld [vmem:[#allocation5 + $0x10] sm:$0xff]   ;;  %6078 = vmatprep.subr.bf16.mxu0 %v6627_v1 }
  0x7b   : > { %6447 = vperm.xlu0 %6424, %v6446_v25   ;;  %v6471_v37 = vpack.i.bf16 %v5716_v32, %v5702_v30  ;;  %v6466_v39 = vpack.i.bf16 %v5701_v35, %v5687_v33  ;;  %v5717_v40 = vsel %vm2151_vm4, 1.0, %v9385_v5  ;;  %v5718_v41 = vsel %vm2152_vm5, 1.0, %v9385_v5  ;;  %6079 = vmatpush3.bf16.msra.mxu0 %v6627_v1 }
  0x7c   : > { %v5703_v42 = vsel %vm1989_vm6, 1.0, %v9385_v5  ;;  %v5731_v43 = vsel %vm2165_vm7, 1.0, %v9385_v5  ;;  %vm1515_vm8 = vcmp.eq.s32.totalorder %v7247_v34, 0  ;;  %vm1516_vm9 = vcmp.eq.s32.totalorder %v7254_v36, 0  ;;  %6100 = vmatprep.subr.bf16.mxu1 %v6628_v4  ;;  %6080 = vmatprep.subr.bf16.mxu0 %v6629_v19 }
  0x7d   : > { %vm1514_vm10 = vcmp.eq.s32.totalorder %v7257_v38, 0  ;;  %vm1662_vm11 = vcmp.eq.s32.totalorder %v7257_v38, 1  ;;  %v6481_v44 = vpack.i.bf16 %v5718_v41, %v5717_v40  ;;  %v6476_v45 = vpack.i.bf16 %v5703_v42, %v5731_v43  ;;  %6101 = vmatpush3.bf16.msra.mxu1 %v6628_v4  ;;  %v7347_v40 = vld [vmem:[%s7196_s25 + $0x68] sm:$0xff] }
  0x7e   : > { %6462 = vperm.xlu1 %6435, %v6461_v29   ;;  %v5657_v46 = vsel %vm1515_vm8, 1.0, %v9385_v5  ;;  %v5658_v47 = vsel %vm1516_vm9, 1.0, %v9385_v5  ;;  %vm1826_vm12 = vcmp.eq.s32.totalorder %v7257_v38, 2  ;;  %v5656_v48 = vsel %vm1514_vm10, 1.0, %v9385_v5 }
  0x7f   : > { %6457 = vperm.xlu0 %6424, %v6456_v31   ;;  %v5672_v49 = vsel %vm1662_vm11, 1.0, %v9385_v5  ;;  %vm2153_vm13 = vcmp.eq.s32.totalorder %v7216_v9, 4  ;;  %vm1663_vm14 = vcmp.eq.s32.totalorder %v7247_v34, 1  ;;  %vm1664_vm15 = vcmp.eq.s32.totalorder %v7254_v36, 1  ;;  %6081 = vmatpush3.bf16.msra.mxu0 %v6629_v19 }
  0x80   : > { %v6491_v51 = vpack.i.bf16 %v5658_v47, %v5657_v46  ;;  %v5688_v52 = vsel %vm1826_vm12, 1.0, %v9385_v5  ;;  %v6486_v53 = vpack.i.bf16 %v5672_v49, %v5656_v48  ;;  %v5719_v54 = vsel %vm2153_vm13, 1.0, %v9385_v5  ;;  %v7355_v47 = vld [vmem:[%s7196_s25 + $0x70] sm:$0xff]  ;;  %v7363_v49 = vld [vmem:[%s7196_s25 + $0x60] sm:$0xff]  ;;  %s9535_s25 = sld [smem:[#allocation52_spill]] }
  0x81   : > { %vm1827_vm0 = vcmp.eq.s32.totalorder %v7247_v34, 2  ;;  %vm1828_vm1 = vcmp.eq.s32.totalorder %v7254_v36, 2  ;;  %v5673_v55 = vsel %vm1663_vm14, 1.0, %v9385_v5  ;;  %v5674_v56 = vsel %vm1664_vm15, 1.0, %v9385_v5 }
  0x82   : > { %6472 = vperm.xlu1 %6435, %v6471_v37   ;;  %vm1517_vm2 = vcmp.eq.s32.totalorder %v7276_v50, 0  ;;  %vm1665_vm3 = vcmp.eq.s32.totalorder %v7276_v50, 1  ;;  %v6501_v58 = vpack.i.bf16 %v5688_v52, %v5719_v54  ;;  %v5689_v59 = vsel %vm1827_vm0, 1.0, %v9385_v5 }
  0x83   : > { %6467 = vperm.xlu0 %6424, %v6466_v39   ;;  %v5690_v60 = vsel %vm1828_vm1, 1.0, %v9385_v5  ;;  %v6496_v61 = vpack.i.bf16 %v5674_v56, %v5673_v55  ;;  %v5659_v62 = vsel %vm1517_vm2, 1.0, %v9385_v5  ;;  %v5675_v63 = vsel %vm1665_vm3, 1.0, %v9385_v5 }
  0x84   : > { %vm1991_vm4 = vcmp.eq.s32.totalorder %v7247_v34, 3  ;;  %vm1992_vm5 = vcmp.eq.s32.totalorder %v7254_v36, 3  ;;  %vm1829_vm6 = vcmp.eq.s32.totalorder %v7276_v50, 2  ;;  %vm1990_vm7 = vcmp.eq.s32.totalorder %v7257_v38, 3 }
  0x85   : > { %v6511_v2 = vpack.i.bf16 %v5690_v60, %v5689_v59  ;;  %v5705_v3 = vsel %vm1991_vm4, 1.0, %v9385_v5  ;;  %v6506_v6 = vpack.i.bf16 %v5675_v63, %v5659_v62  ;;  %v5706_v7 = vsel %vm1992_vm5, 1.0, %v9385_v5 }
  0x86   : > { %6482 = vperm.xlu1 %6435, %v6481_v44   ;;  %v5691_v8 = vsel %vm1829_vm6, 1.0, %v9385_v5  ;;  %v5704_v9 = vsel %vm1990_vm7, 1.0, %v9385_v5  ;;  %vm2155_vm8 = vcmp.eq.s32.totalorder %v7247_v34, 4  ;;  %vm2156_vm9 = vcmp.eq.s32.totalorder %v7254_v36, 4  ;;  %s9315_s27 = scalar_lea.hbm %s9535_s25, %s5927_s1 }
  0x87   : > { %6477 = vperm.xlu0 %6424, %v6476_v45   ;;  %vm1993_vm10 = vcmp.eq.s32.totalorder %v7276_v50, 3  ;;  %vm2154_vm11 = vcmp.eq.s32.totalorder %v7257_v38, 4  ;;  %v6521_v13 = vpack.i.bf16 %v5706_v7, %v5705_v3  ;;  %v6516_v14 = vpack.i.bf16 %v5691_v8, %v5704_v9  ;;  %v7402_v9 = vld [vmem:[%s7396_s23 + $0x50] sm:$0xff] }
  0x88   : > { %v5721_v15 = vsel %vm2155_vm8, 1.0, %v9385_v5  ;;  %v5722_v16 = vsel %vm2156_vm9, 1.0, %v9385_v5  ;;  %v5707_v17 = vsel %vm1993_vm10, 1.0, %v9385_v5  ;;  %v5720_v18 = vsel %vm2154_vm11, 1.0, %v9385_v5 }
  0x89   : > { %vm1519_vm12 = vcmp.eq.s32.totalorder %v7299_v10, 0  ;;  %vm1520_vm13 = vcmp.eq.s32.totalorder %v7302_v11, 0  ;;  %vm1518_vm14 = vcmp.eq.s32.totalorder %v7309_v12, 0  ;;  %vm1666_vm15 = vcmp.eq.s32.totalorder %v7309_v12, 1 }
  0x8a   : > { %6492 = vperm.xlu1 %6435, %v6491_v51   ;;  %v6531_v20 = vpack.i.bf16 %v5722_v16, %v5721_v15  ;;  %v6526_v21 = vpack.i.bf16 %v5707_v17, %v5720_v18  ;;  %v5661_v22 = vsel %vm1519_vm12, 1.0, %v9385_v5  ;;  %v5662_v23 = vsel %vm1520_vm13, 1.0, %v9385_v5  ;;  %v7415_v16 = vld [vmem:[%s7396_s23 + $0x78] sm:$0xff]  ;;  %v7417_v17 = vld [vmem:[#allocation5 + $0x28] sm:$0xff]  }
  0x8b   : > { %6487 = vperm.xlu0 %6424, %v6486_v53   ;;  %v5660_v24 = vsel %vm1518_vm14, 1.0, %v9385_v5  ;;  %v5676_v25 = vsel %vm1666_vm15, 1.0, %v9385_v5  ;;  %vm1830_vm0 = vcmp.eq.s32.totalorder %v7309_v12, 2  ;;  %vm2157_vm1 = vcmp.eq.s32.totalorder %v7276_v50, 4  ;;  %6118 = vmatprep.subr.bf16.mxu0 %v7417_v17 }
  0x8c   : > { %vm1667_vm2 = vcmp.eq.s32.totalorder %v7299_v10, 1  ;;  %vm1668_vm3 = vcmp.eq.s32.totalorder %v7302_v11, 1  ;;  %v6541_v26 = vpack.i.bf16 %v5662_v23, %v5661_v22  ;;  %v6536_v28 = vpack.i.bf16 %v5676_v25, %v5660_v24  ;;  %v7425_v23 = vld [vmem:[%s7396_s23 + $0x70] sm:$0xff] }
  0x8d   : > { %v5692_v29 = vsel %vm1830_vm0, 1.0, %v9385_v5  ;;  %v5723_v30 = vsel %vm2157_vm1, 1.0, %v9385_v5  ;;  %vm1831_vm4 = vcmp.eq.s32.totalorder %v7299_v10, 2  ;;  %v5677_v31 = vsel %vm1667_vm2, 1.0, %v9385_v5 }
  0x8e   : > { %6502 = vperm.xlu1 %6435, %v6501_v58   ;;  %v5678_v32 = vsel %vm1668_vm3, 1.0, %v9385_v5  ;;  %vm1832_vm5 = vcmp.eq.s32.totalorder %v7302_v11, 2  ;;  %vm1521_vm6 = vcmp.eq.s32.totalorder %v7328_v27, 0  ;;  %vm1669_vm7 = vcmp.eq.s32.totalorder %v7328_v27, 1 }
  0x8f   : > { %6497 = vperm.xlu0 %6424, %v6496_v61   ;;  %v670_v33 = vlaneseq  ;;  %v6551_v34 = vpack.i.bf16 %v5692_v29, %v5723_v30  ;;  %v5693_v35 = vsel %vm1831_vm4, 1.0, %v9385_v5  ;;  %v6546_v36 = vpack.i.bf16 %v5678_v32, %v5677_v31 }
  0x90   : > { %v5694_v37 = vsel %vm1832_vm5, 1.0, %v9385_v5  ;;  %vm1995_vm8 = vcmp.eq.s32.totalorder %v7299_v10, 3  ;;  %vm1996_vm9 = vcmp.eq.s32.totalorder %v7302_v11, 3  ;;  %v5663_v38 = vsel %vm1521_vm6, 1.0, %v9385_v5 }
  0x91   : > { %v5679_v39 = vsel %vm1669_vm7, 1.0, %v9385_v5  ;;  %vm1833_vm10 = vcmp.eq.s32.totalorder %v7328_v27, 2  ;;  %vm1994_vm11 = vcmp.eq.s32.totalorder %v7309_v12, 3  ;;  %v7349_v41 = vshrl.u32 %v670_v33, 7 }
  0x92   : > { %6512 = vperm.xlu1 %6435, %v6511_v2   ;;  %v6561_v42 = vpack.i.bf16 %v5694_v37, %v5693_v35  ;;  %v5709_v43 = vsel %vm1995_vm8, 1.0, %v9385_v5  ;;  %v5710_v44 = vsel %vm1996_vm9, 1.0, %v9385_v5  ;;  %v6556_v45 = vpack.i.bf16 %v5679_v39, %v5663_v38  ;;  %v7453_v35 = vld [vmem:[%s7396_s23 + $0x68] sm:$0xff] }
  0x93   : > { %6507 = vperm.xlu0 %6424, %v6506_v6   ;;  %9449 = vst [vmem:[#allocation22_spill] sm:$0xff] %v7349_v41  ;;  %v5695_v46 = vsel %vm1833_vm10, 1.0, %v9385_v5  ;;  %v5708_v48 = vsel %vm1994_vm11, 1.0, %v9385_v5  ;;  %vm2159_vm12 = vcmp.eq.s32.totalorder %v7299_v10, 4  ;;  %vm2160_vm13 = vcmp.eq.s32.totalorder %v7302_v11, 4  ;;  %v7405_v10 = vld [vmem:[%s7396_s23 + $0x58] sm:$0xff] }
  0x94   : > { %vm1997_vm14 = vcmp.eq.s32.totalorder %v7328_v27, 3  ;;  %vm2158_vm15 = vcmp.eq.s32.totalorder %v7309_v12, 4  ;;  %v6571_v50 = vpack.i.bf16 %v5710_v44, %v5709_v43  ;;  %vm1523_vm0 = vcmp.eq.s32.totalorder %v7347_v40, 0  ;;  %v976_v38 = vld [vmem:[%s7396_s23 + $0x8] sm:$0xff]  ;;  %v977_v43 = vld [vmem:[%s7396_s23 + $0x10] sm:$0xff] }
  0x95   : > { %v6566_v51 = vpack.i.bf16 %v5695_v46, %v5708_v48  ;;  %v5725_v52 = vsel %vm2159_vm12, 1.0, %v9385_v5  ;;  %v5726_v53 = vsel %vm2160_vm13, 1.0, %v9385_v5  ;;  %v5711_v54 = vsel %vm1997_vm14, 1.0, %v9385_v5 }
  0x96   : > { %6522 = vperm.xlu1 %6435, %v6521_v13   ;;  %v5724_v55 = vsel %vm2158_vm15, 1.0, %v9385_v5  ;;  %vm1524_vm1 = vcmp.eq.s32.totalorder %v7355_v47, 0  ;;  %v5665_v56 = vsel %vm1523_vm0, 1.0, %v9385_v5  ;;  %vm1522_vm2 = vcmp.eq.s32.totalorder %v7363_v49, 0 }
  0x97   : > { %6517 = vperm.xlu0 %6424, %v6516_v14   ;;  %vm1670_vm3 = vcmp.eq.s32.totalorder %v7363_v49, 1  ;;  %v6581_v57 = vpack.i.bf16 %v5726_v53, %v5725_v52  ;;  %vm1834_vm4 = vcmp.eq.s32.totalorder %v7363_v49, 2  ;;  %v6576_v58 = vpack.i.bf16 %v5711_v54, %v5724_v55 }
  0x98   : > { %v5666_v59 = vsel %vm1524_vm1, 1.0, %v9385_v5  ;;  %vm2161_vm5 = vcmp.eq.s32.totalorder %v7328_v27, 4  ;;  %v5664_v60 = vsel %vm1522_vm2, 1.0, %v9385_v5  ;;  %v5680_v61 = vsel %vm1670_vm3, 1.0, %v9385_v5 }
  0x99   : > { %v691_v62 = vand.u32 15, %v7349_v41  ;;  %v5696_v63 = vsel %vm1834_vm4, 1.0, %v9385_v5  ;;  %vm1671_vm6 = vcmp.eq.s32.totalorder %v7347_v40, 1  ;;  %vm1672_vm7 = vcmp.eq.s32.totalorder %v7355_v47, 1 }
  0x9a   : > { %6532 = vperm.xlu1 %6435, %v6531_v20   ;;  %v6591_v1 = vpack.i.bf16 %v5666_v59, %v5665_v56  ;;  %v5727_v2 = vsel %vm2161_vm5, 1.0, %v9385_v5  ;;  %vm1998_vm8 = vcmp.eq.s32.totalorder %v7363_v49, 3  ;;  %v6586_v3 = vpack.i.bf16 %v5680_v61, %v5664_v60  ;;  %v7421_v20 = vld [vmem:[%s7396_s23] sm:$0xff] }
  0x9b   : > { %6527 = vperm.xlu0 %6424, %v6526_v21   ;;  %vm1999_vm9 = vcmp.eq.s32.totalorder %v7347_v40, 3  ;;  %vm1835_vm10 = vcmp.eq.s32.totalorder %v7347_v40, 2  ;;  %vm1008_vm11 = vcmp.lt.s32.totalorder %v7349_v41, 1  ;;  %v5681_v4 = vsel %vm1671_vm6, 1.0, %v9385_v5 }
  0x9c   : > { %v5682_v6 = vsel %vm1672_vm7, 1.0, %v9385_v5  ;;  %vm1836_vm12 = vcmp.eq.s32.totalorder %v7355_v47, 2  ;;  %v5712_v7 = vsel %vm1998_vm8, 1.0, %v9385_v5  ;;  %v673_v8 = vadd.s32 16, %v7349_v41 }
  0x9d   : > { %vm1273_vm13 = vcmp.lt.s32.totalorder %v7349_v41, 7  ;;  %v6601_v11 = vpack.i.bf16 %v5696_v63, %v5727_v2  ;;  %v5713_v12 = vsel %vm1999_vm9, 1.0, %v9385_v5  ;;  %v5697_v13 = vsel %vm1835_vm10, 1.0, %v9385_v5  ;;  %v978_v63 = vld [vmem:[%s7396_s23 + $0x18] sm:$0xff] }
  0x9e   : > { %6542 = vperm.xlu1 %6435, %v6541_v26   ;;  %vm2163_vm14 = vcmp.eq.s32.totalorder %v7347_v40, 4  ;;  %v6596_v14 = vpack.i.bf16 %v5682_v6, %v5681_v4  ;;  %v5698_v15 = vsel %vm1836_vm12, 1.0, %v9385_v5  ;;  %vm2164_vm15 = vcmp.eq.s32.totalorder %v7355_v47, 4 }
  0x9f   : > { %6537 = vperm.xlu0 %6424, %v6536_v28   ;;  %vm2000_vm0 = vcmp.eq.s32.totalorder %v7355_v47, 3  ;;  %vm2162_vm1 = vcmp.eq.s32.totalorder %v7363_v49, 4  ;;  %v6611_v18 = vpack.i.bf16 %v5713_v12, %v5712_v7  ;;  %v5729_v19 = vsel %vm2163_vm14, 1.0, %v9385_v5 }
  0xa0   : > { %v6606_v21 = vpack.i.bf16 %v5698_v15, %v5697_v13  ;;  %v5730_v22 = vsel %vm2164_vm15, 1.0, %v9385_v5  ;;  %v1002_v24 = vrot.slane %v7402_v9, 7  ;;  %v1003_v25 = vrot.slane %v7405_v10, 7 }
  0xa1   : > { %v5714_v26 = vsel %vm2000_vm0, 1.0, %v9385_v5  ;;  %v5728_v27 = vsel %vm2162_vm1, 1.0, %v9385_v5  ;;  %v1268_v28 = vrot.slane %v7405_v10, 1  ;;  %v1267_v29 = vrot.slane %v7402_v9, 1 }
  0xa2   : > { %6552 = vperm.xlu1 %6435, %v6551_v34   ;;  %v1007_v30 = vrot.slane %v7415_v16, 7  ;;  %v992_v31 = vrot.slane %v7421_v20, 7  ;;  %v7442_v32 = vsel %vm1008_vm11, %v1002_v24, %v1003_v25  ;;  %vm879_vm2 = vcmp.ne.s32.totalorder %v691_v62, 0 }
  0xa3   : > { %6547 = vperm.xlu0 %6424, %v6546_v36   ;;  %v7450_v33 = vsel %vm1273_vm13, %v1267_v29, %v1268_v28  ;;  %v6621_v34 = vpack.i.bf16 %v5730_v22, %v5729_v19  ;;  %v6616_v36 = vpack.i.bf16 %v5728_v27, %v5714_v26  ;;  %v1006_v37 = vrot.slane %v7425_v23, 7 }
  0xa4   : > { %v7458_v39 = vsel %vm879_vm2, 1.0, %v9385_v5  ;;  %v1024_v40 = vsel %vm1008_vm11, %v1007_v30, %v992_v31  ;;  %v1005_v44 = vrot.slane %v7453_v35, 7  ;;  %v994_v48 = vrot.slane %v977_v43, 7 }
  0xa5   : > { %9451 = vst [vmem:[#allocation23_spill] sm:$0xff] %v7458_v39  ;;  %v1009_v46 = vsel %vm1008_vm11, %v1006_v37, %v1007_v30  ;;  %v1025_v47 = vmul.f32 %v7458_v39, %v1024_v40  ;;  %v1257_v55 = vrot.slane %v7421_v20, 1  ;;  %v9383_v56 = vrot.slane %v7415_v16, 1 }
  0xa6   : > { %6562 = vperm.xlu1 %6435, %v6561_v42   ;;  %v705_v42 = vand.u32 15, %v673_v8  ;;  %v7471_v49 = vsel %vm1008_vm11, %v1005_v44, %v1006_v37  ;;  %v675_v61 = vadd.s32 32, %v7349_v41  ;;  %v1258_v62 = vrot.slane %v976_v38, 1 }
  0xa7   : > { %6557 = vperm.xlu0 %6424, %v6556_v45   ;;  %v993_v45 = vrot.slane %v976_v38, 7  ;;  %v1289_v60 = vsel %vm1273_vm13, %v9383_v56, %v1257_v55  ;;  %v674_v2 = vadd.s32 24, %v7349_v41  ;;  %v995_v7 = vrot.slane %v978_v63, 7 }
  0xa8   : > { %vm881_vm3 = vcmp.ne.s32.totalorder %v705_v42, 0  ;;  %v719_v4 = vand.u32 15, %v675_v61  ;;  %v1288_v6 = vsel %vm1273_vm13, %v1257_v55, %v1258_v62  ;;  %v1259_v8 = vrot.slane %v977_v43, 1 }
  0xa9   : > { %v1022_v52 = vsel %vm1008_vm11, %v993_v45, %v994_v48  ;;  %v712_v12 = vand.u32 15, %v674_v2  ;;  %v1260_v13 = vrot.slane %v978_v63, 1  ;;  %v1021_v15 = vsel %vm1008_vm11, %v994_v48, %v995_v7 }
  0xaa   : > { %6572 = vperm.xlu1 %6435, %v6571_v50   ;;  %v686_v50 = vadd.s32 120, %v7349_v41  ;;  %vm883_vm6 = vcmp.ne.s32.totalorder %v719_v4, 0  ;;  %v1287_v19 = vsel %vm1273_vm13, %v1258_v62, %v1259_v8  ;;  %v681_v61 = vadd.s32 80, %v7349_v41  ;;  %v7542_v62 = vld [vmem:[#allocation2] sm:$0x1f] }
  0xab   : > { %6567 = vperm.xlu0 %6424, %v6566_v51   ;;  %v7475_v51 = vsel %vm881_vm3, 1.0, %v9385_v5  ;;  %vm930_vm7 = vcmp.ne.s32.totalorder %v712_v12, 15  ;;  %v1286_v22 = vsel %vm1273_vm13, %v1259_v8, %v1260_v13  ;;  %v7513_v27 = vsel %vm883_vm6, 1.0, %v9385_v5  ;;  %v7553_v8 = vld [vmem:[#allocation7 + $0x8] sm:$0xff]  }
  0xac   : > { %9452 = vst [vmem:[#allocation24_spill] sm:$0xff] %v7475_v51  ;;  %v796_v53 = vand.u32 15, %v686_v50  ;;  %v1027_v54 = vmul.f32 %v7475_v51, %v1022_v52  ;;  %9455 = vst [vmem:[#allocation27_spill] sm:$0xff] %v7513_v27  ;;  %v676_v50 = vadd.s32 40, %v7349_v41  ;;  %6138 = vmatprep.subr.bf16.mxu1 %v7553_v8  ;;  %vm2399_vm3 = vcmask 261120  }
  0xae   : > { %6582 = vperm.xlu1 %6435, %v6581_v57   ;;  %v1023_v57 = vsel %vm1008_vm11, %v992_v31, %v993_v45  ;;  %vm942_vm4 = vcmp.ne.s32.totalorder %v796_v53, 15  ;;  %v7518_v31 = vsel %vm930_vm7, 1.0, %v9385_v5  ;;  %v726_v55 = vand.u32 15, %v676_v50 }
  0xaf   : > { %6577 = vperm.xlu0 %6424, %v6576_v58   ;;  %v672_v58 = vadd.s32 8, %v7349_v41  ;;  %v7488_v59 = vsel %vm942_vm4, 1.0, %v9385_v5  ;;  %9456 = vst [vmem:[#allocation28_spill] sm:$0xff] %v7518_v31 }
  0xb0   : > { %9453 = vst [vmem:[#allocation25_spill] sm:$0xff] %v7488_v59  ;;  %vm7555_vm9 = vcmp.ne.s32.totalorder %v726_v55, 15 }
  0xb2   : > { %6592 = vperm.xlu1 %6435, %v6591_v1   ;;  %v698_v1 = vand.u32 15, %v672_v58  ;;  %v678_v58 = vadd.s32 56, %v7349_v41 }
  0xb3   : > { %6587 = vperm.xlu0 %6424, %v6586_v3   ;;  %v1305_v3 = vmul.f32 %v7488_v59, %v1289_v60  ;;  %v7539_v60 = vsub.s32 0, %v7349_v41 }
  0xb4   : > { %vm928_vm5 = vcmp.ne.s32.totalorder %v698_v1, 15  ;;  %v7545_v1 = vsub.s32 1, %v7349_v41 }
  0xb5   : > { %9458 = vst [vmem:[#allocation30_spill] sm:$0xff] %v7539_v60 }
  0xb6   : > { %6602 = vperm.xlu1 %6435, %v6601_v11   ;;  %v979_v11 = vld [vmem:[%s7396_s23 + $0x20] sm:$0xff]  ;;  %9459 = vst [vmem:[#allocation31_spill] sm:$0xff] %v7545_v1 }
  0xb7   : > { %6597 = vperm.xlu0 %6424, %v6596_v14   ;;  %v996_v14 = vrot.slane %v979_v11, 7 }
  0xb9   : > { %v1020_v30 = vsel %vm1008_vm11, %v995_v7, %v996_v14  ;;  %v7551_v7 = vld [vmem:[%s7396_s23 + $0x40] sm:$0xff] }
  0xba   : > { %6612 = vperm.xlu1 %6435, %v6611_v18   ;;  %v7504_v18 = vsel %vm928_vm5, 1.0, %v9385_v5  ;;  %v1029_v40 = vmul.f32 %v7513_v27, %v1020_v30  ;;  %v1000_v30 = vrot.slane %v7551_v7, 7 }
  0xbb   : > { %6607 = vperm.xlu0 %6424, %v6606_v21   ;;  %9454 = vst [vmem:[#allocation26_spill] sm:$0xff] %v7504_v18  ;;  %v677_v21 = vadd.s32 48, %v7349_v41  ;;  %v1291_v26 = vmul.f32 %v7504_v18, %v1287_v19  ;;  %v761_v19 = vand.u32 15, %v681_v61 }
  0xbd   : > { %v733_v37 = vand.u32 15, %v677_v21  ;;  %v683_v21 = vadd.s32 96, %v7349_v41  ;;  %vm7606_vm14 = vcmp.ne.s32.totalorder %v761_v19, 0 }
  0xbe   : > { %6622 = vperm.xlu1 %6435, %v6621_v34  }
  0xbf   : > { %6617 = vperm.xlu0 %6424, %v6616_v36   ;;  %v980_v36 = vld [vmem:[%s7396_s23 + $0x28] sm:$0xff]  ;;  %vm885_vm8 = vcmp.ne.s32.totalorder %v733_v37, 0  ;;  %v7582_v37 = vsel %vm7555_vm9, 1.0, %v9385_v5  ;;  %v775_v55 = vand.u32 15, %v683_v21 }
  0xc0   : > { %v1262_v53 = vrot.slane %v980_v36, 1  ;;  %9462 = vst [vmem:[#allocation32_spill] sm:$0xff] %v7582_v37 }
  0xc1   : > { %vm7648_vm0 = vcmp.ne.s32.totalorder %v775_v55, 0 }
  0xc2   : > { %1118 = vperm.xlu1 %6435, %v1009_v46  }
  0xc3   : > { %1043 = vperm.xlu0 %6424, %v1025_v47   ;;  %v7529_v47 = vsel %vm885_vm8, 1.0, %v9385_v5 }
  0xc4   : > { %9457 = vst [vmem:[#allocation29_spill] sm:$0xff] %v7529_v47 }
  0xc6   : > { %1218 = vperm.xlu1 %6435, %v7415_v16  }
  0xc7   : > { %1143 = vperm.xlu0 %6424, %v7421_v20   ;;  %v1261_v20 = vrot.slane %v979_v11, 1 }
  0xc9   : > { %v1285_v34 = vsel %vm1273_vm13, %v1260_v13, %v1261_v20  ;;  %v1284_v2 = vsel %vm1273_vm13, %v1261_v20, %v1262_v53  ;;  %v740_v13 = vand.u32 15, %v678_v58  ;;  %v680_v20 = vadd.s32 72, %v7349_v41 }
  0xca   : > { %1053 = vperm.xlu1 %6435, %v1027_v54   ;;  %v1293_v42 = vmul.f32 %v7518_v31, %v1285_v34  ;;  %v982_v54 = vld [vmem:[%s7396_s23 + $0x38] sm:$0xff]  ;;  %v1265_v34 = vrot.slane %v7551_v7, 1 }
  0xcb   : > { %1048 = vperm.xlu0 %6424, %v1023_v57   ;;  %v679_v57 = vadd.s32 64, %v7349_v41  ;;  %vm7595_vm12 = vcmp.ne.s32.totalorder %v740_v13, 15 }
  0xcd   : > { %v747_v12 = vand.u32 15, %v679_v57  ;;  %v682_v57 = vadd.s32 88, %v7349_v41 }
  0xce   : > { %1153 = vperm.xlu1 %6435, %v977_v43   ;;  %v997_v43 = vrot.slane %v980_v36, 7 }
  0xcf   : > { %1148 = vperm.xlu0 %6424, %v976_v38   ;;  %v981_v38 = vld [vmem:[%s7396_s23 + $0x30] sm:$0xff]  ;;  %vm7591_vm10 = vcmp.ne.s32.totalorder %v747_v12, 0 }
  0xd0   : > { %v998_v45 = vrot.slane %v981_v38, 7  ;;  %v1019_v46 = vsel %vm1008_vm11, %v996_v14, %v997_v43  ;;  %v1263_v4 = vrot.slane %v981_v38, 1  ;;  %v7561_v14 = vrot.slane %v7542_v62, %v7539_v60 }
  0xd1   : > { %v7622_v12 = vsel %vm7591_vm10, 1.0, %v9385_v5 }
  0xd2   : > { %1383 = vperm.xlu1 %6435, %v1305_v3   ;;  %v1018_v48 = vsel %vm1008_vm11, %v997_v43, %v998_v45  ;;  %v1264_v3 = vrot.slane %v982_v54, 1  ;;  %9469 = vst [vmem:[#allocation33_spill] sm:$0xff] %v7622_v12 }
  0xd3   : > { %1308 = vperm.xlu0 %6424, %v1288_v6   ;;  %v1031_v52 = vmul.f32 %v7529_v47, %v1018_v48  ;;  %v9382_v6 = vsub.s32 2, %v7349_v41  ;;  %v7602_v48 = vld [vmem:[%s7396_s23 + $0x60] sm:$0xff] }
  0xd4   : > { %v9384_v21 = vrot.slane %v7602_v48, 1 }
  0xd6   : > { %1158 = vperm.xlu1 %6435, %v978_v63   ;;  %v999_v63 = vrot.slane %v982_v54, 7 }
  0xd7   : > { %1058 = vperm.xlu0 %6424, %v1021_v15   ;;  %v7564_v15 = vld [vmem:[%s7396_s23 + $0x48] sm:$0xff]  ;;  %s6961_s23 = smov [#allocation11]  }
  0xd8   : > { %v1266_v13 = vrot.slane %v7564_v15, 1  ;;  %s6882_s26 = sshll.u32 %s6961_s23, 4  ;;  %s6883_s26 = int_to_ptr.vmem [resolvable:$false] %s6882_s26 }
  0xd9   : > { %s6884_s0 = scalar_lea.vmem %s6883_s26, 256  ;;  %p6885_p8 = scmp.lt.s32.totalorder %s5496_s19, %s6883_s26 }
  0xda   : > { %1318 = vperm.xlu1 %6435, %v1286_v22   ;;  %v1017_v22 = vsel %vm1008_vm11, %v998_v45, %v999_v63  ;;  %v2116_v45 = vsub.s32 3, %v7349_v41  ;;  %p6886_p11 = scmp.lt.s32.totalorder %s6884_s0, %s6878_s29 }
  0xdb   : > { %1313 = vperm.xlu0 %6424, %v1291_v26   ;;  %v7573_v26 = vrot.slane %v7542_v62, %v7545_v1 }
  0xdc   : > { %v7632_v19 = vrot.slane %v7542_v62, %v2116_v45  ;;  %v685_v45 = vadd.s32 112, %v7349_v41  ;;  %p6887_p13 = por %p6886_p11, %p6885_p8 }
  0xde   : > { %1063 = vperm.xlu1 %6435, %v1029_v40   ;;  %v1283_v40 = vsel %vm1273_vm13, %v1262_v53, %v1263_v4  ;;  %v754_v53 = vand.u32 15, %v680_v20  ;;  %p6888_p0 = pnand %p6887_p13, %p6881_p9 }
  0xdf   : > { %1323 = vperm.xlu0 %6424, %v1293_v42   ;;  %v7589_v42 = vrot.slane %v7542_v62, %v9382_v6  ;;  %v1295_v61 = vmul.f32 %v7582_v37, %v1283_v40 }
  0xe0   : > { %vm7644_vm15 = vcmp.ne.s32.totalorder %v754_v53, 15 }
  0xe2   : > { %1068 = vperm.xlu1 %6435, %v1019_v46   ;;  %v1001_v46 = vrot.slane %v7564_v15, 7 }
  0xe3   : > { %1163 = vperm.xlu0 %6424, %v979_v11   ;;  %v2280_v11 = vsub.s32 4, %v7349_v41 }
  0xe4   : > { %v1014_v20 = vsel %vm1008_vm11, %v1001_v46, %v1002_v24  ;;  %v1015_v6 = vsel %vm1008_vm11, %v1000_v30, %v1001_v46  ;;  %v7678_v46 = vsel %vm7644_vm15, 1.0, %v9385_v5 }
  0xe5   : > { %v7658_v53 = vrot.slane %v7542_v62, %v2280_v11  ;;  %9476 = vst [vmem:[#allocation36_spill] sm:$0xff] %v7678_v46 }
  0xe6   : > { %1168 = vperm.xlu1 %6435, %v980_v36   ;;  %v1282_v36 = vsel %vm1273_vm13, %v1263_v4, %v1264_v3  ;;  %v1281_v4 = vsel %vm1273_vm13, %v1264_v3, %v1265_v34  ;;  %v7637_v3 = vsel %vm7606_vm14, 1.0, %v9385_v5 }
  0xe7   : > { %1073 = vperm.xlu0 %6424, %v1031_v52   ;;  %9471 = vst [vmem:[#allocation35_spill] sm:$0xff] %v7637_v3  ;;  %v7661_v55 = vmul.f32 %v7637_v3, %v1014_v20 }
  0xea   : > { %1328 = vperm.xlu1 %6435, %v1284_v2   ;;  %v1016_v2 = vsel %vm1008_vm11, %v999_v63, %v1000_v30  ;;  %v1004_v63 = vrot.slane %v7602_v48, 7 }
  0xeb   : > { %1173 = vperm.xlu0 %6424, %v981_v38   ;;  %v768_v38 = vand.u32 15, %v682_v57  ;;  %v1033_v0 = vmul.f32 %v7622_v12, %v1016_v2  ;;  %v7665_v57 = vsel %vm1273_vm13, %v1265_v34, %v1266_v13  ;;  %v7683_v34 = vsel %vm7648_vm0, 1.0, %v9385_v5 }
  0xec   : > { %v1012_v30 = vsel %vm1008_vm11, %v1003_v25, %v1004_v63  ;;  %9477 = vst [vmem:[#allocation37_spill] sm:$0xff] %v7683_v34 }
  0xed   : > { %v7604_v50 = vpop.permute.xlu1 %6437  ;;  %vm938_vm1 = vcmp.ne.s32.totalorder %v768_v38, 15  ;;  %v7707_v38 = vsel %vm1008_vm11, %v1004_v63, %v1005_v44 }
  0xee   : > { %v7611_v58 = vpop.permute.xlu0 %6426  ;;  %1178 = vperm.xlu1 %6435, %v982_v54   ;;  %v7627_v54 = vsel %vm7595_vm12, 1.0, %v9385_v5  ;;  %v6440_v11 = vunpack.i.h.bf16 %v7604_v50 }
  0xef   : > { %1078 = vperm.xlu0 %6424, %v1017_v22   ;;  %9470 = vst [vmem:[#allocation34_spill] sm:$0xff] %v7627_v54  ;;  %v1297_v24 = vmul.f32 %v7627_v54, %v1281_v4  ;;  %v789_v4 = vand.u32 15, %v685_v45  ;;  %v6429_v20 = vunpack.i.h.bf16 %v7611_v58  ;;  %v6428_v40 = vunpack.i.l.bf16 %v7611_v58 }
  0xf0   : > { %v7711_v58 = vsel %vm938_vm1, 1.0, %v9385_v5  ;;  %v1644_v44 = vmul.f32 %v6440_v11, %v7561_v14 }
  0xf1   : > { %v6443_v22 = vpop.permute.xlu1 %6442  ;;  %9478 = vst [vmem:[#allocation38_spill] sm:$0xff] %v7711_v58  ;;  %v1642_v5 = vmul.f32 %v6428_v40, %v7561_v14  ;;  %vm7723_vm2 = vcmp.ne.s32.totalorder %v789_v4, 0 }
  0xf2   : > { %v6432_v52 = vpop.permute.xlu0 %6431  ;;  %1338 = vperm.xlu1 %6435, %v1282_v36   ;;  %v1279_v36 = vsel %vm1273_vm13, %v1266_v13, %v1267_v29  ;;  %v6444_v62 = vunpack.i.l.bf16 %v6443_v22  ;;  %v7691_v29 = vsel %vm1273_vm13, %v1268_v28, %v9384_v21  ;;  %v6445_v25 = vunpack.i.h.bf16 %v6443_v22 }
  0xf3   : > { %1333 = vperm.xlu0 %6424, %v1295_v61   ;;  %v6433_v61 = vunpack.i.l.bf16 %v6432_v52  ;;  %v6439_v13 = vunpack.i.l.bf16 %v7604_v50  ;;  %v6434_v56 = vunpack.i.h.bf16 %v6432_v52  ;;  %v7698_v28 = vmul.f32 %v7678_v46, %v1279_v36 }
  0xf4   : > { %v7701_v22 = vmul.f32 %v7683_v34, %v1012_v30  ;;  %v1791_v50 = vmul.f32 %v6444_v62, %v7573_v26  ;;  %v1792_v52 = vmul.f32 %v6445_v25, %v7573_v26  ;;  %v7717_v21 = vadd.s32 104, %v7349_v41 }
  0xf5   : > { %v6453_v2 = vpop.permute.xlu1 %6452  ;;  %v1643_v63 = vmul.f32 %v6439_v13, %v7561_v14  ;;  %v1657_v62 = vmul.f32 %v6429_v20, %v7561_v14  ;;  %v1805_v25 = vmul.f32 %v6434_v56, %v7573_v26 }
  0xf6   : > { %v6448_v43 = vpop.permute.xlu0 %6447  ;;  %1083 = vperm.xlu1 %6435, %v1033_v0   ;;  %v6455_v54 = vunpack.i.h.bf16 %v6453_v2  ;;  %v6454_v13 = vunpack.i.l.bf16 %v6453_v2  ;;  %v1808_v37 = vadd.f32 %v1792_v52, %v1644_v44  ;;  %v9483_v0 = vrot.slane %v7453_v35, 1 }
  0xf7   : > { %1343 = vperm.xlu0 %6424, %v1297_v24   ;;  %v6449_v45 = vunpack.i.l.bf16 %v6448_v43  ;;  %v1790_v24 = vmul.f32 %v6433_v61, %v7573_v26  ;;  %v6450_v36 = vunpack.i.h.bf16 %v6448_v43  ;;  %v1807_v11 = vadd.f32 %v1791_v50, %v1643_v63 }
  0xf8   : > { %v1645_v52 = vmul.f32 %v6454_v13, %v7561_v14 }
  0xf9   : > { %v6463_v30 = vpop.permute.xlu1 %6462  ;;  %v1954_v20 = vmul.f32 %v6449_v45, %v7589_v42  ;;  %v1806_v40 = vadd.f32 %v1790_v24, %v1642_v5  ;;  %v1793_v5 = vmul.f32 %v6455_v54, %v7573_v26 }
  0xfa   : > { %v6458_v59 = vpop.permute.xlu0 %6457  ;;  %1088 = vperm.xlu1 %6435, %v1015_v6   ;;  %v6464_v61 = vunpack.i.l.bf16 %v6463_v30  ;;  %v1969_v6 = vmul.f32 %v6450_v36, %v7589_v42  ;;  %v6465_v4 = vunpack.i.h.bf16 %v6463_v30 }
  0xfb   : > { %v6460_v43 = vunpack.i.h.bf16 %v6458_v59  ;;  %v6459_v46 = vunpack.i.l.bf16 %v6458_v59  ;;  %1183 = vperm.xlu0 %6424, %v7551_v7   ;;  %v1821_v7 = vadd.f32 %v1805_v25, %v1657_v62  ;;  %v1970_v24 = vadd.f32 %v1954_v20, %v1806_v40 }
  0xfc   : > { %v2118_v2 = vmul.f32 %v6464_v61, %v7632_v19 }
  0xfd   : > { %v6473_v31 = vpop.permute.xlu1 %6472  ;;  %v1956_v60 = vmul.f32 %v6460_v43, %v7589_v42  ;;  %v1955_v56 = vmul.f32 %v6459_v46, %v7589_v42  ;;  %v1985_v46 = vadd.f32 %v1969_v6, %v1821_v7 }
  0xfe   : > { %v6475_v18 = vunpack.i.h.bf16 %v6473_v31  ;;  %v6474_v34 = vunpack.i.l.bf16 %v6473_v31  ;;  %v6468_v59 = vpop.permute.xlu0 %6467  ;;  %1188 = vperm.xlu1 %6435, %v7564_v15   ;;  %v2133_v31 = vmul.f32 %v6465_v4, %v7632_v19  ;;  %v2134_v54 = vadd.f32 %v2118_v2, %v1970_v24 }
  0xff   : > { %v6470_v50 = vunpack.i.h.bf16 %v6468_v59  ;;  %v6469_v45 = vunpack.i.l.bf16 %v6468_v59  ;;  %1093 = vperm.xlu0 %6424, %v7661_v55   ;;  %v1972_v63 = vadd.f32 %v1956_v60, %v1808_v37  ;;  %v1971_v62 = vadd.f32 %v1955_v56, %v1807_v11 }
 0x100   : > { %v2120_v36 = vmul.f32 %v6474_v34, %v7632_v19  ;;  %v2282_v30 = vmul.f32 %v6475_v18, %v7658_v53  ;;  %v2149_v60 = vadd.f32 %v2133_v31, %v1985_v46  ;;  %v1809_v59 = vadd.f32 %v1793_v5, %v1645_v52 }
 0x101   : > { %v2119_v15 = vmul.f32 %v6470_v50, %v7632_v19  ;;  %v6483_v44 = vpop.permute.xlu1 %6482  ;;  %v1957_v43 = vmul.f32 %v6469_v45, %v7589_v42  ;;  %v1301_v24 = vmul.f32 %v7711_v58, %v7691_v29  ;;  %v9484_v5 = vrot.slane %v7602_v48, 1 }
 0x102   : > { %v6485_v25 = vunpack.i.h.bf16 %v6483_v44  ;;  %v6484_v55 = vunpack.i.l.bf16 %v6483_v44  ;;  %v6478_v61 = vpop.permute.xlu0 %6477  ;;  %1348 = vperm.xlu1 %6435, %v7665_v57   ;;  %v2136_v20 = vadd.f32 %v2120_v36, %v1972_v63  ;;  %v7747_v37 = vadd.f32 %v2282_v30, %v2134_v54 }
 0x103   : > { %v6480_v34 = vunpack.i.h.bf16 %v6478_v61  ;;  %v6479_v13 = vunpack.i.l.bf16 %v6478_v61  ;;  %1193 = vperm.xlu0 %6424, %v7402_v9   ;;  %v2135_v18 = vadd.f32 %v2119_v15, %v1971_v62  ;;  %v9481_v57 = vmov 0.0  }
 0x104   : > { %v2284_v40 = vmul.f32 %v6485_v25, %v7658_v53  ;;  %v2283_v6 = vmul.f32 %v6484_v55, %v7658_v53  ;;  %v7753_v56 = vsel %vm7723_vm2, 1.0, %v9481_v57  ;;  %v7772_v52 = vsel %vm1273_vm13, %v9484_v5, %v9483_v0 }
 0x105   : > { %v2297_v11 = vmul.f32 %v6479_v13, %v7658_v53  ;;  %v6493_v4 = vpop.permute.xlu1 %6492  ;;  %9482 = vst [vmem:[#allocation39_spill] sm:$0xff] %v7753_v56  ;;  %v2121_v2 = vmul.f32 %v6480_v34, %v7632_v19  ;;  %v1271_v36 = vrot.slane %v7425_v23, 1  ;;  %v1973_v46 = vadd.f32 %v1957_v43, %v1809_v59 }
 0x106   : > { %v7755_v7 = vadd.f32 %v2283_v6, %v2135_v18  ;;  %v7757_v9 = vadd.f32 %v2284_v40, %v2136_v20  ;;  %v6488_v50 = vpop.permute.xlu0 %6487  ;;  %1198 = vperm.xlu1 %6435, %v7405_v10   ;;  %v7777_v30 = vmul.f32 %v7753_v56, %v7471_v49  ;;  %v6494_v15 = vunpack.i.l.bf16 %v6493_v4 }
 0x107   : > { %v7761_v45 = vadd.f32 %v2297_v11, %v2149_v60  ;;  %1098 = vperm.xlu0 %6424, %v7442_v32   ;;  %v6490_v31 = vunpack.i.h.bf16 %v6488_v50  ;;  %v6489_v10 = vunpack.i.l.bf16 %v6488_v50  ;;  %v6495_v32 = vunpack.i.h.bf16 %v6493_v4 }
 0x108   : > { %v2327_v44 = vrot.slane %v7747_v37, 7  ;;  %v782_v63 = vand.u32 15, %v7717_v21  ;;  %v2329_v62 = vrot.slane %v7757_v9, 7  ;;  %v2137_v25 = vadd.f32 %v2121_v2, %v1973_v46 }
 0x109   : > { %v6503_v29 = vpop.permute.xlu1 %6502  ;;  %v2314_v54 = vpack.c.bf16 %v7755_v7, %v7747_v37  ;;  %v2328_v34 = vrot.slane %v7755_v7, 7  ;;  %v2342_v13 = vrot.slane %v7761_v45, 7  ;;  %v1794_v21 = vmul.f32 %v6490_v31, %v7573_v26 }
 0x10a   : > { %v6504_v55 = vunpack.i.l.bf16 %v6503_v29  ;;  %v6498_v61 = vpop.permute.xlu0 %6497  ;;  %1358 = vperm.xlu1 %6435, %v7450_v33   ;;  %v1646_v20 = vmul.f32 %v6489_v10, %v7561_v14  ;;  %v6505_v18 = vunpack.i.h.bf16 %v6503_v29  ;;  %v1648_v6 = vmul.f32 %v6495_v32, %v7561_v14 }
 0x10b   : > { %v6500_v43 = vunpack.i.h.bf16 %v6498_v61  ;;  %v6499_v49 = vunpack.i.l.bf16 %v6498_v61  ;;  %1353 = vperm.xlu0 %6424, %v7698_v28   ;;  %6102 = vmatprep.mubr.msk.bf16.mxu1 %vm2399_vm3, %v2314_v54  ;;  %v9485_v60 = vrot.slane %v7415_v16, 1  ;;  %vm7799_vm4 = vcmp.ne.s32.totalorder %v782_v63, 15 }
 0x10c   : > { %v2285_v40 = vmul.f32 %v6504_v55, %v7658_v53  ;;  %v9488_v4 = vmov %v9483_v0  ;;  %v2358_v5 = vsel %vm1008_vm11, %v2342_v13, %v2327_v44  ;;  %v1647_v46 = vmul.f32 %v6494_v15, %v7561_v14 }
 0x10d   : > { %v6513_v33 = vpop.permute.xlu1 %6512  ;;  %v7797_v28 = vsel %vm1273_vm13, %v1271_v36, %v9485_v60  ;;  %v7807_v59 = vsel %vm1273_vm13, %v9488_v4, %v1271_v36  ;;  %v1796_v50 = vmul.f32 %v6500_v43, %v7573_v26  ;;  %v1795_v31 = vmul.f32 %v6499_v49, %v7573_v26 }
 0x10e   : > { %v7809_v2 = vadd.f32 %v2285_v40, %v2137_v25  ;;  %v6514_v0 = vunpack.i.l.bf16 %v6513_v33  ;;  %v6508_v16 = vpop.permute.xlu0 %6507  ;;  %1103 = vperm.xlu1 %6435, %v7701_v22   ;;  %v6515_v10 = vunpack.i.h.bf16 %v6513_v33  ;;  %v2356_v36 = vsel %vm1008_vm11, %v2328_v34, %v2329_v62 }
 0x10f   : > { %1363 = vperm.xlu0 %6424, %v1301_v24   ;;  %v1810_v32 = vadd.f32 %v1794_v21, %v1646_v20  ;;  %v1958_v29 = vmul.f32 %v6505_v18, %v7589_v42  ;;  %v6510_v22 = vunpack.i.h.bf16 %v6508_v16  ;;  %v6509_v55 = vunpack.i.l.bf16 %v6508_v16  ;;  %v6633_v18 = vld [vmem:[#allocation7] sm:$0xff]  }
 0x110   : > { %v2330_v63 = vrot.slane %v7809_v2, 7  ;;  %v1959_v25 = vmul.f32 %v6514_v0, %v7589_v42  ;;  %v2359_v61 = vmul.f32 %v7458_v39, %v2358_v5  ;;  %v2315_v15 = vpack.c.bf16 %v7809_v2, %v7757_v9 }
 0x111   : > { %v6523_v54 = vpop.permute.xlu1 %6522  ;;  %v1812_v43 = vadd.f32 %v1796_v50, %v1648_v6  ;;  %v2357_v24 = vsel %vm1008_vm11, %v2327_v44, %v2328_v34  ;;  %v2361_v20 = vmul.f32 %v7475_v51, %v2356_v36  ;;  %v1811_v40 = vadd.f32 %v1795_v31, %v1647_v46  ;;  %v6631_v46 = vld [vmem:[#allocation5 + $0x20] sm:$0xff]  }
 0x112   : > { %v6525_v49 = vunpack.i.h.bf16 %v6523_v54  ;;  %v6518_v21 = vpop.permute.xlu0 %6517  ;;  %1108 = vperm.xlu1 %6435, %v7707_v38   ;;  %v1960_v33 = vmul.f32 %v6515_v10, %v7589_v42  ;;  %v2375_v60 = vpack.c.bf16 %v2357_v24, %v2359_v61  ;;  %v6524_v4 = vunpack.i.l.bf16 %v6523_v54  ;;  %6103 = vmatmul.mubr.msk.bf16.vlgmr.msra.gmra.mxu1 %vm2399_vm3, %v2315_v15 }
 0x113   : > { %1203 = vperm.xlu0 %6424, %v7602_v48   ;;  %v1797_v6 = vmul.f32 %v6510_v22, %v7573_v26  ;;  %v6520_v50 = vunpack.i.h.bf16 %v6518_v21  ;;  %v6519_v44 = vunpack.i.l.bf16 %v6518_v21  ;;  %v2355_v38 = vsel %vm1008_vm11, %v2329_v62, %v2330_v63  ;;  %6139 = vmatpush3.bf16.msra.mxu1 %v7553_v8 }
 0x114   : > { %v1975_v34 = vadd.f32 %v1959_v25, %v1811_v40  ;;  %v1649_v0 = vmul.f32 %v6509_v55, %v7561_v14  ;;  %6082 = vmatprep.mubr.msk.bf16.mxu0 %vm2399_vm3, %v2375_v60  ;;  %v2123_v16 = vmul.f32 %v6524_v4, %v7632_v19  ;;  %v2376_v48 = vpack.c.bf16 %v2355_v38, %v2361_v20 }
 0x115   : > { %v6533_v5 = vpop.permute.xlu1 %6532  ;;  %v2124_v31 = vmul.f32 %v6525_v49, %v7632_v19  ;;  %v2122_v10 = vmul.f32 %v6519_v44, %v7632_v19  ;;  %6140 = vmatprep.subr.bf16.mxu1 %v6633_v18  ;;  %v1974_v8 = vadd.f32 %v1958_v29, %v1810_v32  ;;  %v7851_v55 = vsel %vm7799_vm4, 1.0, %v9481_v57 }
 0x116   : > { %v6535_v36 = vunpack.i.h.bf16 %v6533_v5  ;;  %v6534_v22 = vunpack.i.l.bf16 %v6533_v5  ;;  %v6528_v61 = vpop.permute.xlu0 %6527  ;;  %1208 = vperm.xlu1 %6435, %v7453_v35   ;;  %6083 = vmatmul.mubr.msk.bf16.vlgmr.msra.gmra.mxu0 %vm2399_vm3, %v2376_v48  ;;  %9489 = vst [vmem:[#allocation40_spill] sm:$0xff] %v7851_v55  ;;  %v1976_v54 = vadd.f32 %v1960_v33, %v1812_v43  ;;  %v2139_v15 = vadd.f32 %v2123_v16, %v1975_v34 }
 0x117   : > { %v6530_v62 = vunpack.i.h.bf16 %v6528_v61  ;;  %v6529_v25 = vunpack.i.l.bf16 %v6528_v61  ;;  %1113 = vperm.xlu0 %6424, %v7777_v30   ;;  %v1961_v24 = vmul.f32 %v6520_v50, %v7589_v42  ;;  %6119 = vmatpush3.bf16.msra.mxu0 %v7417_v17  ;;  %v2138_v35 = vadd.f32 %v2122_v10, %v1974_v8  ;;  %v7858_v30 = vld [vmem:[#allocation7 + $0x18] sm:$0xff]  }
 0x118   : > { %v2287_v49 = vmul.f32 %v6534_v22, %v7658_v53  ;;  %v2288_v32 = vmul.f32 %v6535_v36, %v7658_v53  ;;  %6120 = vmatprep.subr.bf16.mxu0 %v6631_v46  ;;  %6141 = vmatpush3.bf16.msra.mxu1 %v6633_v18  ;;  %v1813_v57 = vadd.f32 %v1797_v6, %v1649_v0 }
 0x119   : > { %v2286_v29 = vmul.f32 %v6529_v25, %v7658_v53  ;;  %v6543_v21 = vpop.permute.xlu1 %6542  ;;  %v2140_v11 = vadd.f32 %v2124_v31, %v1976_v54  ;;  %v2125_v43 = vmul.f32 %v6530_v62, %v7632_v19  ;;  %v1303_v17 = vmul.f32 %v7851_v55, %v7807_v59 }
 0x11a   : > { %v6538_v20 = vpop.permute.xlu0 %6537  ;;  %1368 = vperm.xlu1 %6435, %v7772_v52   ;;  %v7864_v40 = vadd.f32 %v2287_v49, %v2139_v15  ;;  %v1977_v18 = vadd.f32 %v1961_v24, %v1813_v57  ;;  %v6544_v50 = vunpack.i.l.bf16 %v6543_v21  ;;  %v6545_v59 = vunpack.i.h.bf16 %v6543_v21 }
 0x11b   : > { %v7866_v33 = vadd.f32 %v2286_v29, %v2138_v35  ;;  %v6540_v60 = vunpack.i.h.bf16 %v6538_v20  ;;  %v6539_v4 = vunpack.i.l.bf16 %v6538_v20  ;;  %1213 = vperm.xlu0 %6424, %v7425_v23   ;;  %6121 = vmatpush3.bf16.msra.mxu0 %v6631_v46  ;;  %v7869_v6 = vadd.f32 %v2288_v32, %v2140_v11 }
 0x11c   : > { %6158 = vmatprep.subr.bf16.mxu0 %v7858_v30  ;;  %v2141_v52 = vadd.f32 %v2125_v43, %v1977_v18  ;;  %v2332_v46 = vrot.slane %v7864_v40, 7  ;;  %v1651_v61 = vmul.f32 %v6544_v50, %v7561_v14  ;;  %v1652_v49 = vmul.f32 %v6545_v59, %v7561_v14 }
 0x11d   : > { %v6553_v44 = vpop.permute.xlu1 %6552  ;;  %v2331_v38 = vrot.slane %v7866_v33, 7  ;;  %v1798_v16 = vmul.f32 %v6540_v60, %v7573_v26  ;;  %v1650_v23 = vmul.f32 %v6539_v4, %v7561_v14  ;;  %v2316_v48 = vpack.c.bf16 %v7864_v40, %v7866_v33 }
 0x11e   : > { %v6554_v34 = vunpack.i.l.bf16 %v6553_v44  ;;  %v6548_v0 = vpop.permute.xlu0 %6547  ;;  %1378 = vperm.xlu1 %6435, %v7797_v28   ;;  %v6555_v31 = vunpack.i.h.bf16 %v6553_v44  ;;  %v2333_v22 = vrot.slane %v7869_v6, 7 }
 0x11f   : > { %v6549_v5 = vunpack.i.l.bf16 %v6548_v0  ;;  %1373 = vperm.xlu0 %6424, %v1303_v17   ;;  %v6550_v36 = vunpack.i.h.bf16 %v6548_v0  ;;  %6106 = vmatprep.mubr.msk.bf16.mxu1 %vm2399_vm3, %v2316_v48  ;;  %v2354_v24 = vsel %vm1008_vm11, %v2330_v63, %v2331_v38  ;;  %v1814_v35 = vadd.f32 %v1798_v16, %v1650_v23 }
 0x120   : > { %v2289_v10 = vmul.f32 %v6554_v34, %v7658_v53  ;;  %v1962_v21 = vmul.f32 %v6555_v31, %v7589_v42  ;;  %v2353_v43 = vsel %vm1008_vm11, %v2331_v38, %v2332_v46  ;;  %v2363_v60 = vmul.f32 %v7513_v27, %v2354_v24 }
 0x121   : > { %v1799_v28 = vmul.f32 %v6549_v5, %v7573_v26  ;;  %v6563_v8 = vpop.permute.xlu1 %6562  ;;  %v1800_v57 = vmul.f32 %v6550_v36, %v7573_v26  ;;  %v2352_v31 = vsel %vm1008_vm11, %v2332_v46, %v2333_v22 }
 0x122   : > { %v7884_v62 = vadd.f32 %v2289_v10, %v2141_v52  ;;  %v6565_v25 = vunpack.i.h.bf16 %v6563_v8  ;;  %v6564_v54 = vunpack.i.l.bf16 %v6563_v8  ;;  %v6558_v15 = vpop.permute.xlu0 %6557  ;;  %v2377_v38 = vpack.c.bf16 %v2353_v43, %v2363_v60 }
 0x123   : > { %v6560_v32 = vunpack.i.h.bf16 %v6558_v15  ;;  %v6559_v29 = vunpack.i.l.bf16 %v6558_v15  ;;  %v1815_v11 = vadd.f32 %v1799_v28, %v1651_v61  ;;  %v1978_v23 = vadd.f32 %v1962_v21, %v1814_v35  ;;  %v7916_v21 = vld [vmem:[#allocation7 + $0x28] sm:$0xff]  }
 0x124   : > { %v2334_v20 = vrot.slane %v7884_v62, 7  ;;  %v1963_v17 = vmul.f32 %v6564_v54, %v7589_v42  ;;  %v2317_v4 = vpack.c.bf16 %v7884_v62, %v7869_v6  ;;  %v1964_v18 = vmul.f32 %v6565_v25, %v7589_v42  ;;  %6086 = vmatprep.mubr.msk.bf16.mxu0 %vm2399_vm3, %v2377_v38  ;;  %6178 = vmatprep.subr.bf16.mxu1 %v7916_v21 }
 0x125   : > { %v6573_v63 = vpop.permute.xlu1 %6572  ;;  %v1801_v50 = vmul.f32 %v6560_v32, %v7573_v26  ;;  %v1653_v34 = vmul.f32 %v6559_v29, %v7561_v14  ;;  %v1816_v5 = vadd.f32 %v1800_v57, %v1652_v49  ;;  %v2365_v46 = vmul.f32 %v7529_v47, %v2352_v31 }
 0x126   : > { %v6575_v44 = vunpack.i.h.bf16 %v6573_v63  ;;  %v6574_v52 = vunpack.i.l.bf16 %v6573_v63  ;;  %v6568_v59 = vpop.permute.xlu0 %6567  ;;  %6107 = vmatmul.mubr.msk.bf16.gmra.mxu1 %vm2399_vm3, %v2317_v4  ;;  %v1979_v10 = vadd.f32 %v1963_v17, %v1815_v11  ;;  %v2351_v8 = vsel %vm1008_vm11, %v2333_v22, %v2334_v20 }
 0x127   : > { %v6570_v0 = vunpack.i.h.bf16 %v6568_v59  ;;  %v6569_v16 = vunpack.i.l.bf16 %v6568_v59  ;;  %v1980_v49 = vadd.f32 %v1964_v18, %v1816_v5  ;;  %v1817_v35 = vadd.f32 %v1801_v50, %v1653_v34 }
 0x128   : > { %v2127_v48 = vmul.f32 %v6574_v52, %v7632_v19  ;;  %v2128_v36 = vmul.f32 %v6575_v44, %v7632_v19  ;;  %v2378_v17 = vpack.c.bf16 %v2351_v8, %v2365_v46 }
 0x129   : > { %v2126_v61 = vmul.f32 %v6569_v16, %v7632_v19  ;;  %v6583_v28 = vpop.permute.xlu1 %6582  ;;  %v1965_v25 = vmul.f32 %v6570_v0, %v7589_v42 }
 0x12a   : > { %v6585_v54 = vunpack.i.h.bf16 %v6583_v28  ;;  %v6584_v15 = vunpack.i.l.bf16 %v6583_v28  ;;  %v6578_v24 = vpop.permute.xlu0 %6577  ;;  %v2143_v57 = vadd.f32 %v2127_v48, %v1979_v10  ;;  %v2144_v22 = vadd.f32 %v2128_v36, %v1980_v49  ;;  %6087 = vmatmul.mubr.msk.bf16.gmra.mxu0 %vm2399_vm3, %v2378_v17 }
 0x12b   : > { %v6580_v32 = vunpack.i.h.bf16 %v6578_v24  ;;  %v6579_v29 = vunpack.i.l.bf16 %v6578_v24  ;;  %v2142_v60 = vadd.f32 %v2126_v61, %v1978_v23  ;;  %v1981_v18 = vadd.f32 %v1965_v25, %v1817_v35 }
 0x12c   : > { %v2292_v11 = vmul.f32 %v6585_v54, %v7658_v53  ;;  %v2291_v43 = vmul.f32 %v6584_v15, %v7658_v53 }
 0x12d   : > { %v2129_v63 = vmul.f32 %v6580_v32, %v7632_v19  ;;  %v2290_v4 = vmul.f32 %v6579_v29, %v7658_v53  ;;  %v6593_v44 = vpop.permute.xlu1 %6592 }
 0x12e   : > { %v7923_v50 = vadd.f32 %v2291_v43, %v2143_v57  ;;  %v6588_v52 = vpop.permute.xlu0 %6587  ;;  %v7926_v59 = vadd.f32 %v2292_v11, %v2144_v22  ;;  %v6595_v16 = vunpack.i.h.bf16 %v6593_v44  ;;  %v6594_v31 = vunpack.i.l.bf16 %v6593_v44 }
 0x12f   : > { %v7928_v34 = vadd.f32 %v2290_v4, %v2142_v60  ;;  %v6590_v38 = vunpack.i.h.bf16 %v6588_v52  ;;  %v6589_v0 = vunpack.i.l.bf16 %v6588_v52  ;;  %v2145_v5 = vadd.f32 %v2129_v63, %v1981_v18 }
 0x130   : > { %v2336_v23 = vrot.slane %v7923_v50, 7  ;;  %v2337_v54 = vrot.slane %v7926_v59, 7  ;;  %v1656_v49 = vmul.f32 %v6595_v16, %v7561_v14  ;;  %v1655_v57 = vmul.f32 %v6594_v31, %v7561_v14 }
 0x131   : > { %v2335_v48 = vrot.slane %v7928_v34, 7  ;;  %v6603_v10 = vpop.permute.xlu1 %6602  ;;  %v1802_v36 = vmul.f32 %v6590_v38, %v7573_v26  ;;  %v1654_v61 = vmul.f32 %v6589_v0, %v7561_v14  ;;  %v2318_v46 = vpack.c.bf16 %v7923_v50, %v7928_v34 }
 0x132   : > { %v6605_v28 = vunpack.i.h.bf16 %v6603_v10  ;;  %v6604_v8 = vunpack.i.l.bf16 %v6603_v10  ;;  %v6598_v25 = vpop.permute.xlu0 %6597 }
 0x133   : > { %v6600_v15 = vunpack.i.h.bf16 %v6598_v25  ;;  %v6599_v24 = vunpack.i.l.bf16 %v6598_v25  ;;  %v2350_v29 = vsel %vm1008_vm11, %v2334_v20, %v2335_v48  ;;  %v1818_v11 = vadd.f32 %v1802_v36, %v1654_v61  ;;  %6110 = vmatprep.mubr.msk.bf16.mxu1 %vm2399_vm3, %v2318_v46 }
 0x134   : > { %v1966_v35 = vmul.f32 %v6605_v28, %v7589_v42  ;;  %v2293_v32 = vmul.f32 %v6604_v8, %v7658_v53  ;;  %v2367_v22 = vmul.f32 %v7622_v12, %v2350_v29  ;;  %v2349_v14 = vsel %vm1008_vm11, %v2335_v48, %v2336_v23 }
 0x135   : > { %v1803_v43 = vmul.f32 %v6599_v24, %v7573_v26  ;;  %v6613_v17 = vpop.permute.xlu1 %6612  ;;  %v1804_v63 = vmul.f32 %v6600_v15, %v7573_v26  ;;  %v2348_v20 = vsel %vm1008_vm11, %v2336_v23, %v2337_v54 }
 0x136   : > { %v7948_v60 = vadd.f32 %v2293_v32, %v2145_v5  ;;  %v6615_v4 = vunpack.i.h.bf16 %v6613_v17  ;;  %v6614_v44 = vunpack.i.l.bf16 %v6613_v17  ;;  %v6608_v18 = vpop.permute.xlu0 %6607  ;;  %v1982_v0 = vadd.f32 %v1966_v35, %v1818_v11 }
 0x137   : > { %v6610_v52 = vunpack.i.h.bf16 %v6608_v18  ;;  %v6609_v38 = vunpack.i.l.bf16 %v6608_v18  ;;  %v1819_v31 = vadd.f32 %v1803_v43, %v1655_v57  ;;  %v2379_v36 = vpack.c.bf16 %v2349_v14, %v2367_v22 }
 0x138   : > { %v2338_v16 = vrot.slane %v7948_v60, 7  ;;  %v2130_v5 = vmul.f32 %v6614_v44, %v7632_v19  ;;  %v2319_v28 = vpack.c.bf16 %v7948_v60, %v7926_v59  ;;  %v1820_v8 = vadd.f32 %v1804_v63, %v1656_v49 }
 0x139   : > { %v1968_v10 = vmul.f32 %v6610_v52, %v7589_v42  ;;  %v1967_v26 = vmul.f32 %v6609_v38, %v7589_v42  ;;  %v6623_v61 = vpop.permute.xlu1 %6622  ;;  %v2131_v48 = vmul.f32 %v6615_v4, %v7632_v19  ;;  %6090 = vmatprep.mubr.msk.bf16.mxu0 %vm2399_vm3, %v2379_v36  ;;  %v2369_v49 = vmul.f32 %v7637_v3, %v2348_v20 }
 0x13a   : > { %v6625_v25 = vunpack.i.h.bf16 %v6623_v61  ;;  %v6624_v23 = vunpack.i.l.bf16 %v6623_v61  ;;  %v6618_v15 = vpop.permute.xlu0 %6617  ;;  %6111 = vmatmul.mubr.msk.bf16.gmra.mxu1 %vm2399_vm3, %v2319_v28  ;;  %v2347_v42 = vsel %vm1008_vm11, %v2337_v54, %v2338_v16  ;;  %v2146_v32 = vadd.f32 %v2130_v5, %v1982_v0 }
 0x13b   : > { %v1983_v24 = vadd.f32 %v1967_v26, %v1819_v31  ;;  %v6620_v46 = vunpack.i.h.bf16 %v6618_v15  ;;  %v6619_v35 = vunpack.i.l.bf16 %v6618_v15  ;;  %v1984_v57 = vadd.f32 %v1968_v10, %v1820_v8  ;;  %v991_v26 = vld [vmem:[%s9353_s3] sm:$0x7] }
 0x13c   : > { %v2295_v29 = vmul.f32 %v6624_v23, %v7658_v53  ;;  %v2655_v63 = vrot.slane %v7755_v7, 1  ;;  %v2656_v4 = vrot.slane %v7757_v9, 1  ;;  %v2380_v44 = vpack.c.bf16 %v2347_v42, %v2369_v49  ;;  %v9490_v23 = vld [vmem:[#allocation37_spill] sm:$0xff] }
 0x13d   : > { %v2147_v11 = vadd.f32 %v2131_v48, %v1983_v24  ;;  %v2294_v43 = vmul.f32 %v6620_v46, %v7658_v53  ;;  %v2132_v17 = vmul.f32 %v6619_v35, %v7632_v19  ;;  %v1119_v22 = vpop.permute.xlu1 %1118  ;;  %v2296_v54 = vmul.f32 %v6625_v25, %v7658_v53  ;;  %v9491_v46 = vld [vmem:[#allocation26_spill] sm:$0xff] }
 0x13e   : > { %v1044_v18 = vpop.permute.xlu0 %1043  ;;  %6091 = vmatmul.mubr.msk.bf16.gmra.mxu0 %vm2399_vm3, %v2380_v44  ;;  %v2683_v53 = vsel %vm1273_vm13, %v2655_v63, %v2656_v4  ;;  %v2654_v61 = vrot.slane %v7747_v37, 1  ;;  %v7996_v28 = vrot.slane %v991_v26, %v7545_v1  ;;  %v2658_v48 = vrot.slane %v7866_v33, 1 }
 0x13f   : > { %v7973_v52 = vadd.f32 %v2295_v29, %v2147_v11  ;;  %v2148_v38 = vadd.f32 %v2132_v17, %v1984_v57  ;;  %v7975_v14 = vadd.f32 %v2294_v43, %v2146_v32  ;;  %v2687_v35 = vmul.f32 %v9491_v46, %v2683_v53  ;;  %v9492_v43 = vld [vmem:[#allocation30_spill] sm:$0xff] }
 0x140   : > { %v2659_v42 = vrot.slane %v7864_v40, 1  ;;  %v2660_v32 = vrot.slane %v7869_v6, 1  ;;  %v2657_v49 = vrot.slane %v7809_v2, 1  ;;  %v8020_v17 = vrot.slane %v991_v26, %v9492_v43 }
 0x141   : > { %v7978_v20 = vadd.f32 %v2296_v54, %v2148_v38  ;;  %v2339_v19 = vrot.slane %v7975_v14, 7  ;;  %v1219_v0 = vpop.permute.xlu1 %1218  ;;  %v2340_v7 = vrot.slane %v7973_v52, 7  ;;  %v2320_v5 = vpack.c.bf16 %v7973_v52, %v7975_v14 }
 0x142   : > { %v1144_v31 = vpop.permute.xlu0 %1143  ;;  %v2684_v6 = vsel %vm1273_vm13, %v2654_v61, %v2655_v63  ;;  %v2681_v44 = vsel %vm1273_vm13, %v2657_v49, %v2658_v48  ;;  %v1240_v38 = vmul.f32 %v7996_v28, %v1219_v0  ;;  %v2662_v63 = vrot.slane %v7928_v34, 1 }
 0x143   : > { %v2341_v10 = vrot.slane %v7978_v20, 7  ;;  %v2321_v36 = vpack.c.bf16 %v7761_v45, %v7978_v20  ;;  %6114 = vmatprep.mubr.msk.bf16.mxu1 %vm2399_vm3, %v2320_v5  ;;  %v2346_v8 = vsel %vm1008_vm11, %v2338_v16, %v2339_v19  ;;  %v2345_v16 = vsel %vm1008_vm11, %v2339_v19, %v2340_v7 }
 0x144   : > { %v2371_v15 = vmul.f32 %v9490_v23, %v2346_v8  ;;  %v2702_v54 = vpack.c.bf16 %v2687_v35, %v2684_v6  ;;  %v9493_v19 = vsub.s32 2, %v7349_v41  ;;  %v2679_v5 = vsel %vm1273_vm13, %v2659_v42, %v2660_v32 }
 0x145   : > { %6115 = vmatmul.mubr.msk.bf16.gmra.mxu1 %vm2399_vm3, %v2321_v36  ;;  %v8003_v25 = vpop.permute.xlu1 %1053  ;;  %v2344_v24 = vsel %vm1008_vm11, %v2340_v7, %v2341_v10  ;;  %v2343_v11 = vsel %vm1008_vm11, %v2341_v10, %v2342_v13  ;;  %v1225_v53 = vmul.f32 %v7996_v28, %v1144_v31  ;;  %v9494_v10 = vld [vmem:[#allocation28_spill] sm:$0xff]  ;;  %v2663_v0 = vrot.slane %v7923_v50, 1 }
 0x146   : > { %v1049_v29 = vpop.permute.xlu0 %1048  ;;  %v2373_v33 = vmul.f32 %v7753_v56, %v2344_v24  ;;  %v2381_v57 = vpack.c.bf16 %v2345_v16, %v2371_v15  ;;  %v8033_v7 = vrot.slane %v991_v26, %v9493_v19  ;;  %v2689_v36 = vmul.f32 %v9494_v10, %v2681_v44  ;;  %v9495_v16 = vld [vmem:[#allocation32_spill] sm:$0xff] }
 0x147   : > { %v2664_v8 = vrot.slane %v7926_v59, 1  ;;  %v1140_v15 = vmul.f32 %v8020_v17, %v1119_v22  ;;  %v2661_v26 = vrot.slane %v7884_v62, 1  ;;  %v1125_v24 = vmul.f32 %v8020_v17, %v1044_v18  ;;  %v8055_v22 = vld [vmem:[%s9354_s4] ss:$0 sm:$0xff] }
 0x148   : > { %v2382_v40 = vpack.c.bf16 %v2343_v11, %v2373_v33  ;;  %6094 = vmatprep.mubr.msk.bf16.mxu0 %vm2399_vm3, %v2381_v57  ;;  %v2691_v33 = vmul.f32 %v9495_v16, %v2679_v5  ;;  %v2682_v50 = vsel %vm1273_vm13, %v2656_v4, %v2657_v49  ;;  %v2680_v44 = vsel %vm1273_vm13, %v2658_v48, %v2659_v42  ;;  %v6635_v4 = vld [vmem:[#allocation7 + $0x10] sm:$0xff]  }
 0x149   : > { %v1154_v2 = vpop.permute.xlu1 %1153  ;;  %v1256_v34 = vadd.f32 %v1240_v38, %v1140_v15  ;;  %v1241_v11 = vadd.f32 %v1225_v53, %v1125_v24  ;;  %v2677_v18 = vsel %vm1273_vm13, %v2661_v26, %v2662_v63  ;;  %v2703_v6 = vpack.c.bf16 %v2689_v36, %v2682_v50  ;;  %v9496_v15 = vld [vmem:[#allocation34_spill] sm:$0xff] }
 0x14a   : > { %6095 = vmatmul.mubr.msk.bf16.gmra.mxu0 %vm2399_vm3, %v2382_v40  ;;  %v1149_v13 = vpop.permute.xlu0 %1148  ;;  %v2675_v9 = vsel %vm1273_vm13, %v2663_v0, %v2664_v8  ;;  %v2665_v49 = vrot.slane %v7948_v60, 1  ;;  %v2704_v19 = vpack.c.bf16 %v2691_v33, %v2680_v44  ;;  %v2678_v5 = vsel %vm1273_vm13, %v2660_v32, %v2661_v26  ;;  %v9497_v26 = vld [vmem:[#allocation36_spill] sm:$0xff] }
 0x14b   : > { %6122 = vmatprep.mubr.msk.bf16.mxu0 %vm2399_vm3, %v2702_v54  ;;  %v1227_v53 = vmul.f32 %v7996_v28, %v1154_v2  ;;  %v1226_v36 = vmul.f32 %v7996_v28, %v1149_v13  ;;  %v2693_v24 = vmul.f32 %v9496_v15, %v2677_v18  ;;  %v2676_v32 = vsel %vm1273_vm13, %v2662_v63, %v2663_v0 }
 0x14c   : > { %v2695_v2 = vmul.f32 %v9497_v26, %v2675_v9  ;;  %v1127_v13 = vmul.f32 %v8020_v17, %v8003_v25  ;;  %v1126_v33 = vmul.f32 %v8020_v17, %v1049_v29 }
 0x14d   : > { %v1384_v35 = vpop.permute.xlu1 %1383  ;;  %v2705_v44 = vpack.c.bf16 %v2693_v24, %v2678_v5 }
 0x14e   : > { %v1405_v31 = vmul.f32 %v8033_v7, %v1384_v35  ;;  %v1309_v57 = vpop.permute.xlu0 %1308  ;;  %v2666_v35 = vrot.slane %v7975_v14, 1  ;;  %v2667_v14 = vrot.slane %v7973_v52, 1  ;;  %v1243_v63 = vadd.f32 %v1227_v53, %v1127_v13 }
 0x14f   : > { %v1390_v62 = vmul.f32 %v8033_v7, %v1309_v57  ;;  %v2668_v57 = vrot.slane %v7978_v20, 1  ;;  %v1242_v0 = vadd.f32 %v1226_v36, %v1126_v33  ;;  %v2706_v9 = vpack.c.bf16 %v2695_v2, %v2676_v32 }
 0x150   : > { %v1421_v40 = vadd.f32 %v1405_v31, %v1256_v34 }
 0x151   : > { %v1406_v54 = vadd.f32 %v1390_v62, %v1241_v11  ;;  %v1159_v38 = vpop.permute.xlu1 %1158 }
 0x152   : > { %v1444_v48 = vadd.f32 %v8055_v22, %v1421_v40  ;;  %6123 = vmatmul.mubr.msk.bf16.vlgmr.msra.gmra.mxu0 %vm2399_vm3, %v2703_v6  ;;  %v1059_v42 = vpop.permute.xlu0 %1058  ;;  %v1228_v29 = vmul.f32 %v7996_v28, %v1159_v38  ;;  %v2671_v38 = vsel %vm1273_vm13, %v2667_v14, %v2668_v57 }
 0x153   : > { %v1429_v34 = vadd.f32 %v8055_v22, %v1406_v54  ;;  %6126 = vmatprep.mubr.msk.bf16.mxu0 %vm2399_vm3, %v2704_v19  ;;  %6159 = vmatpush3.bf16.msra.mxu0 %v7858_v30  ;;  %v1128_v40 = vmul.f32 %v8020_v17, %v1059_v42  ;;  %v2673_v54 = vsel %vm1273_vm13, %v2665_v49, %v2666_v35 }
 0x154   : > { %vm1460_vm5 = vcmp.gt.f32.partialorder %v1444_v48, 0.0  ;;  %v1476_v31 = vmul.f32 0.01, %v1444_v48  ;;  %6160 = vmatprep.subr.bf16.mxu0 %v6635_v4  ;;  %v2697_v2 = vmul.f32 %v7711_v58, %v2673_v54  ;;  %v2699_v33 = vmul.f32 %v7851_v55, %v2671_v38 }
 0x155   : > { %vm1445_vm6 = vcmp.gt.f32.partialorder %v1429_v34, 0.0  ;;  %v1461_v50 = vmul.f32 0.01, %v1429_v34  ;;  %v1319_v11 = vpop.permute.xlu1 %1318  ;;  %v1244_v24 = vadd.f32 %v1228_v29, %v1128_v40 }
 0x156   : > { %v8086_v62 = vsel %vm1460_vm5, %v1444_v48, %v1476_v31  ;;  %v1392_v30 = vmul.f32 %v8033_v7, %v1319_v11  ;;  %v1314_v18 = vpop.permute.xlu0 %1313 }
 0x157   : > { %v8089_v25 = vsel %vm1445_vm6, %v1429_v34, %v1461_v50  ;;  %v1391_v52 = vmul.f32 %v8033_v7, %v1314_v18  ;;  %6161 = vmatpush3.bf16.msra.mxu0 %v6635_v4  ;;  %v2963_v19 = vrot.slane %v8086_v62, 7  ;;  %v2669_v4 = vrot.slane %v7761_v45, 1 }
 0x158   : > { %v1408_v6 = vadd.f32 %v1392_v30, %v1243_v63  ;;  %v2948_v53 = vrot.slane %v8089_v25, 7  ;;  %v2674_v30 = vsel %vm1273_vm13, %v2664_v8, %v2665_v49  ;;  %v2672_v18 = vsel %vm1273_vm13, %v2666_v35, %v2667_v14 }
 0x159   : > { %v1407_v36 = vadd.f32 %v1391_v52, %v1242_v0  ;;  %v1064_v48 = vpop.permute.xlu1 %1063  ;;  %v2685_v29 = vsel %vm1273_vm13, %v2669_v4, %v2654_v61  ;;  %v3274_v38 = vrot.slane %v8089_v25, 1 }
 0x15a   : > { %v1431_v5 = vadd.f32 %v8055_v22, %v1408_v6  ;;  %6127 = vmatmul.mubr.msk.bf16.gmra.mxu0 %vm2399_vm3, %v2705_v44  ;;  %v1324_v42 = vpop.permute.xlu0 %1323  ;;  %v2979_v11 = vsel %vm1008_vm11, %v2963_v19, %v2948_v53  ;;  %v2707_v44 = vpack.c.bf16 %v2697_v2, %v2674_v30  ;;  %v2670_v2 = vsel %vm1273_vm13, %v2668_v57, %v2669_v4 }
 0x15b   : > { %v1430_v34 = vadd.f32 %v8055_v22, %v1407_v36  ;;  %v1393_v32 = vmul.f32 %v8033_v7, %v1324_v42  ;;  %6130 = vmatprep.mubr.msk.bf16.mxu0 %vm2399_vm3, %v2706_v9  ;;  %v2708_v9 = vpack.c.bf16 %v2699_v33, %v2672_v18  ;;  %v2980_v8 = vmul.f32 %v7458_v39, %v2979_v11 }
 0x15c   : > { %vm1447_vm7 = vcmp.gt.f32.partialorder %v1431_v5, 0.0  ;;  %v1463_v13 = vmul.f32 0.01, %v1431_v5 }
 0x15d   : > { %vm1446_vm8 = vcmp.gt.f32.partialorder %v1430_v34, 0.0  ;;  %v1462_v45 = vmul.f32 0.01, %v1430_v34  ;;  %v1409_v31 = vadd.f32 %v1393_v32, %v1244_v24  ;;  %v1069_v50 = vpop.permute.xlu1 %1068 }
 0x15e   : > { %v8116_v63 = vsel %vm1447_vm7, %v1431_v5, %v1463_v13  ;;  %v1164_v0 = vpop.permute.xlu0 %1163  ;;  %v1129_v5 = vmul.f32 %v8020_v17, %v1064_v48  ;;  %v9498_v13 = vld [vmem:[#allocation25_spill] sm:$0xff] }
 0x15f   : > { %v2950_v40 = vrot.slane %v8116_v63, 7  ;;  %v1478_v52 = vsel %vm1446_vm8, %v1430_v34, %v1462_v45  ;;  %v1432_v6 = vadd.f32 %v8055_v22, %v1409_v31  ;;  %v3276_v60 = vrot.slane %v8116_v63, 1 }
 0x160   : > { %v2949_v59 = vrot.slane %v1478_v52, 7  ;;  %v3275_v49 = vrot.slane %v1478_v52, 1  ;;  %v1229_v37 = vmul.f32 %v7996_v28, %v1164_v0 }
 0x161   : > { %vm1448_vm9 = vcmp.gt.f32.partialorder %v1432_v6, 0.0  ;;  %v1464_v35 = vmul.f32 0.01, %v1432_v6  ;;  %v1169_v14 = vpop.permute.xlu1 %1168 }
 0x162   : > { %v2977_v61 = vsel %vm1008_vm11, %v2949_v59, %v2950_v40  ;;  %6131 = vmatmul.mubr.msk.bf16.gmra.mxu0 %vm2399_vm3, %v2707_v44  ;;  %v1074_v54 = vpop.permute.xlu0 %1073  ;;  %v2978_v36 = vsel %vm1008_vm11, %v2948_v53, %v2949_v59  ;;  %v2701_v53 = vmul.f32 %v9498_v13, %v2685_v29  ;;  %v1245_v45 = vadd.f32 %v1229_v37, %v1129_v5  ;;  %v6637_v29 = vld [vmem:[#allocation7 + $0x20] sm:$0xff]  }
 0x163   : > { %v8142_v42 = vsel %vm1448_vm9, %v1432_v6, %v1464_v35  ;;  %6134 = vmatprep.mubr.msk.bf16.mxu0 %vm2399_vm3, %v2708_v9  ;;  %v2996_v24 = vpack.c.bf16 %v2978_v36, %v2980_v8  ;;  %v2982_v33 = vmul.f32 %v7475_v51, %v2977_v61  ;;  %v3303_v31 = vsel %vm1273_vm13, %v3275_v49, %v3276_v60 }
 0x164   : > { %v2951_v34 = vrot.slane %v8142_v42, 7  ;;  %v3277_v32 = vrot.slane %v8142_v42, 1  ;;  %v8160_v11 = vsel %vm1273_vm13, %v3274_v38, %v3275_v49  ;;  %v8172_v30 = vmul.f32 %v9491_v46, %v3303_v31 }
 0x165   : > { %6142 = vmatprep.mubr.msk.bf16.mxu1 %vm2399_vm3, %v2996_v24  ;;  %v1329_v48 = vpop.permute.xlu1 %1328  ;;  %v2709_v44 = vpack.c.bf16 %v2701_v53, %v2670_v2  ;;  %v2935_v9 = vpack.c.bf16 %v1478_v52, %v8089_v25  ;;  %v1130_v37 = vmul.f32 %v8020_v17, %v1069_v50  ;;  %v1131_v61 = vmul.f32 %v8020_v17, %v1074_v54 }
 0x166   : > { %v2976_v20 = vsel %vm1008_vm11, %v2950_v40, %v2951_v34  ;;  %v8168_v57 = vsel %vm1273_vm13, %v3276_v60, %v3277_v32  ;;  %v1394_v4 = vmul.f32 %v8033_v7, %v1329_v48  ;;  %v1174_v0 = vpop.permute.xlu0 %1173  ;;  %v3322_v59 = vpack.c.bf16 %v8172_v30, %v8160_v11 }
 0x167   : > { %v2997_v18 = vpack.c.bf16 %v2976_v20, %v2982_v33  ;;  %v1230_v60 = vmul.f32 %v7996_v28, %v1169_v14  ;;  %v1231_v49 = vmul.f32 %v7996_v28, %v1174_v0  ;;  %v2936_v54 = vpack.c.bf16 %v8142_v42, %v8116_v63 }
 0x168   : > { %v1410_v6 = vadd.f32 %v1394_v4, %v1245_v45 }
 0x169   : > { %6143 = vmatmul.mubr.msk.bf16.vlgmr.msra.gmra.mxu1 %vm2399_vm3, %v2997_v18  ;;  %v1179_v40 = vpop.permute.xlu1 %1178  ;;  %v1246_v14 = vadd.f32 %v1230_v60, %v1130_v37  ;;  %v1247_v24 = vadd.f32 %v1231_v49, %v1131_v61 }
 0x16a   : > { %v1433_v8 = vadd.f32 %v8055_v22, %v1410_v6  ;;  %6135 = vmatmul.mubr.msk.bf16.gmra.mxu0 %vm2399_vm3, %v2709_v44  ;;  %v1079_v35 = vpop.permute.xlu0 %1078  ;;  %6179 = vmatpush3.bf16.msra.mxu1 %v7916_v21  ;;  %v1232_v33 = vmul.f32 %v7996_v28, %v1179_v40 }
 0x16b   : > { %6162 = vmatprep.mubr.msk.bf16.mxu0 %vm2399_vm3, %v2935_v9  ;;  %6180 = vmatprep.subr.bf16.mxu1 %v6637_v29  ;;  %v1132_v45 = vmul.f32 %v8020_v17, %v1079_v35 }
 0x16c   : > { %vm1449_vm10 = vcmp.gt.f32.partialorder %v1433_v8, 0.0  ;;  %v1465_v52 = vmul.f32 0.01, %v1433_v8 }
 0x16d   : > { %v1339_v36 = vpop.permute.xlu1 %1338  ;;  %v1248_v44 = vadd.f32 %v1232_v33, %v1132_v45 }
 0x16e   : > { %v8186_v5 = vsel %vm1449_vm10, %v1433_v8, %v1465_v52  ;;  %v1396_v2 = vmul.f32 %v8033_v7, %v1339_v36  ;;  %v1334_v53 = vpop.permute.xlu0 %1333  ;;  %6181 = vmatpush3.bf16.msra.mxu1 %v6637_v29 }
 0x16f   : > { %v3278_v21 = vrot.slane %v8186_v5, 1  ;;  %v1395_v50 = vmul.f32 %v8033_v7, %v1334_v53  ;;  %v2952_v0 = vrot.slane %v8186_v5, 7 }
 0x170   : > { %v1412_v48 = vadd.f32 %v1396_v2, %v1247_v24 }
 0x171   : > { %v3301_v31 = vsel %vm1273_vm13, %v3277_v32, %v3278_v21  ;;  %v1411_v20 = vadd.f32 %v1395_v50, %v1246_v14  ;;  %v1084_v4 = vpop.permute.xlu1 %1083  ;;  %v2975_v61 = vsel %vm1008_vm11, %v2951_v34, %v2952_v0 }
 0x172   : > { %v8201_v18 = vmul.f32 %v9494_v10, %v3301_v31  ;;  %v1435_v29 = vadd.f32 %v8055_v22, %v1412_v48  ;;  %6163 = vmatmul.mubr.msk.bf16.vlgmr.msra.gmra.mxu0 %vm2399_vm3, %v2936_v54  ;;  %v1344_v6 = vpop.permute.xlu0 %1343  ;;  %v2984_v45 = vmul.f32 %v7513_v27, %v2975_v61 }
 0x173   : > { %v1434_v63 = vadd.f32 %v8055_v22, %v1411_v20  ;;  %v1397_v40 = vmul.f32 %v8033_v7, %v1344_v6  ;;  %v1133_v20 = vmul.f32 %v8020_v17, %v1084_v4 }
 0x174   : > { %vm1451_vm12 = vcmp.gt.f32.partialorder %v1435_v29, 0.0  ;;  %v1467_v9 = vmul.f32 0.01, %v1435_v29  ;;  %v3323_v32 = vpack.c.bf16 %v8201_v18, %v8168_v57 }
 0x175   : > { %vm1450_vm14 = vcmp.gt.f32.partialorder %v1434_v63, 0.0  ;;  %v1466_v60 = vmul.f32 0.01, %v1434_v63  ;;  %v1413_v8 = vadd.f32 %v1397_v40, %v1248_v44  ;;  %v1089_v49 = vpop.permute.xlu1 %1088 }
 0x176   : > { %v8209_v35 = vsel %vm1451_vm12, %v1435_v29, %v1467_v9  ;;  %v1184_v37 = vpop.permute.xlu0 %1183 }
 0x177   : > { %v2954_v52 = vrot.slane %v8209_v35, 7  ;;  %v8216_v36 = vsel %vm1450_vm14, %v1434_v63, %v1466_v60  ;;  %v1436_v14 = vadd.f32 %v8055_v22, %v1413_v8  ;;  %v1233_v42 = vmul.f32 %v7996_v28, %v1184_v37 }
 0x178   : > { %v2953_v24 = vrot.slane %v8216_v36, 7  ;;  %v2937_v2 = vpack.c.bf16 %v8216_v36, %v8186_v5 }
 0x179   : > { %vm1452_vm15 = vcmp.gt.f32.partialorder %v1436_v14, 0.0  ;;  %v1468_v53 = vmul.f32 0.01, %v1436_v14  ;;  %v1189_v33 = vpop.permute.xlu1 %1188  ;;  %v1249_v40 = vadd.f32 %v1233_v42, %v1133_v20 }
 0x17a   : > { %6166 = vmatprep.mubr.msk.bf16.mxu0 %vm2399_vm3, %v2937_v2  ;;  %v1094_v34 = vpop.permute.xlu0 %1093  ;;  %v2974_v50 = vsel %vm1008_vm11, %v2952_v0, %v2953_v24  ;;  %v2973_v54 = vsel %vm1008_vm11, %v2953_v24, %v2954_v52  ;;  %v1234_v61 = vmul.f32 %v7996_v28, %v1189_v33 }
 0x17b   : > { %v8229_v48 = vsel %vm1452_vm15, %v1436_v14, %v1468_v53  ;;  %v2998_v31 = vpack.c.bf16 %v2974_v50, %v2984_v45  ;;  %v2986_v63 = vmul.f32 %v7529_v47, %v2973_v54  ;;  %v1134_v53 = vmul.f32 %v8020_v17, %v1089_v49 }
 0x17c   : > { %v2955_v29 = vrot.slane %v8229_v48, 7  ;;  %v2938_v6 = vpack.c.bf16 %v8229_v48, %v8209_v35  ;;  %v1135_v45 = vmul.f32 %v8020_v17, %v1094_v34 }
 0x17d   : > { %6146 = vmatprep.mubr.msk.bf16.mxu1 %vm2399_vm3, %v2998_v31  ;;  %v1349_v44 = vpop.permute.xlu1 %1348 }
 0x17e   : > { %v1398_v0 = vmul.f32 %v8033_v7, %v1349_v44  ;;  %6167 = vmatmul.mubr.msk.bf16.gmra.mxu0 %vm2399_vm3, %v2938_v6  ;;  %v1194_v9 = vpop.permute.xlu0 %1193  ;;  %v2972_v60 = vsel %vm1008_vm11, %v2954_v52, %v2955_v29  ;;  %v1250_v52 = vadd.f32 %v1234_v61, %v1134_v53 }
 0x17f   : > { %v2999_v4 = vpack.c.bf16 %v2972_v60, %v2986_v63  ;;  %v1235_v24 = vmul.f32 %v7996_v28, %v1194_v9 }
 0x180   : > { %v1414_v8 = vadd.f32 %v1398_v0, %v1249_v40 }
 0x181   : > { %6147 = vmatmul.mubr.msk.bf16.gmra.mxu1 %vm2399_vm3, %v2999_v4  ;;  %v1199_v37 = vpop.permute.xlu1 %1198  ;;  %v1251_v54 = vadd.f32 %v1235_v24, %v1135_v45 }
 0x182   : > { %v1437_v14 = vadd.f32 %v8055_v22, %v1414_v8  ;;  %v1099_v2 = vpop.permute.xlu0 %1098  ;;  %v1236_v33 = vmul.f32 %v7996_v28, %v1199_v37 }
 0x183   : > { %v1136_v44 = vmul.f32 %v8020_v17, %v1099_v2 }
 0x184   : > { %vm1453_vm0 = vcmp.gt.f32.partialorder %v1437_v14, 0.0  ;;  %v1469_v42 = vmul.f32 0.01, %v1437_v14 }
 0x185   : > { %v1359_v50 = vpop.permute.xlu1 %1358  ;;  %v1252_v4 = vadd.f32 %v1236_v33, %v1136_v44 }
 0x186   : > { %v1400_v31 = vmul.f32 %v8033_v7, %v1359_v50  ;;  %v1354_v20 = vpop.permute.xlu0 %1353  ;;  %v8248_v6 = vsel %vm1453_vm0, %v1437_v14, %v1469_v42 }
 0x187   : > { %v1399_v63 = vmul.f32 %v8033_v7, %v1354_v20  ;;  %v2956_v34 = vrot.slane %v8248_v6, 7 }
 0x188   : > { %v1416_v40 = vadd.f32 %v1400_v31, %v1251_v54 }
 0x189   : > { %v1415_v49 = vadd.f32 %v1399_v63, %v1250_v52  ;;  %v1104_v0 = vpop.permute.xlu1 %1103  ;;  %v2971_v42 = vsel %vm1008_vm11, %v2955_v29, %v2956_v34 }
 0x18a   : > { %v1439_v9 = vadd.f32 %v8055_v22, %v1416_v40  ;;  %v1364_v60 = vpop.permute.xlu0 %1363  ;;  %v2988_v63 = vmul.f32 %v7622_v12, %v2971_v42 }
 0x18b   : > { %v1438_v8 = vadd.f32 %v8055_v22, %v1415_v49  ;;  %v1401_v61 = vmul.f32 %v8033_v7, %v1364_v60 }
 0x18c   : > { %vm1455_vm1 = vcmp.gt.f32.partialorder %v1439_v9, 0.0  ;;  %v1471_v14 = vmul.f32 0.01, %v1439_v9 }
 0x18d   : > { %vm1454_vm2 = vcmp.gt.f32.partialorder %v1438_v8, 0.0  ;;  %v1470_v37 = vmul.f32 0.01, %v1438_v8  ;;  %v1417_v24 = vadd.f32 %v1401_v61, %v1252_v4  ;;  %v1109_v2 = vpop.permute.xlu1 %1108 }
 0x18e   : > { %v8257_v53 = vsel %vm1455_vm1, %v1439_v9, %v1471_v14  ;;  %v1204_v45 = vpop.permute.xlu0 %1203 }
 0x18f   : > { %v2958_v50 = vrot.slane %v8257_v53, 7  ;;  %v8262_v52 = vsel %vm1454_vm2, %v1438_v8, %v1470_v37  ;;  %v1440_v54 = vadd.f32 %v8055_v22, %v1417_v24  ;;  %v1237_v40 = vmul.f32 %v7996_v28, %v1204_v45 }
 0x190   : > { %v2957_v31 = vrot.slane %v8262_v52, 7  ;;  %v2939_v20 = vpack.c.bf16 %v8262_v52, %v8248_v6  ;;  %v1137_v8 = vmul.f32 %v8020_v17, %v1104_v0 }
 0x191   : > { %vm1456_vm4 = vcmp.gt.f32.partialorder %v1440_v54, 0.0  ;;  %v1472_v33 = vmul.f32 0.01, %v1440_v54  ;;  %v1209_v44 = vpop.permute.xlu1 %1208 }
 0x192   : > { %6170 = vmatprep.mubr.msk.bf16.mxu0 %vm2399_vm3, %v2939_v20  ;;  %v1114_v29 = vpop.permute.xlu0 %1113  ;;  %v2970_v49 = vsel %vm1008_vm11, %v2956_v34, %v2957_v31  ;;  %v2969_v9 = vsel %vm1008_vm11, %v2957_v31, %v2958_v50  ;;  %v1253_v45 = vadd.f32 %v1237_v40, %v1137_v8  ;;  %v1238_v0 = vmul.f32 %v7996_v28, %v1209_v44 }
 0x193   : > { %v8275_v60 = vsel %vm1456_vm4, %v1440_v54, %v1472_v33  ;;  %v3000_v4 = vpack.c.bf16 %v2970_v49, %v2988_v63  ;;  %v2990_v24 = vmul.f32 %v7637_v3, %v2969_v9  ;;  %v1139_v33 = vmul.f32 %v8020_v17, %v1114_v29 }
 0x194   : > { %v2959_v61 = vrot.slane %v8275_v60, 7  ;;  %v2940_v14 = vpack.c.bf16 %v8275_v60, %v8257_v53  ;;  %v1138_v49 = vmul.f32 %v8020_v17, %v1109_v2  ;;  %v3285_v18 = vrot.slane %v8275_v60, 1 }
 0x195   : > { %6150 = vmatprep.mubr.msk.bf16.mxu1 %vm2399_vm3, %v3000_v4  ;;  %v1369_v37 = vpop.permute.xlu1 %1368 }
 0x196   : > { %v1402_v34 = vmul.f32 %v8033_v7, %v1369_v37  ;;  %6171 = vmatmul.mubr.msk.bf16.gmra.mxu0 %vm2399_vm3, %v2940_v14  ;;  %v1214_v42 = vpop.permute.xlu0 %1213  ;;  %v2968_v54 = vsel %vm1008_vm11, %v2958_v50, %v2959_v61  ;;  %v1254_v50 = vadd.f32 %v1238_v0, %v1138_v49 }
 0x197   : > { %v1239_v31 = vmul.f32 %v7996_v28, %v1214_v42  ;;  %v3001_v20 = vpack.c.bf16 %v2968_v54, %v2990_v24 }
 0x198   : > { %v1418_v63 = vadd.f32 %v1402_v34, %v1253_v45 }
 0x199   : > { %6151 = vmatmul.mubr.msk.bf16.gmra.mxu1 %vm2399_vm3, %v3001_v20  ;;  %v1379_v40 = vpop.permute.xlu1 %1378  ;;  %v1255_v4 = vadd.f32 %v1239_v31, %v1139_v33 }
 0x19a   : > { %v1441_v9 = vadd.f32 %v8055_v22, %v1418_v63  ;;  %v1404_v8 = vmul.f32 %v8033_v7, %v1379_v40  ;;  %v1374_v14 = vpop.permute.xlu0 %1373  ;;  %v3280_v40 = vrot.slane %v8209_v35, 1 }
 0x19b   : > { %v1403_v44 = vmul.f32 %v8033_v7, %v1374_v14  ;;  %v6638_v14 = vld [vmem:[#allocation8 + $0x18] sm:$0xff]  }
 0x19c   : > { %vm1457_vm5 = vcmp.gt.f32.partialorder %v1441_v9, 0.0  ;;  %v1473_v28 = vmul.f32 0.01, %v1441_v9  ;;  %v1420_v37 = vadd.f32 %v1404_v8, %v1255_v4  ;;  %6218 = vmatprep.subr.bf16.mxu1 %v6638_v14 }
 0x19d   : > { %v1419_v24 = vadd.f32 %v1403_v44, %v1254_v50 }
 0x19e   : > { %v8295_v29 = vsel %vm1457_vm5, %v1441_v9, %v1473_v28  ;;  %v1443_v17 = vadd.f32 %v8055_v22, %v1420_v37  ;;  %v3279_v9 = vrot.slane %v8216_v36, 1  ;;  %v6639_v28 = vld [vmem:[#allocation8 + $0x8] sm:$0xff]   ;;  %v3282_v36 = vrot.slane %v8248_v6, 1  ;;  %v6641_v6 = vld [vmem:[#allocation8] sm:$0xff]  }
 0x19f   : > { %v2960_v2 = vrot.slane %v8295_v29, 7  ;;  %v1442_v45 = vadd.f32 %v8055_v22, %v1419_v24  ;;  %6198 = vmatprep.subr.bf16.mxu0 %v6639_v28  ;;  %v3284_v37 = vrot.slane %v8257_v53, 1  ;;  %v3283_v24 = vrot.slane %v8262_v52, 1 }
 0x1a0   : > { %vm1459_vm6 = vcmp.gt.f32.partialorder %v1443_v17, 0.0  ;;  %v1475_v34 = vmul.f32 0.01, %v1443_v17  ;;  %v3299_v35 = vsel %vm1273_vm13, %v3279_v9, %v3280_v40  ;;  %6199 = vmatpush3.bf16.msra.mxu0 %v6639_v28 }
 0x1a1   : > { %vm1458_vm7 = vcmp.gt.f32.partialorder %v1442_v45, 0.0  ;;  %v1474_v42 = vmul.f32 0.01, %v1442_v45  ;;  %v2967_v7 = vsel %vm1008_vm11, %v2959_v61, %v2960_v2  ;;  %6200 = vmatprep.subr.bf16.mxu0 %v6641_v6 }
 0x1a2   : > { %v8300_v54 = vsel %vm1459_vm6, %v1443_v17, %v1475_v34  ;;  %v2992_v63 = vmul.f32 %v9490_v23, %v2967_v7  ;;  %v3281_v17 = vrot.slane %v8229_v48, 1  ;;  %v3296_v34 = vsel %vm1273_vm13, %v3282_v36, %v3283_v24 }
 0x1a3   : > { %v2962_v0 = vrot.slane %v8300_v54, 7  ;;  %v8305_v31 = vsel %vm1458_vm7, %v1442_v45, %v1474_v42  ;;  %v2942_v20 = vpack.c.bf16 %v8086_v62, %v8300_v54  ;;  %v6640_v45 = vld [vmem:[#allocation8 + $0x10] sm:$0xff]   ;;  %v3288_v53 = vrot.slane %v8300_v54, 1 }
 0x1a4   : > { %v2961_v33 = vrot.slane %v8305_v31, 7  ;;  %v2941_v22 = vpack.c.bf16 %v8305_v31, %v8295_v29  ;;  %v3297_v30 = vsel %vm1273_vm13, %v3281_v17, %v3282_v36  ;;  %v3287_v57 = vrot.slane %v8305_v31, 1  ;;  %6201 = vmatpush3.bf16.msra.mxu0 %v6641_v6 }
 0x1a5   : > { %v2964_v50 = vsel %vm1008_vm11, %v2962_v0, %v2963_v19  ;;  %v3311_v19 = vmul.f32 %v9495_v16, %v3299_v35  ;;  %v3313_v5 = vmul.f32 %v9496_v15, %v3297_v30  ;;  %v3294_v31 = vsel %vm1273_vm13, %v3284_v37, %v3285_v18 }
 0x1a6   : > { %6174 = vmatprep.mubr.msk.bf16.mxu0 %vm2399_vm3, %v2941_v22  ;;  %v2966_v49 = vsel %vm1008_vm11, %v2960_v2, %v2961_v33  ;;  %v2965_v61 = vsel %vm1008_vm11, %v2961_v33, %v2962_v0  ;;  %v3300_v2 = vsel %vm1273_vm13, %v3278_v21, %v3279_v9  ;;  %v3286_v21 = vrot.slane %v8295_v29, 1 }
 0x1a7   : > { %6175 = vmatmul.mubr.msk.bf16.gmra.mxu0 %vm2399_vm3, %v2942_v20  ;;  %v3002_v4 = vpack.c.bf16 %v2966_v49, %v2992_v63  ;;  %v2994_v8 = vmul.f32 %v7753_v56, %v2965_v61  ;;  %v3324_v11 = vpack.c.bf16 %v3311_v19, %v3300_v2  ;;  %v3291_v54 = vsel %vm1273_vm13, %v3287_v57, %v3288_v53  ;;  %v8373_v20 = vld [vmem:[#allocation8 + $0x28] sm:$0xff]  }
 0x1a8   : > { %v3293_v42 = vsel %vm1273_vm13, %v3285_v18, %v3286_v21  ;;  %v3319_v7 = vmul.f32 %v7851_v55, %v3291_v54  ;;  %v3289_v0 = vrot.slane %v8086_v62, 1  ;;  %v3292_v22 = vsel %vm1273_vm13, %v3286_v21, %v3287_v57  ;;  %6238 = vmatprep.subr.bf16.mxu0 %v8373_v20 }
 0x1a9   : > { %6154 = vmatprep.mubr.msk.bf16.mxu1 %vm2399_vm3, %v3002_v4  ;;  %v3003_v44 = vpack.c.bf16 %v2964_v50, %v2994_v8  ;;  %v3317_v60 = vmul.f32 %v7711_v58, %v3293_v42 }
 0x1aa   : > { %v3328_v63 = vpack.c.bf16 %v3319_v7, %v3292_v22  ;;  %v3305_v62 = vsel %vm1273_vm13, %v3289_v0, %v3274_v38  ;;  %v3290_v49 = vsel %vm1273_vm13, %v3288_v53, %v3289_v0  ;;  %v8405_v22 = vld [vmem:[%s9356_s6] ss:$0 sm:$0xff] }
 0x1ab   : > { %6155 = vmatmul.mubr.msk.bf16.gmra.mxu1 %vm2399_vm3, %v3003_v44  ;;  %v3327_v33 = vpack.c.bf16 %v3317_v60, %v3294_v31  ;;  %v3321_v61 = vmul.f32 %v9498_v13, %v3305_v62 }
 0x1ac   : > { %6182 = vmatprep.mubr.msk.bf16.mxu1 %vm2399_vm3, %v3322_v59  ;;  %v3295_v59 = vsel %vm1273_vm13, %v3283_v24, %v3284_v37 }
 0x1ad   : > { %v3315_v48 = vmul.f32 %v9497_v26, %v3295_v59 }
 0x1af   : > { %v3326_v29 = vpack.c.bf16 %v3315_v48, %v3296_v34 }
 0x1b3   : > { %6183 = vmatmul.mubr.msk.bf16.vlgmr.msra.gmra.mxu1 %vm2399_vm3, %v3323_v32  ;;  %v3298_v32 = vsel %vm1273_vm13, %v3280_v40, %v3281_v17  ;;  %v3329_v40 = vpack.c.bf16 %v3321_v61, %v3290_v49 }
 0x1b4   : > { %6186 = vmatprep.mubr.msk.bf16.mxu1 %vm2399_vm3, %v3324_v11  ;;  %6219 = vmatpush3.bf16.msra.mxu1 %v6638_v14  ;;  %v3325_v52 = vpack.c.bf16 %v3313_v5, %v3298_v32 }
 0x1b5   : > { %6220 = vmatprep.subr.bf16.mxu1 %v6640_v45 }
 0x1b8   : > { %6221 = vmatpush3.bf16.msra.mxu1 %v6640_v45 }
 0x1bb   : > { %6187 = vmatmul.mubr.msk.bf16.gmra.mxu1 %vm2399_vm3, %v3325_v52 }
 0x1bc   : > { %6190 = vmatprep.mubr.msk.bf16.mxu1 %vm2399_vm3, %v3326_v29 }
 0x1c3   : > { %6191 = vmatmul.mubr.msk.bf16.gmra.mxu1 %vm2399_vm3, %v3327_v33 }
 0x1c4   : > { %6194 = vmatprep.mubr.msk.bf16.mxu1 %vm2399_vm3, %v3328_v63 }
 0x1cb   : > { %6195 = vmatmul.mubr.msk.bf16.gmra.mxu1 %vm2399_vm3, %v3329_v40 }
 0x1d2   : > { %v6104_v44 = vpop.f32.mrf.mxu1 }
 0x1d4   : > { %v2591_v35 = vpop.f32.mrf.mxu1 }
 0x1d6   : > { %v6084_v9 = vpop.f32.mrf.mxu0  ;;  %v6105_v36 = vpop.f32.mrf.mxu1 }
 0x1d7   : > { %v2600_v29 = vadd.f32 %v6104_v44, %v6084_v9 }
 0x1d8   : > { %v2458_v4 = vpop.f32.mrf.mxu0  ;;  %v2594_v38 = vpop.f32.mrf.mxu1 }
 0x1d9   : > { %v2592_v52 = vadd.f32 %v2591_v35, %v2458_v4 }
 0x1da   : > { %v6085_v8 = vpop.f32.mrf.mxu0 }
 0x1db   : > { %v2603_v34 = vadd.f32 %v6105_v36, %v6085_v8 }
 0x1dc   : > { %v2461_v14 = vpop.f32.mrf.mxu0 }
 0x1dd   : > { %v2595_v7 = vadd.f32 %v2594_v38, %v2461_v14 }
 0x1e6   : > { %v6108_v24 = vpop.f32.mrf.mxu1 }
 0x1e8   : > { %v2607_v45 = vpop.f32.mrf.mxu1 }
 0x1ea   : > { %v6088_v50 = vpop.f32.mrf.mxu0  ;;  %v6109_v30 = vpop.f32.mrf.mxu1 }
 0x1eb   : > { %v2616_v14 = vadd.f32 %v6108_v24, %v6088_v50 }
 0x1ec   : > { %v2474_v28 = vpop.f32.mrf.mxu0  ;;  %v2610_v21 = vpop.f32.mrf.mxu1 }
 0x1ed   : > { %v2608_v44 = vadd.f32 %v2607_v45, %v2474_v28 }
 0x1ee   : > { %v6089_v25 = vpop.f32.mrf.mxu0 }
 0x1ef   : > { %v2619_v35 = vadd.f32 %v6109_v30, %v6089_v25 }
 0x1f0   : > { %v2477_v19 = vpop.f32.mrf.mxu0 }
 0x1fa   : > { %v6112_v6 = vpop.f32.mrf.mxu1 }
 0x1fc   : > { %v2623_v18 = vpop.f32.mrf.mxu1 }
 0x1fe   : > { %v8388_v37 = vpop.f32.mrf.mxu0  ;;  %v6113_v0 = vpop.f32.mrf.mxu1 }
 0x200   : > { %v2490_v17 = vpop.f32.mrf.mxu0  ;;  %v2626_v40 = vpop.f32.mrf.mxu1 }
 0x202   : > { %v8390_v2 = vpop.f32.mrf.mxu0 }
 0x204   : > { %v8392_v11 = vpop.f32.mrf.mxu0 }
 0x205   : > { %v8411_v36 = vpop.f32.mrf.mxu1 }
 0x207   : > { %v2639_v50 = vpop.f32.mrf.mxu1 }
 0x20a   : > { %v8394_v59 = vpop.f32.mrf.mxu0 }
 0x20c   : > { %v8396_v5 = vpop.f32.mrf.mxu0 }
 0x20e   : > { %v8398_v48 = vpop.f32.mrf.mxu0 }
 0x210   : > { %v8400_v53 = vpop.f32.mrf.mxu0 }
 0x212   : > { %v6124_v57 = vpop.f32.mrf.mxu0 }
 0x213   : > { %v2850_v31 = vadd.f32 %v6124_v57, %v2600_v29 }
 0x214   : > { %v2785_v32 = vpop.f32.mrf.mxu0 }
 0x215   : > { %v2848_v54 = vadd.f32 %v2785_v32, %v2592_v52  ;;  %v2873_v9 = vadd.f32 %v8405_v22, %v2850_v31 }
 0x216   : > { %v6125_v42 = vpop.f32.mrf.mxu0 }
 0x217   : > { %v2851_v60 = vadd.f32 %v6125_v42, %v2603_v34  ;;  %v2871_v61 = vadd.f32 %v8405_v22, %v2848_v54  ;;  %v2905_v29 = vmul.f32 0.01, %v2873_v9  ;;  %vm2889_vm12 = vcmp.gt.f32.partialorder %v2873_v9, 0.0 }
 0x218   : > { %v2788_v33 = vpop.f32.mrf.mxu0 }
 0x219   : > { %v2874_v63 = vadd.f32 %v8405_v22, %v2851_v60  ;;  %v2849_v62 = vadd.f32 %v2788_v33, %v2595_v7  ;;  %v2903_v32 = vmul.f32 0.01, %v2871_v61  ;;  %vm2887_vm10 = vcmp.gt.f32.partialorder %v2871_v61, 0.0 }
 0x21a   : > { %v6128_v49 = vpop.f32.mrf.mxu0  ;;  %v2611_v7 = vadd.f32 %v2610_v21, %v2477_v19 }
 0x21b   : > { %v2872_v4 = vadd.f32 %v8405_v22, %v2849_v62  ;;  %v2906_v38 = vmul.f32 0.01, %v2874_v63  ;;  %vm2890_vm9 = vcmp.gt.f32.partialorder %v2874_v63, 0.0  ;;  %v2854_v34 = vadd.f32 %v6128_v49, %v2616_v14  ;;  %v6117_v14 = vpop.f32.mrf.mxu1 }
 0x21c   : > { %v2801_v8 = vpop.f32.mrf.mxu0  ;;  %v8417_v24 = vsel %vm2887_vm10, %v2871_v61, %v2903_v32  ;;  %v2624_v62 = vadd.f32 %v2623_v18, %v2490_v17  ;;  %v8421_v49 = vsel %vm2889_vm12, %v2873_v9, %v2905_v29  ;;  %v2635_v18 = vadd.f32 %v6113_v0, %v8390_v2 }
 0x21d   : > { %vm2888_vm8 = vcmp.gt.f32.partialorder %v2872_v4, 0.0  ;;  %v2904_v52 = vmul.f32 0.01, %v2872_v4  ;;  %v2852_v42 = vadd.f32 %v2801_v8, %v2608_v44  ;;  %v8415_v28 = vsel %vm2890_vm9, %v2874_v63, %v2906_v38 }
 0x21e   : > { %v6129_v57 = vpop.f32.mrf.mxu0  ;;  %v2877_v45 = vadd.f32 %v8405_v22, %v2854_v34  ;;  %v3485_v63 = vpack.c.bf16 %v8415_v28, %v8421_v49  ;;  %v2627_v38 = vadd.f32 %v2626_v40, %v8392_v11  ;;  %v2642_v34 = vpop.f32.mrf.mxu1 }
 0x21f   : > { %v2855_v54 = vadd.f32 %v6129_v57, %v2619_v35  ;;  %v8413_v31 = vsel %vm2888_vm8, %v2872_v4, %v2904_v52  ;;  %v2875_v8 = vadd.f32 %v8405_v22, %v2852_v42  ;;  %v2632_v4 = vadd.f32 %v6112_v6, %v8388_v37 }
 0x220   : > { %v2804_v60 = vpop.f32.mrf.mxu0  ;;  %v3484_v19 = vpack.c.bf16 %v8413_v31, %v8417_v24  ;;  %v2909_v9 = vmul.f32 0.01, %v2877_v45  ;;  %vm2893_vm0 = vcmp.gt.f32.partialorder %v2877_v45, 0.0 }
 0x221   : > { %v2878_v30 = vadd.f32 %v8405_v22, %v2855_v54  ;;  %v2853_v33 = vadd.f32 %v2804_v60, %v2611_v7  ;;  %v2907_v57 = vmul.f32 0.01, %v2875_v8  ;;  %vm2891_vm1 = vcmp.gt.f32.partialorder %v2875_v8, 0.0 }
 0x222   : > { %v6132_v25 = vpop.f32.mrf.mxu0  ;;  %6222 = vmatprep.mubr.msk.bf16.mxu1 %vm2399_vm3, %v3484_v19  ;;  %v2640_v54 = vadd.f32 %v2639_v50, %v8396_v5  ;;  %v8440_v11 = vsel %vm2893_vm0, %v2877_v45, %v2909_v9  ;;  %v2648_v5 = vadd.f32 %v8411_v36, %v8394_v59  ;;  %v2651_v50 = vadd.f32 %v6117_v14, %v8398_v48 }
 0x223   : > { %v2876_v61 = vadd.f32 %v8405_v22, %v2853_v33  ;;  %v2910_v35 = vmul.f32 0.01, %v2878_v30  ;;  %6223 = vmatmul.mubr.msk.bf16.vlgmr.msra.gmra.mxu1 %vm2399_vm3, %v3485_v63  ;;  %vm2894_vm15 = vcmp.gt.f32.partialorder %v2878_v30, 0.0  ;;  %v2858_v37 = vadd.f32 %v6132_v25, %v2632_v4 }
 0x224   : > { %v2817_v21 = vpop.f32.mrf.mxu0  ;;  %v8442_v40 = vsel %vm2891_vm1, %v2875_v8, %v2907_v57  ;;  %vm4225_vm0 = vcmask 523264  }
 0x225   : > { %v2856_v44 = vadd.f32 %v2817_v21, %v2624_v62  ;;  %vm2892_vm14 = vcmp.gt.f32.partialorder %v2876_v61, 0.0  ;;  %v2908_v32 = vmul.f32 0.01, %v2876_v61  ;;  %v8438_v60 = vsel %vm2894_vm15, %v2878_v30, %v2910_v35 }
 0x226   : > { %v6133_v17 = vpop.f32.mrf.mxu0  ;;  %v2881_v62 = vadd.f32 %v8405_v22, %v2858_v37  ;;  %v3487_v30 = vpack.c.bf16 %v8438_v60, %v8440_v11 }
 0x227   : > { %v2859_v6 = vadd.f32 %v6133_v17, %v2635_v18  ;;  %v8434_v29 = vsel %vm2892_vm14, %v2876_v61, %v2908_v32  ;;  %v2879_v2 = vadd.f32 %v8405_v22, %v2856_v44  ;;  %v2643_v61 = vadd.f32 %v2642_v34, %v8400_v53 }
 0x228   : > { %v2820_v52 = vpop.f32.mrf.mxu0  ;;  %v3486_v21 = vpack.c.bf16 %v8434_v29, %v8442_v40  ;;  %v2913_v36 = vmul.f32 0.01, %v2881_v62  ;;  %v3499_v53 = vrot.slane %v8421_v49, 7  ;;  %vm2897_vm6 = vcmp.gt.f32.partialorder %v2881_v62, 0.0 }
 0x229   : > { %v2857_v0 = vadd.f32 %v2820_v52, %v2627_v38  ;;  %v2882_v7 = vadd.f32 %v8405_v22, %v2859_v6  ;;  %v6144_v33 = vpop.f32.mrf.mxu1  ;;  %v2911_v45 = vmul.f32 0.01, %v2879_v2  ;;  %vm2895_vm4 = vcmp.gt.f32.partialorder %v2879_v2, 0.0 }
 0x22a   : > { %v6136_v42 = vpop.f32.mrf.mxu0  ;;  %6226 = vmatprep.mubr.msk.bf16.mxu1 %vm2399_vm3, %v3486_v21  ;;  %v3497_v38 = vrot.slane %v8417_v24, 7  ;;  %v3498_v34 = vrot.slane %v8413_v31, 7  ;;  %v8475_v21 = vsel %vm2897_vm6, %v2881_v62, %v2913_v36 }
 0x22b   : > { %v2880_v19 = vadd.f32 %v8405_v22, %v2857_v0  ;;  %v2914_v4 = vmul.f32 0.01, %v2882_v7  ;;  %vm2898_vm5 = vcmp.gt.f32.partialorder %v2882_v7, 0.0  ;;  %v2862_v17 = vadd.f32 %v6136_v42, %v2648_v5  ;;  %v3078_v18 = vpop.f32.mrf.mxu1  ;;  %6227 = vmatmul.mubr.msk.bf16.gmra.mxu1 %vm2399_vm3, %v3487_v30 }
 0x22c   : > { %v2833_v25 = vpop.f32.mrf.mxu0  ;;  %v8462_v32 = vsel %vm2895_vm4, %v2879_v2, %v2911_v45  ;;  %v3500_v2 = vrot.slane %v8415_v28, 7  ;;  %v3501_v5 = vrot.slane %v8442_v40, 7  ;;  %v3526_v62 = vsel %vm1008_vm11, %v3498_v34, %v3499_v53 }
 0x22d   : > { %v2860_v63 = vadd.f32 %v2833_v25, %v2640_v54  ;;  %vm2896_vm2 = vcmp.gt.f32.partialorder %v2880_v19, 0.0  ;;  %v2912_v44 = vmul.f32 0.01, %v2880_v19  ;;  %v8464_v52 = vsel %vm2898_vm5, %v2882_v7, %v2914_v4  ;;  %v6145_v42 = vpop.f32.mrf.mxu1 }
 0x22e   : > { %v6137_v8 = vpop.f32.mrf.mxu0  ;;  %v2885_v0 = vadd.f32 %v8405_v22, %v2862_v17 }
 0x22f   : > { %v2863_v59 = vadd.f32 %v6137_v8, %v2651_v50  ;;  %v8457_v14 = vsel %vm2896_vm2, %v2880_v19, %v2912_v44  ;;  %v2883_v9 = vadd.f32 %v8405_v22, %v2860_v63  ;;  %v3502_v8 = vrot.slane %v8434_v29, 7  ;;  %v3081_v44 = vpop.f32.mrf.mxu1 }
 0x230   : > { %v2836_v48 = vpop.f32.mrf.mxu0  ;;  %v3488_v25 = vpack.c.bf16 %v8457_v14, %v8462_v32  ;;  %vm2901_vm10 = vcmp.gt.f32.partialorder %v2885_v0, 0.0 }
 0x231   : > { %v2861_v35 = vadd.f32 %v2836_v48, %v2643_v61  ;;  %v2886_v37 = vadd.f32 %v8405_v22, %v2863_v59  ;;  %v2915_v7 = vmul.f32 0.01, %v2883_v9  ;;  %vm2899_vm8 = vcmp.gt.f32.partialorder %v2883_v9, 0.0 }
 0x232   : > { %v6164_v57 = vpop.f32.mrf.mxu0  ;;  %6230 = vmatprep.mubr.msk.bf16.mxu1 %vm2399_vm3, %v3488_v25  ;;  %v2917_v61 = vmul.f32 0.01, %v2885_v0 }
 0x233   : > { %v2884_v6 = vadd.f32 %v8405_v22, %v2861_v35  ;;  %v8470_v54 = vadd.f32 %v6164_v57, %v6144_v33  ;;  %vm2902_vm7 = vcmp.gt.f32.partialorder %v2886_v37, 0.0  ;;  %v2918_v63 = vmul.f32 0.01, %v2886_v37 }
 0x234   : > { %v3211_v19 = vpop.f32.mrf.mxu0  ;;  %v3489_v22 = vpack.c.bf16 %v8464_v52, %v8475_v21  ;;  %v8492_v59 = vsel %vm2899_vm8, %v2883_v9, %v2915_v7  ;;  %v3531_v57 = vmul.f32 %v7475_v51, %v3526_v62  ;;  %v3524_v9 = vsel %vm1008_vm11, %v3500_v2, %v3501_v5 }
 0x235   : > { %vm2900_vm9 = vcmp.gt.f32.partialorder %v2884_v6, 0.0  ;;  %v2916_v50 = vmul.f32 0.01, %v2884_v6  ;;  %v8481_v45 = vadd.f32 %v3211_v19, %v3078_v18  ;;  %v8488_v4 = vsel %vm2902_vm7, %v2886_v37, %v2918_v63 }
 0x236   : > { %v6165_v33 = vpop.f32.mrf.mxu0  ;;  %6231 = vmatmul.mubr.msk.bf16.gmra.mxu1 %vm2399_vm3, %v3489_v22  ;;  %v3512_v18 = vrot.slane %v8488_v4, 7  ;;  %v8513_v25 = vsel %vm2901_vm10, %v2885_v0, %v2917_v61  ;;  %v3527_v19 = vsel %vm1008_vm11, %v3497_v38, %v3498_v34  ;;  %v3523_v7 = vsel %vm1008_vm11, %v3501_v5, %v3502_v8  ;;  %v6643_v0 = vld [vmem:[#allocation8 + $0x20] sm:$0xff]  }
 0x237   : > { %v8483_v30 = vadd.f32 %v6165_v33, %v6145_v42  ;;  %v8496_v48 = vsel %vm2900_vm9, %v2884_v6, %v2916_v50  ;;  %v3525_v42 = vsel %vm1008_vm11, %v3499_v53, %v3500_v2  ;;  %v3503_v63 = vrot.slane %v8440_v11, 7 }
 0x238   : > { %v3214_v17 = vpop.f32.mrf.mxu0  ;;  %v3490_v35 = vpack.c.bf16 %v8496_v48, %v8492_v59  ;;  %v3528_v37 = vsel %vm1008_vm11, %v3512_v18, %v3497_v38  ;;  %v3491_v22 = vpack.c.bf16 %v8488_v4, %v8513_v25  ;;  %v3533_v62 = vmul.f32 %v7513_v27, %v3524_v9 }
 0x239   : > { %v8498_v36 = vadd.f32 %v3214_v17, %v3081_v44  ;;  %v3529_v6 = vmul.f32 %v7458_v39, %v3528_v37  ;;  %v3546_v44 = vpack.c.bf16 %v3525_v42, %v3531_v57  ;;  %v3505_v53 = vrot.slane %v8462_v32, 7 }
 0x23a   : > { %6234 = vmatprep.mubr.msk.bf16.mxu1 %vm2399_vm3, %v3490_v35  ;;  %v3547_v38 = vpack.c.bf16 %v3523_v7, %v3533_v62  ;;  %v3522_v34 = vsel %vm1008_vm11, %v3502_v8, %v3503_v63  ;;  %v3504_v2 = vrot.slane %v8438_v60, 7  ;;  %v3506_v5 = vrot.slane %v8457_v14, 7 }
 0x23b   : > { %v3545_v33 = vpack.c.bf16 %v3527_v19, %v3529_v6  ;;  %v3535_v37 = vmul.f32 %v7529_v47, %v3522_v34  ;;  %v3508_v34 = vrot.slane %v8464_v52, 7 }
 0x23c   : > { %v3520_v8 = vsel %vm1008_vm11, %v3504_v2, %v3505_v53  ;;  %v3519_v19 = vsel %vm1008_vm11, %v3505_v53, %v3506_v5  ;;  %v3510_v53 = vrot.slane %v8496_v48, 7 }
 0x23d   : > { %6202 = vmatprep.mubr.msk.bf16.mxu0 %vm2399_vm3, %v3545_v33  ;;  %v3537_v33 = vmul.f32 %v7622_v12, %v3520_v8 }
 0x23e   : > { %v6168_v50 = vpop.f32.mrf.mxu0  ;;  %6235 = vmatmul.mubr.msk.bf16.gmra.mxu1 %vm2399_vm3, %v3491_v22  ;;  %6203 = vmatmul.mubr.msk.bf16.vlgmr.msra.gmra.mxu0 %vm2399_vm3, %v3546_v44  ;;  %v3521_v22 = vsel %vm1008_vm11, %v3503_v63, %v3504_v2  ;;  %v3824_v2 = vrot.slane %v8413_v31, 1 }
 0x23f   : > { %6239 = vmatpush3.bf16.msra.mxu0 %v8373_v20  ;;  %6206 = vmatprep.mubr.msk.bf16.mxu0 %vm2399_vm3, %v3547_v38  ;;  %v3507_v20 = vrot.slane %v8475_v21, 7  ;;  %v3548_v62 = vpack.c.bf16 %v3521_v22, %v3535_v37  ;;  %v3549_v44 = vpack.c.bf16 %v3519_v19, %v3537_v33  ;;  %v3825_v37 = vrot.slane %v8421_v49, 1 }
 0x240   : > { %v3227_v61 = vpop.f32.mrf.mxu0  ;;  %6240 = vmatprep.subr.bf16.mxu0 %v6643_v0  ;;  %v3823_v33 = vrot.slane %v8417_v24, 1 }
 0x241   : > { %v6148_v17 = vpop.f32.mrf.mxu1  ;;  %v3518_v38 = vsel %vm1008_vm11, %v3506_v5, %v3507_v20  ;;  %v3511_v5 = vrot.slane %v8513_v25, 7  ;;  %v3852_v31 = vsel %vm1273_vm13, %v3824_v2, %v3825_v37 }
 0x242   : > { %v8533_v35 = vadd.f32 %v6168_v50, %v6148_v17  ;;  %v6169_v6 = vpop.f32.mrf.mxu0  ;;  %v3509_v50 = vrot.slane %v8492_v59, 7  ;;  %v3539_v63 = vmul.f32 %v7637_v3, %v3518_v38  ;;  %v3517_v17 = vsel %vm1008_vm11, %v3507_v20, %v3508_v34 }
 0x243   : > { %v3094_v57 = vpop.f32.mrf.mxu1  ;;  %6241 = vmatpush3.bf16.msra.mxu0 %v6643_v0  ;;  %v3827_v20 = vrot.slane %v8442_v40, 1  ;;  %v3856_v49 = vmul.f32 %v9491_v46, %v3852_v31  ;;  %v3513_v38 = vsel %vm1008_vm11, %v3511_v5, %v3512_v18 }
 0x244   : > { %v8538_v9 = vadd.f32 %v3227_v61, %v3094_v57  ;;  %v3516_v0 = vsel %vm1008_vm11, %v3508_v34, %v3509_v50  ;;  %v3515_v61 = vsel %vm1008_vm11, %v3509_v50, %v3510_v53  ;;  %v3550_v8 = vpack.c.bf16 %v3517_v17, %v3539_v63  ;;  %v8574_v22 = vpop.f32.mrf.mxu0 }
 0x245   : > { %v6149_v42 = vpop.f32.mrf.mxu1  ;;  %v3541_v57 = vmul.f32 %v9490_v23, %v3516_v0  ;;  %v3828_v50 = vrot.slane %v8434_v29, 1  ;;  %v3829_v34 = vrot.slane %v8440_v11, 1  ;;  %v3853_v63 = vsel %vm1273_vm13, %v3823_v33, %v3824_v2 }
 0x246   : > { %v8543_v7 = vadd.f32 %v6169_v6, %v6149_v42  ;;  %6207 = vmatmul.mubr.msk.bf16.gmra.mxu0 %vm2399_vm3, %v3548_v62  ;;  %v3514_v42 = vsel %vm1008_vm11, %v3510_v53, %v3511_v5  ;;  %v3826_v62 = vrot.slane %v8415_v28, 1  ;;  %v3871_v28 = vpack.c.bf16 %v3856_v49, %v3853_v63 }
 0x247   : > { %6210 = vmatprep.mubr.msk.bf16.mxu0 %vm2399_vm3, %v3549_v44  ;;  %v3551_v6 = vpack.c.bf16 %v3515_v61, %v3541_v57  ;;  %v3543_v19 = vmul.f32 %v7753_v56, %v3514_v42  ;;  %v8585_v53 = vpop.f32.mrf.mxu1  ;;  %v3848_v18 = vsel %vm1273_vm13, %v3828_v50, %v3829_v34  ;;  %v3831_v2 = vrot.slane %v8462_v32, 1 }
 0x248   : > { %9499 = vst [vmem:[#allocation41_spill] sm:$0xff] %v8543_v7  ;;  %v3850_v29 = vsel %vm1273_vm13, %v3826_v62, %v3827_v20  ;;  %v3830_v49 = vrot.slane %v8438_v60, 1  ;;  %v3849_v32 = vsel %vm1273_vm13, %v3827_v20, %v3828_v50  ;;  %v3834_v20 = vrot.slane %v8464_v52, 1 }
 0x249   : > { %v3552_v40 = vpack.c.bf16 %v3513_v38, %v3543_v19  ;;  %v3858_v5 = vmul.f32 %v9494_v10, %v3850_v29  ;;  %v3851_v19 = vsel %vm1273_vm13, %v3825_v37, %v3826_v62  ;;  %v3835_v37 = vrot.slane %v8492_v59, 1 }
 0x24a   : > { %v3846_v29 = vsel %vm1273_vm13, %v3830_v49, %v3831_v2  ;;  %v3836_v62 = vrot.slane %v8496_v48, 1  ;;  %v3847_v50 = vsel %vm1273_vm13, %v3829_v34, %v3830_v49  ;;  %v3231_v51 = vadd.f32 %v8574_v22, %v8585_v53 }
 0x24b   : > { %v3872_v38 = vpack.c.bf16 %v3858_v5, %v3851_v19  ;;  %v3862_v60 = vmul.f32 %v9496_v15, %v3846_v29  ;;  %v3842_v59 = vsel %vm1273_vm13, %v3834_v20, %v3835_v37 }
 0x24c   : > { %v3866_v34 = vmul.f32 %v7711_v58, %v3842_v59 }
 0x24e   : > { %6211 = vmatmul.mubr.msk.bf16.gmra.mxu0 %vm2399_vm3, %v3550_v8  ;;  %v3860_v8 = vmul.f32 %v9495_v16, %v3848_v18 }
 0x24f   : > { %6214 = vmatprep.mubr.msk.bf16.mxu0 %vm2399_vm3, %v3551_v6  ;;  %v3832_v6 = vrot.slane %v8457_v14, 1 }
 0x250   : > { %v3873_v63 = vpack.c.bf16 %v3860_v8, %v3849_v32  ;;  %v3838_v8 = vrot.slane %v8488_v4, 1  ;;  %v3841_v32 = vsel %vm1273_vm13, %v3835_v37, %v3836_v62  ;;  %v6644_v37 = vld [vmem:[#allocation10 + $0x38] sm:$0xff]  }
 0x251   : > { %v3845_v18 = vsel %vm1273_vm13, %v3831_v2, %v3832_v6  ;;  %6282 = vmatprep.subr.bf16.mxu0 %v6644_v37 }
 0x252   : > { %v3854_v4 = vsel %vm1273_vm13, %v3838_v8, %v3823_v33 }
 0x253   : > { %v3870_v29 = vmul.f32 %v9498_v13, %v3854_v4 }
 0x256   : > { %v6172_v44 = vpop.f32.mrf.mxu0  ;;  %6215 = vmatmul.mubr.msk.bf16.gmra.mxu0 %vm2399_vm3, %v3552_v40  ;;  %v3833_v40 = vrot.slane %v8475_v21, 1 }
 0x257   : > { %6242 = vmatprep.mubr.msk.bf16.mxu0 %vm2399_vm3, %v3871_v28  ;;  %v3837_v28 = vrot.slane %v8513_v25, 1 }
 0x258   : > { %v3243_v0 = vpop.f32.mrf.mxu0  ;;  %v3844_v14 = vsel %vm1273_vm13, %v3832_v6, %v3833_v40  ;;  %v3843_v49 = vsel %vm1273_vm13, %v3833_v40, %v3834_v20  ;;  %v6646_v20 = vld [vmem:[#allocation10 + $0x28] sm:$0xff]  }
 0x259   : > { %v6152_v61 = vpop.f32.mrf.mxu1  ;;  %v3864_v21 = vmul.f32 %v9497_v26, %v3844_v14  ;;  %v3840_v48 = vsel %vm1273_vm13, %v3836_v62, %v3837_v28  ;;  %v3839_v14 = vsel %vm1273_vm13, %v3837_v28, %v3838_v8  ;;  %v6648_v28 = vld [vmem:[#allocation10 + $0x20] sm:$0xff]  }
 0x25a   : > { %v8597_v11 = vadd.f32 %v6172_v44, %v6152_v61  ;;  %v6173_v42 = vpop.f32.mrf.mxu0  ;;  %v3874_v61 = vpack.c.bf16 %v3862_v60, %v3847_v50  ;;  %v3868_v6 = vmul.f32 %v7851_v55, %v3840_v48  ;;  %v3878_v40 = vpack.c.bf16 %v3870_v29, %v3839_v14  ;;  %v6647_v50 = vld [vmem:[#allocation10 + $0x18] sm:$0xff]   ;;  %v6650_v48 = vld [vmem:[#allocation10 + $0x8] sm:$0xff]  }
 0x25b   : > { %v3110_v17 = vpop.f32.mrf.mxu1  ;;  %v3875_v5 = vpack.c.bf16 %v3864_v21, %v3845_v18  ;;  %v6645_v21 = vld [vmem:[#allocation10 + $0x30] sm:$0xff]   ;;  %6258 = vmatprep.subr.bf16.mxu1 %v6647_v50 }
 0x25c   : > { %9500 = vst [vmem:[#allocation42_spill] sm:$0xff] %v8597_v11  ;;  %v8601_v57 = vadd.f32 %v3243_v0, %v3110_v17  ;;  %v8627_v0 = vpop.f32.mrf.mxu0  ;;  %6259 = vmatpush3.bf16.msra.mxu1 %v6647_v50 }
 0x25d   : > { %v6153_v31 = vpop.f32.mrf.mxu1 }
 0x25e   : > { %9501 = vst [vmem:[#allocation43_spill] sm:$0xff] %v8601_v57  ;;  %v8608_v44 = vadd.f32 %v6173_v42, %v6153_v31  ;;  %6243 = vmatmul.mubr.msk.bf16.vlgmr.msra.gmra.mxu0 %vm2399_vm3, %v3872_v38  ;;  %v3876_v38 = vpack.c.bf16 %v3866_v34, %v3843_v49  ;;  %v6651_v34 = vld [vmem:[#allocation10] sm:$0xff]  }
 0x25f   : > { %6246 = vmatprep.mubr.msk.bf16.mxu0 %vm2399_vm3, %v3873_v63  ;;  %v8633_v17 = vpop.f32.mrf.mxu1  ;;  %v3877_v63 = vpack.c.bf16 %v3868_v6, %v3841_v32  ;;  %6283 = vmatpush3.bf16.msra.mxu0 %v6644_v37  ;;  %v8672_v6 = vld [vmem:[#allocation10 + $0x58] sm:$0xff]  }
 0x260   : > { %9502 = vst [vmem:[#allocation44_spill] sm:$0xff] %v8608_v44  ;;  %6284 = vmatprep.subr.bf16.mxu0 %v6645_v21  ;;  %9505 = vst [vmem:[#allocation47_spill] sm:$0xff] %v8672_v6  ;;  %v3247_v41 = vadd.f32 %v8627_v0, %v8633_v17 }
 0x263   : > { %6285 = vmatpush3.bf16.msra.mxu0 %v6645_v21 }
 0x264   : > { %6286 = vmatprep.subr.bf16.mxu0 %v6646_v20 }
 0x266   : > { %6247 = vmatmul.mubr.msk.bf16.gmra.mxu0 %vm2399_vm3, %v3874_v61 }
 0x267   : > { %v6176_v52 = vpop.f32.mrf.mxu0  ;;  %6250 = vmatprep.mubr.msk.bf16.mxu0 %vm2399_vm3, %v3875_v5  ;;  %6287 = vmatpush3.bf16.msra.mxu0 %v6646_v20  ;;  %v6649_v5 = vld [vmem:[#allocation10 + $0x10] sm:$0xff]  }
 0x268   : > { %6288 = vmatprep.subr.bf16.mxu0 %v6648_v28  ;;  %6260 = vmatprep.subr.bf16.mxu1 %v6649_v5 }
 0x269   : > { %v3259_v42 = vpop.f32.mrf.mxu0  ;;  %6261 = vmatpush3.bf16.msra.mxu1 %v6649_v5 }
 0x26a   : > { %6262 = vmatprep.subr.bf16.mxu1 %v6650_v48 }
 0x26b   : > { %v6156_v25 = vpop.f32.mrf.mxu1  ;;  %6289 = vmatpush3.bf16.msra.mxu0 %v6648_v28  ;;  %v6177_v37 = vpop.f32.mrf.mxu0 }
 0x26c   : > { %v8641_v2 = vadd.f32 %v6176_v52, %v6156_v25 }
 0x26d   : > { %v3126_v31 = vpop.f32.mrf.mxu1  ;;  %6263 = vmatpush3.bf16.msra.mxu1 %v6650_v48  ;;  %v3262_v20 = vpop.f32.mrf.mxu0 }
 0x26e   : > { %9503 = vst [vmem:[#allocation45_spill] sm:$0xff] %v8641_v2  ;;  %v8644_v19 = vadd.f32 %v3259_v42, %v3126_v31  ;;  %6251 = vmatmul.mubr.msk.bf16.gmra.mxu0 %vm2399_vm3, %v3876_v38  ;;  %6264 = vmatprep.subr.bf16.mxu1 %v6651_v34 }
 0x26f   : > { %6254 = vmatprep.mubr.msk.bf16.mxu0 %vm2399_vm3, %v3877_v63  ;;  %v8660_v60 = vpop.f32.mrf.mxu1 }
 0x270   : > { %9504 = vst [vmem:[#allocation46_spill] sm:$0xff] %v8644_v19  ;;  %v3271_v19 = vadd.f32 %v6177_v37, %v8660_v60 }
 0x271   : > { %v8662_v24 = vpop.f32.mrf.mxu1  ;;  %6265 = vmatpush3.bf16.msra.mxu1 %v6651_v34 }
 0x272   : > { %6306 = vmatprep.subr.bf16.mxu1 %v8672_v6  ;;  %v3263_v57 = vadd.f32 %v3262_v20, %v8662_v24  ;;  %v9507_v24 = vld [vmem:[#allocation41_spill] sm:$0xff] }
 0x273   : > { %v8664_v33 = vpop.f32.mrf.mxu1 }
 0x274   : > { %v3470_v11 = vadd.f32 %v8664_v33, %v8470_v54 }
 0x275   : > { %v8666_v62 = vpop.f32.mrf.mxu1 }
 0x276   : > { %6255 = vmatmul.mubr.msk.bf16.gmra.mxu0 %vm2399_vm3, %v3878_v40  ;;  %v3468_v7 = vadd.f32 %v8666_v62, %v8481_v45  ;;  %v9508_v62 = vld [vmem:[#allocation42_spill] sm:$0xff] }
 0x277   : > { %v8668_v61 = vpop.f32.mrf.mxu1 }
 0x278   : > { %v3471_v22 = vadd.f32 %v8668_v61, %v8483_v30  ;;  %v9509_v30 = vld [vmem:[#allocation43_spill] sm:$0xff] }
 0x279   : > { %v8670_v18 = vpop.f32.mrf.mxu1 }
 0x27a   : > { %v3469_v53 = vadd.f32 %v8670_v18, %v8498_v36  ;;  %v9510_v36 = vld [vmem:[#allocation44_spill] sm:$0xff] }
 0x27b   : > { %v6188_v59 = vpop.f32.mrf.mxu1 }
 0x27c   : > { %v3474_v0 = vadd.f32 %v6188_v59, %v8533_v35  ;;  %v8716_v59 = vld [vmem:[%s9359_s9] ss:$0 sm:$0xff] }
 0x27d   : > { %v3421_v52 = vpop.f32.mrf.mxu1 }
 0x27e   : > { %v8695_v17 = vadd.f32 %v3421_v52, %v8538_v9  ;;  %v9511_v52 = vld [vmem:[#allocation45_spill] sm:$0xff] }
 0x27f   : > { %v6189_v25 = vpop.f32.mrf.mxu1 }
 0x280   : > { %v8698_v37 = vadd.f32 %v6189_v25, %v9507_v24 }
 0x281   : > { %v3424_v8 = vpop.f32.mrf.mxu1 }
 0x282   : > { %v8700_v54 = vadd.f32 %v3424_v8, %v3231_v51 }
 0x283   : > { %v6192_v42 = vpop.f32.mrf.mxu1 }
 0x285   : > { %v3437_v31 = vpop.f32.mrf.mxu1 }
 0x286   : > { %v8706_v61 = vadd.f32 %v3437_v31, %v9509_v30  ;;  %v9512_v31 = vld [vmem:[#allocation46_spill] sm:$0xff] }
 0x287   : > { %v6193_v49 = vpop.f32.mrf.mxu1 }
 0x288   : > { %v8709_v18 = vadd.f32 %v6193_v49, %v9510_v36 }
 0x289   : > { %v3440_v38 = vpop.f32.mrf.mxu1 }
 0x28a   : > { %v8711_v35 = vadd.f32 %v3440_v38, %v3247_v41 }
 0x28b   : > { %v6196_v32 = vpop.f32.mrf.mxu1 }
 0x28d   : > { %v3453_v63 = vpop.f32.mrf.mxu1 }
 0x28f   : > { %v6197_v4 = vpop.f32.mrf.mxu1 }
 0x290   : > { %v8724_v49 = vadd.f32 %v6197_v4, %v3271_v19 }
 0x291   : > { %v3456_v29 = vpop.f32.mrf.mxu1 }
 0x292   : > { %v8726_v41 = vadd.f32 %v3456_v29, %v3263_v57 }
 0x2e3   : > { %v6224_v14 = vpop.f32.mrf.mxu1 }
 0x2e5   : > { %v3760_v40 = vpop.f32.mrf.mxu1 }
 0x2e7   : > { %v6225_v21 = vpop.f32.mrf.mxu1 }
 0x2e9   : > { %v3763_v50 = vpop.f32.mrf.mxu1 }
 0x2eb   : > { %v6228_v5 = vpop.f32.mrf.mxu1 }
 0x2ed   : > { %v3776_v1 = vpop.f32.mrf.mxu1 }
 0x2ef   : > { %v6229_v55 = vpop.f32.mrf.mxu1 }
 0x2f1   : > { %v3779_v15 = vpop.f32.mrf.mxu1 }
 0x2f6   : > { %v6232_v46 = vpop.f32.mrf.mxu1 }
 0x2f8   : > { %v3792_v3 = vpop.f32.mrf.mxu1 }
 0x2fa   : > { %v6233_v47 = vpop.f32.mrf.mxu1 }
 0x2fc   : > { %v3795_v2 = vpop.f32.mrf.mxu1 }
 0x2fe   : > { %v6204_v28 = vpop.f32.mrf.mxu0  ;;  %v6236_v9 = vpop.f32.mrf.mxu1 }
 0x300   : > { %v3627_v48 = vpop.f32.mrf.mxu0 }
 0x301   : > { %v3761_v33 = vadd.f32 %v3760_v40, %v3627_v48  ;;  %v8722_v40 = vadd.f32 %v3453_v63, %v9512_v31 }
 0x302   : > { %v6205_v34 = vpop.f32.mrf.mxu0 }
 0x303   : > { %v3772_v25 = vadd.f32 %v6225_v21, %v6205_v34 }
 0x304   : > { %v3630_v43 = vpop.f32.mrf.mxu0 }
 0x305   : > { %v3764_v38 = vadd.f32 %v3763_v50, %v3630_v43 }
 0x306   : > { %v6208_v13 = vpop.f32.mrf.mxu0 }
 0x308   : > { %v3643_v58 = vpop.f32.mrf.mxu0 }
 0x30a   : > { %v6209_v26 = vpop.f32.mrf.mxu0 }
 0x30b   : > { %v3788_v30 = vadd.f32 %v6229_v55, %v6209_v26 }
 0x30c   : > { %v3646_v6 = vpop.f32.mrf.mxu0 }
 0x30d   : > { %v3780_v21 = vadd.f32 %v3779_v15, %v3646_v6 }
 0x30e   : > { %v6212_v16 = vpop.f32.mrf.mxu0 }
 0x310   : > { %v3659_v56 = vpop.f32.mrf.mxu0 }
 0x311   : > { %v3793_v57 = vadd.f32 %v3792_v3, %v3659_v56 }
 0x312   : > { %v6213_v23 = vpop.f32.mrf.mxu0 }
 0x313   : > { %v8730_v29 = vadd.f32 %v6233_v47, %v6213_v23 }
 0x314   : > { %v3662_v39 = vpop.f32.mrf.mxu0 }
 0x315   : > { %v8732_v43 = vadd.f32 %v3795_v2, %v3662_v39 }
 0x316   : > { %v6216_v12 = vpop.f32.mrf.mxu0 }
 0x318   : > { %v3675_v27 = vpop.f32.mrf.mxu0 }
 0x31a   : > { %v8675_v10 = vpop.f32.mrf.mxu0 }
 0x31b   : > { %9506 = vst [vmem:[#allocation48_spill] sm:$0xff] %v8675_v10  ;;  %v3769_v10 = vadd.f32 %v6224_v14, %v6204_v28  ;;  %v8703_v14 = vadd.f32 %v6192_v42, %v9508_v62  ;;  %v3785_v28 = vadd.f32 %v6228_v5, %v6208_v13  ;;  %v3808_v62 = vpop.f32.mrf.mxu1 }
 0x31c   : > { %v8682_v44 = vpop.f32.mrf.mxu0 }
 0x31d   : > { %v6237_v55 = vpop.f32.mrf.mxu1 }
 0x31e   : > { %v6244_v60 = vpop.f32.mrf.mxu0 }
 0x31f   : > { %v4019_v45 = vadd.f32 %v6244_v60, %v3769_v10  ;;  %v8719_v10 = vadd.f32 %v6196_v32, %v9511_v52  ;;  %v3777_v32 = vadd.f32 %v3776_v1, %v3643_v58 }
 0x320   : > { %v3954_v51 = vpop.f32.mrf.mxu0 }
 0x321   : > { %v4035_v8 = vadd.f32 %v4019_v45, %v3470_v11  ;;  %v4017_v42 = vadd.f32 %v3954_v51, %v3761_v33  ;;  %v3801_v11 = vadd.f32 %v6232_v46, %v6212_v16  ;;  %v8739_v46 = vadd.f32 %v3808_v62, %v3675_v27 }
 0x322   : > { %v6245_v20 = vpop.f32.mrf.mxu0  ;;  %v9513_v47 = vld [vmem:[#allocation48_spill] sm:$0xff] }
 0x323   : > { %v4058_v48 = vadd.f32 %v8716_v59, %v4035_v8  ;;  %v4033_v60 = vadd.f32 %v4017_v42, %v3468_v7  ;;  %v4020_v24 = vadd.f32 %v6245_v20, %v3772_v25  ;;  %v8734_v7 = vadd.f32 %v6236_v9, %v6216_v12  ;;  %v3811_v25 = vpop.f32.mrf.mxu1 }
 0x324   : > { %v3957_v34 = vpop.f32.mrf.mxu0  ;;  %v8742_v56 = vadd.f32 %v6237_v55, %v9513_v47 }
 0x325   : > { %vm4074_vm3 = vcmp.gt.f32.partialorder %v4058_v48, 0.0  ;;  %v4090_v63 = vmul.f32 0.01, %v4058_v48  ;;  %v4056_v19 = vadd.f32 %v8716_v59, %v4033_v60  ;;  %v4036_v4 = vadd.f32 %v4020_v24, %v3471_v22 }
 0x326   : > { %v4018_v13 = vadd.f32 %v3957_v34, %v3764_v38  ;;  %v6248_v50 = vpop.f32.mrf.mxu0  ;;  %v6658_v38 = vld [vmem:[%s9362_s12 + $0x74] ss:$8 sps:$4 sm:$0xff]  }
 0x327   : > { %v8736_v5 = vsel %vm4074_vm3, %v4058_v48, %v4090_v63  ;;  %v4088_v1 = vmul.f32 0.01, %v4056_v19  ;;  %v4059_v58 = vadd.f32 %v8716_v59, %v4036_v4  ;;  %vm4072_vm12 = vcmp.gt.f32.partialorder %v4056_v19, 0.0  ;;  %5001 = vmatprep.subr.bf16.mxu0 %v6658_v38 }
 0x328   : > { %v4034_v16 = vadd.f32 %v4018_v13, %v3469_v53  ;;  %v4023_v15 = vadd.f32 %v6248_v50, %v3785_v28  ;;  %v3970_v3 = vpop.f32.mrf.mxu0  ;;  %v4139_v12 = vrot.slane %v8736_v5, 7  ;;  %v4494_v26 = vrot.slane %v8736_v5, 1 }
 0x329   : > { %vm4075_vm14 = vcmp.gt.f32.partialorder %v4059_v58, 0.0  ;;  %v4091_v39 = vmul.f32 0.01, %v4059_v58  ;;  %v4021_v23 = vadd.f32 %v3970_v3, %v3777_v32  ;;  %v8747_v27 = vsel %vm4072_vm12, %v4056_v19, %v4088_v1 }
 0x32a   : > { %v4057_v2 = vadd.f32 %v8716_v59, %v4034_v16  ;;  %v4039_v6 = vadd.f32 %v4023_v15, %v3474_v0  ;;  %v6249_v22 = vpop.f32.mrf.mxu0  ;;  %v4492_v13 = vrot.slane %v8747_v27, 1 }
 0x32b   : > { %v8749_v33 = vsel %vm4075_vm14, %v4059_v58, %v4091_v39  ;;  %v4037_v53 = vadd.f32 %v4021_v23, %v8695_v17  ;;  %v4024_v45 = vadd.f32 %v6249_v22, %v3788_v30  ;;  %v8760_v17 = vadd.f32 %v3811_v25, %v8682_v44  ;;  %v9515_v22 = vld [vmem:[#allocation24_spill] sm:$0xff] }
 0x32c   : > { %v4121_v36 = vpack.c.bf16 %v8749_v33, %v8736_v5  ;;  %v4140_v9 = vrot.slane %v8749_v33, 7  ;;  %v4495_v51 = vrot.slane %v8749_v33, 1  ;;  %vm4073_vm15 = vcmp.gt.f32.partialorder %v4057_v2, 0.0  ;;  %v3973_v52 = vpop.f32.mrf.mxu0  ;;  %v9516_v25 = vld [vmem:[#allocation28_spill] sm:$0xff]  ;;  %v9517_v33 = vld [vmem:[#allocation27_spill] sm:$0xff] }
 0x32d   : > { %v4089_v0 = vmul.f32 0.01, %v4057_v2  ;;  %v4062_v8 = vadd.f32 %v8716_v59, %v4039_v6  ;;  %v4060_v42 = vadd.f32 %v8716_v59, %v4037_v53  ;;  %v4040_v31 = vadd.f32 %v4024_v45, %v8698_v37 }
 0x32e   : > { %v8766_v20 = vsel %vm1008_vm11, %v4139_v12, %v4140_v9  ;;  %v8772_v28 = vsel %vm1273_vm13, %v4494_v26, %v4495_v51  ;;  %v4022_v48 = vadd.f32 %v3973_v52, %v3780_v21  ;;  %v6252_v60 = vpop.f32.mrf.mxu0  ;;  %v4137_v44 = vrot.slane %v8747_v27, 7 }
 0x32f   : > { %v8774_v24 = vsel %vm4073_vm15, %v4057_v2, %v4089_v0  ;;  %vm4078_vm1 = vcmp.gt.f32.partialorder %v4062_v8, 0.0  ;;  %v4094_v37 = vmul.f32 0.01, %v4062_v8  ;;  %vm4076_vm2 = vcmp.gt.f32.partialorder %v4060_v42, 0.0 }
 0x330   : > { %v4138_v62 = vrot.slane %v8774_v24, 7  ;;  %v4092_v32 = vmul.f32 0.01, %v4060_v42  ;;  %v4063_v30 = vadd.f32 %v8716_v59, %v4040_v31  ;;  %v3986_v34 = vpop.f32.mrf.mxu0  ;;  %v4038_v19 = vadd.f32 %v4022_v48, %v8700_v54 }
 0x331   : > { %v8779_v63 = vsel %vm4078_vm1, %v4062_v8, %v4094_v37  ;;  %v4027_v4 = vadd.f32 %v6252_v60, %v3801_v11  ;;  %v4025_v21 = vadd.f32 %v3986_v34, %v3793_v57  ;;  %v4493_v1 = vrot.slane %v8774_v24, 1 }
 0x332   : > { %v4166_v50 = vsel %vm1008_vm11, %v4138_v62, %v4139_v12  ;;  %v8788_v58 = vsel %vm4076_vm2, %v4060_v42, %v4092_v32  ;;  %v6253_v55 = vpop.f32.mrf.mxu0  ;;  %v4143_v16 = vrot.slane %v8779_v63, 7  ;;  %v4498_v15 = vrot.slane %v8779_v63, 1 }
 0x333   : > { %v4496_v54 = vrot.slane %v8788_v58, 1  ;;  %vm4079_vm4 = vcmp.gt.f32.partialorder %v4063_v30, 0.0  ;;  %v4095_v11 = vmul.f32 0.01, %v4063_v30  ;;  %v4061_v57 = vadd.f32 %v8716_v59, %v4038_v19 }
 0x334   : > { %v4043_v3 = vadd.f32 %v4027_v4, %v8703_v14  ;;  %v4041_v47 = vadd.f32 %v4025_v21, %v8706_v61  ;;  %v3989_v39 = vpop.f32.mrf.mxu0  ;;  %v4120_v12 = vpack.c.bf16 %v8774_v24, %v8747_v27  ;;  %v4028_v2 = vadd.f32 %v6253_v55, %v8730_v29  ;;  %v6656_v27 = vld [vmem:[%s9362_s12 + $0x70] ss:$8 sps:$4 sm:$0xff]  }
 0x335   : > { %v4519_v23 = vsel %vm1273_vm13, %v4495_v51, %v4496_v54  ;;  %v4026_v6 = vadd.f32 %v3989_v39, %v8732_v43  ;;  %v8805_v53 = vmul.f32 %v9515_v22, %v4166_v50  ;;  %v8807_v45 = vsel %vm4079_vm4, %v4063_v30, %v4095_v11 }
 0x336   : > { %vm4077_vm5 = vcmp.gt.f32.partialorder %v4061_v57, 0.0  ;;  %v4093_v14 = vmul.f32 0.01, %v4061_v57  ;;  %v6256_v61 = vpop.f32.mrf.mxu0  ;;  %v4141_v52 = vrot.slane %v8788_v58, 7  ;;  %v8811_v0 = vmul.f32 %v9516_v25, %v4519_v23  ;;  %6290 = vmatprep.mubr.msk.bf16.mxu0 %vm4225_vm0, %v4120_v12 }
 0x337   : > { %v4066_v51 = vadd.f32 %v8716_v59, %v4043_v3  ;;  %v4064_v8 = vadd.f32 %v8716_v59, %v4041_v47  ;;  %6291 = vmatmul.mubr.msk.bf16.vlgmr.msra.gmra.mxu0 %vm4225_vm0, %v4121_v36  ;;  %v4044_v43 = vadd.f32 %v4028_v2, %v8709_v18  ;;  %v4042_v42 = vadd.f32 %v4026_v6, %v8711_v35 }
 0x338   : > { %v8816_v29 = vsel %vm4077_vm5, %v4061_v57, %v4093_v14  ;;  %v4031_v31 = vadd.f32 %v6256_v61, %v8734_v7  ;;  %v4002_v48 = vpop.f32.mrf.mxu0  ;;  %v4144_v60 = vrot.slane %v8807_v45, 7  ;;  %v4499_v37 = vrot.slane %v8807_v45, 1  ;;  %5002 = vmatpush1.bf16.msra.mxu0 %v6656_v27 }
 0x339   : > { %vm4082_vm6 = vcmp.gt.f32.partialorder %v4066_v51, 0.0  ;;  %v4098_v32 = vmul.f32 0.01, %v4066_v51  ;;  %vm4080_vm7 = vcmp.gt.f32.partialorder %v4064_v8, 0.0  ;;  %v4096_v30 = vmul.f32 0.01, %v4064_v8 }
 0x33a   : > { %v4067_v34 = vadd.f32 %v8716_v59, %v4044_v43  ;;  %v4065_v19 = vadd.f32 %v8716_v59, %v4042_v42  ;;  %v6257_v36 = vpop.f32.mrf.mxu0  ;;  %v4047_v18 = vadd.f32 %v4031_v31, %v8719_v10  ;;  %v4029_v35 = vadd.f32 %v4002_v48, %v8739_v46 }
 0x33b   : > { %v8826_v4 = vsel %vm4082_vm6, %v4066_v51, %v4098_v32  ;;  %v4122_v7 = vpack.c.bf16 %v8816_v29, %v8788_v58  ;;  %v4142_v21 = vrot.slane %v8816_v29, 7  ;;  %v4497_v50 = vrot.slane %v8816_v29, 1 }
 0x33c   : > { %v4147_v55 = vrot.slane %v8826_v4, 7  ;;  %vm4083_vm8 = vcmp.gt.f32.partialorder %v4067_v34, 0.0  ;;  %v4005_v11 = vpop.f32.mrf.mxu0  ;;  %v4502_v57 = vrot.slane %v8826_v4, 1  ;;  %v8836_v3 = vsel %vm4080_vm7, %v4064_v8, %v4096_v30 }
 0x33d   : > { %v4099_v47 = vmul.f32 0.01, %v4067_v34  ;;  %vm4081_vm9 = vcmp.gt.f32.partialorder %v4065_v19, 0.0  ;;  %6294 = vmatprep.mubr.msk.bf16.mxu0 %vm4225_vm0, %v4122_v7  ;;  %v4097_v10 = vmul.f32 0.01, %v4065_v19  ;;  %v4070_v46 = vadd.f32 %v8716_v59, %v4047_v18 }
 0x33e   : > { %v4045_v39 = vadd.f32 %v4029_v35, %v8722_v40  ;;  %v4123_v23 = vpack.c.bf16 %v8807_v45, %v8779_v63  ;;  %v4032_v2 = vadd.f32 %v6257_v36, %v8742_v56  ;;  %v4030_v6 = vadd.f32 %v4005_v11, %v8760_v17 }
 0x33f   : > { %v8843_v12 = vsel %vm4083_vm8, %v4067_v34, %v4099_v47  ;;  %v8853_v22 = vsel %vm1008_vm11, %v4137_v44, %v4138_v62  ;;  %v4145_v14 = vrot.slane %v8836_v3, 7  ;;  %v4500_v40 = vrot.slane %v8836_v3, 1  ;;  %v9518_v47 = vld [vmem:[#allocation29_spill] sm:$0xff] }
 0x340   : > { %v8857_v61 = vsel %vm4081_vm9, %v4065_v19, %v4097_v10  ;;  %vm4086_vm10 = vcmp.gt.f32.partialorder %v4070_v46, 0.0  ;;  %6295 = vmatmul.mubr.msk.bf16.gmra.mxu0 %vm4225_vm0, %v4123_v23  ;;  %v4148_v56 = vrot.slane %v8843_v12, 7  ;;  %v4503_v17 = vrot.slane %v8843_v12, 1 }
 0x341   : > { %v4102_v25 = vmul.f32 0.01, %v4070_v46  ;;  %v4068_v51 = vadd.f32 %v8716_v59, %v4045_v39  ;;  %v4048_v8 = vadd.f32 %v4032_v2, %v8724_v49  ;;  %v4046_v62 = vadd.f32 %v4030_v6, %v8726_v41 }
 0x342   : > { %v4124_v43 = vpack.c.bf16 %v8857_v61, %v8836_v3  ;;  %v4125_v42 = vpack.c.bf16 %v8843_v12, %v8826_v4  ;;  %v4186_v32 = vpack.c.bf16 %v8766_v20, %v8805_v53  ;;  %v4146_v30 = vrot.slane %v8857_v61, 7 }
 0x343   : > { %v8869_v31 = vsel %vm4086_vm10, %v4070_v46, %v4102_v25  ;;  %vm4084_vm3 = vcmp.gt.f32.partialorder %v4068_v51, 0.0  ;;  %v4100_v48 = vmul.f32 0.01, %v4068_v51  ;;  %v4501_v34 = vrot.slane %v8857_v61, 1 }
 0x344   : > { %v4071_v49 = vadd.f32 %v8716_v59, %v4048_v8  ;;  %v4069_v41 = vadd.f32 %v8716_v59, %v4046_v62  ;;  %6298 = vmatprep.mubr.msk.bf16.mxu0 %vm4225_vm0, %v4124_v43  ;;  %v4163_v36 = vsel %vm1008_vm11, %v4141_v52, %v4142_v21  ;;  %v4164_v20 = vsel %vm1008_vm11, %v4140_v9, %v4141_v52 }
 0x345   : > { %v8878_v19 = vsel %vm4084_vm3, %v4068_v51, %v4100_v48  ;;  %v8896_v59 = vsel %vm1008_vm11, %v4143_v16, %v4144_v60  ;;  %v4151_v53 = vrot.slane %v8869_v31, 7  ;;  %v4173_v11 = vmul.f32 %v9517_v33, %v4164_v20  ;;  %v9520_v48 = vld [vmem:[#allocation23_spill] sm:$0xff] }
 0x346   : > { %v4149_v18 = vrot.slane %v8878_v19, 7  ;;  %vm4087_vm12 = vcmp.gt.f32.partialorder %v4071_v49, 0.0  ;;  %v4103_v35 = vmul.f32 0.01, %v4071_v49  ;;  %vm4085_vm14 = vcmp.gt.f32.partialorder %v4069_v41, 0.0  ;;  %v9521_v20 = vld [vmem:[#allocation35_spill] sm:$0xff] }
 0x347   : > { %v4101_v7 = vmul.f32 0.01, %v4069_v41  ;;  %v4162_v9 = vsel %vm1008_vm11, %v4142_v21, %v4143_v16  ;;  %v8913_v46 = vsel %vm1008_vm11, %v4145_v14, %v4146_v30  ;;  %v4160_v39 = vsel %vm1008_vm11, %v4144_v60, %v4145_v14  ;;  %v9519_v14 = vld [vmem:[#allocation33_spill] sm:$0xff] }
 0x348   : > { %v8905_v52 = vsel %vm4087_vm12, %v4071_v49, %v4103_v35  ;;  %6299 = vmatmul.mubr.msk.bf16.gmra.mxu0 %vm4225_vm0, %v4125_v42  ;;  %v8909_v10 = vmul.f32 %v9518_v47, %v4162_v9  ;;  %v4504_v23 = vrot.slane %v8878_v19, 1  ;;  %v4187_v8 = vpack.c.bf16 %v4163_v36, %v4173_v11  ;;  %v9522_v35 = vld [vmem:[#allocation37_spill] sm:$0xff]  ;;  %v9524_v47 = vld [vmem:[#allocation26_spill] sm:$0xff] }
 0x349   : > { %v4152_v16 = vrot.slane %v8905_v52, 7  ;;  %v4117_v21 = vsel %vm4085_vm14, %v4069_v41, %v4101_v7  ;;  %v4127_v2 = vpack.c.bf16 %v8905_v52, %v8869_v31  ;;  %v4507_v6 = vrot.slane %v8905_v52, 1  ;;  %v9523_v52 = vld [vmem:[#allocation39_spill] sm:$0xff] }
 0x34a   : > { %v4150_v25 = vrot.slane %v4117_v21, 7  ;;  %v4126_v51 = vpack.c.bf16 %v4117_v21, %v8878_v19  ;;  %v4188_v60 = vpack.c.bf16 %v8896_v59, %v8909_v10  ;;  %v4177_v43 = vmul.f32 %v9519_v14, %v4160_v39  ;;  %v9531_v14 = vld [vmem:[#allocation40_spill] sm:$0xff] }
 0x34b   : > { %v4168_v62 = vsel %vm1008_vm11, %v4152_v16, %v4137_v44  ;;  %v8936_v42 = vsel %vm1008_vm11, %v4147_v55, %v4148_v56  ;;  %v4158_v44 = vsel %vm1008_vm11, %v4146_v30, %v4147_v55  ;;  %v4156_v19 = vsel %vm1008_vm11, %v4148_v56, %v4149_v18 }
 0x34c   : > { %6302 = vmatprep.mubr.msk.bf16.mxu0 %vm4225_vm0, %v4126_v51  ;;  %v4169_v49 = vmul.f32 %v9520_v48, %v4168_v62  ;;  %v4155_v41 = vsel %vm1008_vm11, %v4149_v18, %v4150_v25  ;;  %v4189_v36 = vpack.c.bf16 %v8913_v46, %v4177_v43  ;;  %v4179_v59 = vmul.f32 %v9521_v20, %v4158_v44  ;;  %v6653_v18 = vld [vmem:[#allocation10 + $0x50] sm:$0xff]   ;;  %v9532_v48 = vld [vmem:[#allocation25_spill] sm:$0xff]  ;;  %v6662_v44 = vld [vmem:[%s9362_s12 + $0x50] ss:$8 sps:$4 sm:$0xff]  }
 0x34d   : > { %v4181_v7 = vmul.f32 %v9522_v35, %v4156_v19  ;;  %v4153_v33 = vsel %vm1008_vm11, %v4151_v53, %v4152_v16  ;;  %v4154_v55 = vsel %vm1008_vm11, %v4150_v25, %v4151_v53  ;;  %v4521_v56 = vsel %vm1273_vm13, %v4493_v1, %v4494_v26  ;;  %v9525_v16 = vld [vmem:[#allocation32_spill] sm:$0xff]  ;;  %v9529_v51 = vld [vmem:[#allocation38_spill] sm:$0xff] }
 0x34e   : > { %v4185_v11 = vpack.c.bf16 %v8853_v22, %v4169_v49  ;;  %v4522_v30 = vsel %vm1273_vm13, %v4492_v13, %v4493_v1  ;;  %v4190_v22 = vpack.c.bf16 %v8936_v42, %v4179_v59  ;;  %v4183_v53 = vmul.f32 %v9523_v52, %v4154_v55  ;;  %v6682_v19 = vld [vmem:[%s9364_s14 + $0x74] ss:$8 sps:$4 sm:$0xff]   ;;  %v6685_v20 = vld [vmem:[%s9364_s14 + $0x64] ss:$8 sps:$4 sm:$0xff]   ;;  %v6683_v59 = vld [vmem:[%s9364_s14 + $0x60] ss:$8 sps:$4 sm:$0xff]  }
 0x34f   : > { %v4191_v9 = vpack.c.bf16 %v4155_v41, %v4181_v7  ;;  %v4525_v5 = vmul.f32 %v9524_v47, %v4521_v56  ;;  %v4505_v10 = vrot.slane %v4117_v21, 1  ;;  %v4541_v26 = vpack.c.bf16 %v8811_v0, %v8772_v28  ;;  %v9526_v21 = vld [vmem:[#allocation47_spill] sm:$0xff]  ;;  %v6665_v35 = vld [vmem:[%s9362_s12 + $0x40] ss:$8 sps:$4 sm:$0xff]   ;;  %v6691_v56 = vld [vmem:[%s9364_s14 + $0x44] ss:$8 sps:$4 sm:$0xff]  }
 0x350   : > { %6303 = vmatmul.mubr.msk.bf16.gmra.mxu0 %vm4225_vm0, %v4127_v2  ;;  %6266 = vmatprep.mubr.msk.bf16.mxu1 %vm4225_vm0, %v4185_v11  ;;  %v4517_v24 = vsel %vm1273_vm13, %v4497_v50, %v4498_v15  ;;  %v4518_v1 = vsel %vm1273_vm13, %v4496_v54, %v4497_v50  ;;  %v4192_v46 = vpack.c.bf16 %v4153_v33, %v4183_v53  ;;  %v4506_v29 = vrot.slane %v8869_v31, 1  ;;  %v9527_v54 = vld [vmem:[#allocation34_spill] sm:$0xff]  ;;  %v6680_v41 = vld [vmem:[%s9364_s14 + $0x70] ss:$8 sps:$4 sm:$0xff]   ;;  %v6688_v7 = vld [vmem:[%s9364_s14 + $0x54] ss:$8 sps:$4 sm:$0xff]  }
 0x351   : > { %6267 = vmatmul.mubr.msk.bf16.vlgmr.msra.gmra.mxu1 %vm4225_vm0, %v4186_v32  ;;  %v4540_v39 = vpack.c.bf16 %v4525_v5, %v4522_v30  ;;  %v4529_v28 = vmul.f32 %v9525_v16, %v4517_v24  ;;  %v4515_v0 = vsel %vm1273_vm13, %v4499_v37, %v4500_v40  ;;  %v4516_v58 = vsel %vm1273_vm13, %v4498_v15, %v4499_v37  ;;  %v6654_v32 = vld [vmem:[#allocation10 + $0x48] sm:$0xff]   ;;  %v9528_v15 = vld [vmem:[#allocation36_spill] sm:$0xff] }
 0x352   : > { %6307 = vmatpush3.bf16.msra.mxu1 %v9526_v21  ;;  %6270 = vmatprep.mubr.msk.bf16.mxu1 %vm4225_vm0, %v4187_v8  ;;  %v4531_v50 = vmul.f32 %v9527_v54, %v4515_v0  ;;  %v4513_v31 = vsel %vm1273_vm13, %v4501_v34, %v4502_v57  ;;  %v4514_v63 = vsel %vm1273_vm13, %v4500_v40, %v4501_v34  ;;  %v9530_v34 = vmov 0   ;;  %v6670_v33 = vld [vmem:[%s9362_s12 + $0x34] ss:$8 sps:$4 sm:$0xff]   ;;  %v6686_v11 = vld [vmem:[%s9364_s14 + $0x50] ss:$8 sps:$4 sm:$0xff]  }
 0x353   : > { %6308 = vmatprep.subr.bf16.mxu1 %v6653_v18  ;;  %v4542_v2 = vpack.c.bf16 %v4529_v28, %v4518_v1  ;;  %v4533_v45 = vmul.f32 %v9528_v15, %v4513_v31  ;;  %v4511_v37 = vsel %vm1273_vm13, %v4503_v17, %v4504_v23  ;;  %v4512_v61 = vsel %vm1273_vm13, %v4502_v57, %v4503_v17  ;;  %v6655_v17 = vld [vmem:[#allocation10 + $0x40] sm:$0xff]   ;;  %v6673_v30 = vld [vmem:[%s9362_s12 + $0x24] ss:$8 sps:$4 sm:$0xff]   ;;  %v6677_v24 = vld [vmem:[%s9362_s12] ss:$8 sps:$4 sm:$0xff]  }
 0x354   : > { %v4543_v25 = vpack.c.bf16 %v4531_v50, %v4516_v58  ;;  %v4535_v3 = vmul.f32 %v9529_v51, %v4511_v37  ;;  %v4509_v40 = vsel %vm1273_vm13, %v4505_v10, %v4506_v29  ;;  %5033 = vmatprep.mubr.bf16.mxu0 %v9530_v34  ;;  %v4510_v62 = vsel %vm1273_vm13, %v4504_v23, %v4505_v10  ;;  %v6668_v55 = vld [vmem:[%s9362_s12 + $0x30] ss:$8 sps:$4 sm:$0xff]   ;;  %v6676_v52 = vld [vmem:[%s9362_s12 + $0x14] ss:$8 sps:$4 sm:$0xff]   ;;  %v6697_v5 = vld [vmem:[%s9364_s14 + $0x24] ss:$8 sps:$4 sm:$0xff]  }
 0x355   : > { %v4544_v8 = vpack.c.bf16 %v4533_v45, %v4514_v63  ;;  %v4537_v43 = vmul.f32 %v9531_v14, %v4509_v40  ;;  %v4508_v12 = vsel %vm1273_vm13, %v4506_v29, %v4507_v6  ;;  %v4523_v57 = vsel %vm1273_vm13, %v4507_v6, %v4492_v13  ;;  %v6661_v13 = vld [vmem:[%s9362_s12 + $0x64] ss:$8 sps:$4 sm:$0xff]   ;;  %v6659_v6 = vld [vmem:[%s9362_s12 + $0x60] ss:$8 sps:$4 sm:$0xff]   ;;  %v6692_v53 = vld [vmem:[%s9364_s14 + $0x30] ss:$8 sps:$4 sm:$0xff]  }
 0x356   : > { %6309 = vmatpush3.bf16.msra.mxu1 %v6653_v18  ;;  %v4545_v4 = vpack.c.bf16 %v4535_v3, %v4512_v61  ;;  %v4539_v49 = vmul.f32 %v9532_v48, %v4523_v57  ;;  %5003 = vmatprep.subr.bf16.mxu0 %v6661_v13  ;;  %v6689_v18 = vld [vmem:[%s9364_s14 + $0x40] ss:$8 sps:$4 sm:$0xff]   ;;  %v6674_v47 = vld [vmem:[%s9362_s12 + $0x10] ss:$8 sps:$4 sm:$0xff]   ;;  %v6679_v10 = vld [vmem:[%s9362_s12 + $0x4] ss:$8 sps:$4 sm:$0xff]  }
 0x357   : > { %6310 = vmatprep.subr.bf16.mxu1 %v6654_v32  ;;  %v4546_v42 = vpack.c.bf16 %v4537_v43, %v4510_v62  ;;  %5004 = vmatpush1.bf16.msra.mxu0 %v6659_v6  ;;  %v6700_v1 = vld [vmem:[%s9364_s14 + $0x14] ss:$8 sps:$4 sm:$0xff]   ;;  %v6701_v16 = vld [vmem:[%s9364_s14] ss:$8 sps:$4 sm:$0xff]   ;;  %v6704_v21 = vld [vmem:[%s9364_s14 + $0xf0] ss:$8 sps:$4 sm:$0xff]  }
 0x358   : > { %v4547_v23 = vpack.c.bf16 %v4539_v49, %v4508_v12  ;;  %v6706_v0 = vld [vmem:[%s9364_s14 + $0xf4] ss:$8 sps:$4 sm:$0xff]   ;;  %v6709_v54 = vld [vmem:[%s9364_s14 + $0xe4] ss:$8 sps:$4 sm:$0xff]   ;;  %v6710_v37 = vld [vmem:[%s9364_s14 + $0xd0] ss:$8 sps:$4 sm:$0xff]  }
 0x359   : > { %6271 = vmatmul.mubr.msk.bf16.gmra.mxu1 %vm4225_vm0, %v4188_v60  ;;  %v6664_v60 = vld [vmem:[%s9362_s12 + $0x54] ss:$8 sps:$4 sm:$0xff]   ;;  %v6715_v61 = vld [vmem:[%s9364_s14 + $0xc4] ss:$8 sps:$4 sm:$0xff]   ;;  %v6713_v40 = vld [vmem:[%s9364_s14 + $0xc0] ss:$8 sps:$4 sm:$0xff]  }
 0x35a   : > { %6274 = vmatprep.mubr.msk.bf16.mxu1 %vm4225_vm0, %v4189_v36  ;;  %6311 = vmatpush3.bf16.msra.mxu1 %v6654_v32  ;;  %v6667_v36 = vld [vmem:[%s9362_s12 + $0x44] ss:$8 sps:$4 sm:$0xff]   ;;  %v6707_v32 = vld [vmem:[%s9364_s14 + $0xe0] ss:$8 sps:$4 sm:$0xff]   ;;  %v6712_v63 = vld [vmem:[%s9364_s14 + $0xd4] ss:$8 sps:$4 sm:$0xff]  }
 0x35b   : > { %6312 = vmatprep.subr.bf16.mxu1 %v6655_v17  ;;  %5005 = vmatprep.subr.bf16.mxu0 %v6664_v60  ;;  %v6716_v43 = vld [vmem:[%s9364_s14 + $0xb0] ss:$8 sps:$4 sm:$0xff]  }
 0x35c   : > { %5006 = vmatpush1.bf16.msra.mxu0 %v6662_v44 }
 0x35d   : > { %5007 = vmatprep.subr.bf16.mxu0 %v6667_v36 }
 0x35e   : > { %6313 = vmatpush3.bf16.msra.mxu1 %v6655_v17 }
 0x35f   : > { %5254 = vmatprep.subr.bf16.mxu1 %v6682_v19 }
 0x360   : > { %5008 = vmatpush1.bf16.msra.mxu0 %v6665_v35 }
 0x361   : > { %6275 = vmatmul.mubr.msk.bf16.gmra.mxu1 %vm4225_vm0, %v4190_v22  ;;  %5009 = vmatprep.subr.bf16.mxu0 %v6670_v33  ;;  %v6671_v22 = vld [vmem:[%s9362_s12 + $0x20] ss:$8 sps:$4 sm:$0xff]  }
 0x362   : > { %6278 = vmatprep.mubr.msk.bf16.mxu1 %vm4225_vm0, %v4191_v9  ;;  %v6694_v9 = vld [vmem:[%s9364_s14 + $0x34] ss:$8 sps:$4 sm:$0xff]  }
 0x364   : > { %5010 = vmatpush1.bf16.msra.mxu0 %v6668_v55 }
 0x365   : > { %5011 = vmatprep.subr.bf16.mxu0 %v6673_v30 }
 0x368   : > { %5012 = vmatpush1.bf16.msra.mxu0 %v6671_v22 }
 0x369   : > { %6279 = vmatmul.mubr.msk.bf16.gmra.mxu1 %vm4225_vm0, %v4192_v46  ;;  %5013 = vmatprep.subr.bf16.mxu0 %v6676_v52  ;;  %v6698_v46 = vld [vmem:[%s9364_s14 + $0x10] ss:$8 sps:$4 sm:$0xff]  }
 0x36a   : > { %6314 = vmatprep.mubr.msk.bf16.mxu1 %vm4225_vm0, %v4540_v39  ;;  %v6703_v39 = vld [vmem:[%s9364_s14 + $0x4] ss:$8 sps:$4 sm:$0xff]  }
 0x36c   : > { %5014 = vmatpush1.bf16.msra.mxu0 %v6674_v47 }
 0x36d   : > { %5015 = vmatprep.subr.bf16.mxu0 %v6679_v10 }
 0x370   : > { %5016 = vmatpush1.bf16.msra.mxu0 %v6677_v24 }
 0x371   : > { %6315 = vmatmul.mubr.msk.bf16.vlgmr.msra.gmra.mxu1 %vm4225_vm0, %v4541_v26  ;;  %v6695_v26 = vld [vmem:[%s9364_s14 + $0x20] ss:$8 sps:$4 sm:$0xff]  }
 0x372   : > { %6318 = vmatprep.mubr.msk.bf16.mxu1 %vm4225_vm0, %v4542_v2  ;;  %5255 = vmatpush1.bf16.msra.mxu1 %v6680_v41 }
 0x373   : > { %5256 = vmatprep.subr.bf16.mxu1 %v6685_v20 }
 0x376   : > { %5257 = vmatpush1.bf16.msra.mxu1 %v6683_v59  ;;  %v9208_v59 = vld [vmem:[%s9361_s11] ss:$0 sm:$0xff] }
 0x377   : > { %5258 = vmatprep.subr.bf16.mxu1 %v6688_v7 }
 0x379   : > { %6319 = vmatmul.mubr.msk.bf16.gmra.mxu1 %vm4225_vm0, %v4543_v25 }
 0x37a   : > { %6322 = vmatprep.mubr.msk.bf16.mxu1 %vm4225_vm0, %v4544_v8  ;;  %5259 = vmatpush1.bf16.msra.mxu1 %v6686_v11  ;;  %v6718_v8 = vld [vmem:[%s9364_s14 + $0xb4] ss:$8 sps:$4 sm:$0xff]  }
 0x37b   : > { %5260 = vmatprep.subr.bf16.mxu1 %v6691_v56 }
 0x37e   : > { %5261 = vmatpush1.bf16.msra.mxu1 %v6689_v18 }
 0x37f   : > { %5262 = vmatprep.subr.bf16.mxu1 %v6694_v9 }
 0x381   : > { %6323 = vmatmul.mubr.msk.bf16.gmra.mxu1 %vm4225_vm0, %v4545_v4  ;;  %v6721_v4 = vld [vmem:[%s9364_s14 + $0xa4] ss:$8 sps:$4 sm:$0xff]  }
 0x382   : > { %6326 = vmatprep.mubr.msk.bf16.mxu1 %vm4225_vm0, %v4546_v42  ;;  %5263 = vmatpush1.bf16.msra.mxu1 %v6692_v53  ;;  %v6719_v42 = vld [vmem:[%s9364_s14 + $0xa0] ss:$8 sps:$4 sm:$0xff]  }
 0x383   : > { %5264 = vmatprep.subr.bf16.mxu1 %v6697_v5 }
 0x386   : > { %5265 = vmatpush1.bf16.msra.mxu1 %v6695_v26 }
 0x387   : > { %5266 = vmatprep.subr.bf16.mxu1 %v6700_v1 }
 0x389   : > { %6327 = vmatmul.mubr.msk.bf16.gmra.mxu1 %vm4225_vm0, %v4547_v23 }
 0x38a   : > { %5267 = vmatpush1.bf16.msra.mxu1 %v6698_v46 }
 0x38b   : > { %5268 = vmatprep.subr.bf16.mxu1 %v6703_v39 }
 0x38e   : > { %5269 = vmatpush1.bf16.msra.mxu1 %v6701_v16 }
 0x38f   : > { %5270 = vmatprep.subr.bf16.mxu1 %v6706_v0 }
 0x392   : > { %5271 = vmatpush2.bf16.msra.mxu1 %v6704_v21 }
 0x393   : > { %5272 = vmatprep.subr.bf16.mxu1 %v6709_v54 }
 0x396   : > { %5273 = vmatpush2.bf16.msra.mxu1 %v6707_v32 }
 0x397   : > { %5274 = vmatprep.subr.bf16.mxu1 %v6712_v63 }
 0x39a   : > { %5275 = vmatpush2.bf16.msra.mxu1 %v6710_v37 }
 0x39b   : > { %5276 = vmatprep.subr.bf16.mxu1 %v6715_v61 }
 0x39e   : > { %5277 = vmatpush2.bf16.msra.mxu1 %v6713_v40 }
 0x39f   : > { %5278 = vmatprep.subr.bf16.mxu1 %v6718_v8 }
 0x3a2   : > { %5279 = vmatpush2.bf16.msra.mxu1 %v6716_v43 }
 0x3a3   : > { %5280 = vmatprep.subr.bf16.mxu1 %v6721_v4 }
 0x3a6   : > { %5281 = vmatpush2.bf16.msra.mxu1 %v6719_v42 }
 0x3f7   : > { %v6292_v50 = vpop.f32.mrf.mxu0 }
 0x3f9   : > { %v4429_v15 = vpop.f32.mrf.mxu0 }
 0x3fb   : > { %v6293_v51 = vpop.f32.mrf.mxu0 }
 0x3fd   : > { %v4432_v62 = vpop.f32.mrf.mxu0 }
 0x400   : > { %v6296_v57 = vpop.f32.mrf.mxu0 }
 0x402   : > { %v4445_v49 = vpop.f32.mrf.mxu0 }
 0x404   : > { %v6297_v38 = vpop.f32.mrf.mxu0 }
 0x406   : > { %v4448_v44 = vpop.f32.mrf.mxu0 }
 0x408   : > { %v6300_v33 = vpop.f32.mrf.mxu0 }
 0x40a   : > { %v4461_v47 = vpop.f32.mrf.mxu0 }
 0x40c   : > { %v6301_v54 = vpop.f32.mrf.mxu0 }
 0x40e   : > { %v4464_v43 = vpop.f32.mrf.mxu0 }
 0x411   : > { %v6268_v28 = vpop.f32.mrf.mxu1 }
 0x412   : > { %v4438_v6 = vadd.f32 %v6292_v50, %v6268_v28 }
 0x413   : > { %v4284_v29 = vpop.f32.mrf.mxu1 }
 0x414   : > { %v4430_v41 = vadd.f32 %v4429_v15, %v4284_v29 }
 0x415   : > { %v6269_v58 = vpop.f32.mrf.mxu1 }
 0x416   : > { %v4441_v20 = vadd.f32 %v6293_v51, %v6269_v58 }
 0x417   : > { %v4287_v31 = vpop.f32.mrf.mxu1 }
 0x418   : > { %v4433_v55 = vadd.f32 %v4432_v62, %v4287_v31 }
 0x419   : > { %v6272_v2 = vpop.f32.mrf.mxu1 }
 0x41a   : > { %v4454_v22 = vadd.f32 %v6296_v57, %v6272_v2 }
 0x41b   : > { %v4300_v45 = vpop.f32.mrf.mxu1 }
 0x41c   : > { %v4446_v5 = vadd.f32 %v4445_v49, %v4300_v45 }
 0x41d   : > { %v6273_v25 = vpop.f32.mrf.mxu1 }
 0x41e   : > { %v4457_v24 = vadd.f32 %v6297_v38, %v6273_v25 }
 0x41f   : > { %v9172_v3 = vpop.f32.mrf.mxu1 }
 0x420   : > { %v4449_v50 = vadd.f32 %v4448_v44, %v9172_v3 }
 0x421   : > { %v9177_v34 = vpop.f32.mrf.mxu1 }
 0x422   : > { %v4470_v37 = vadd.f32 %v6300_v33, %v9177_v34 }
 0x423   : > { %v9182_v14 = vpop.f32.mrf.mxu1 }
 0x424   : > { %v4462_v3 = vadd.f32 %v4461_v47, %v9182_v14 }
 0x425   : > { %v9187_v12 = vpop.f32.mrf.mxu1 }
 0x426   : > { %v4473_v4 = vadd.f32 %v6301_v54, %v9187_v12  ;;  %v6304_v12 = vpop.f32.mrf.mxu0 }
 0x427   : > { %v9192_v17 = vpop.f32.mrf.mxu1 }
 0x429   : > { %v9197_v48 = vpop.f32.mrf.mxu1 }
 0x42b   : > { %v9199_v23 = vpop.f32.mrf.mxu1 }
 0x42d   : > { %v9201_v27 = vpop.f32.mrf.mxu1 }
 0x42f   : > { %v9203_v13 = vpop.f32.mrf.mxu1 }
 0x431   : > { %v6316_v60 = vpop.f32.mrf.mxu1 }
 0x432   : > { %v4704_v19 = vadd.f32 %v6316_v60, %v4438_v6 }
 0x433   : > { %v4639_v36 = vpop.f32.mrf.mxu1 }
 0x434   : > { %v4702_v35 = vadd.f32 %v4639_v36, %v4430_v41  ;;  %v4727_v56 = vadd.f32 %v9208_v59, %v4704_v19 }
 0x435   : > { %v6317_v7 = vpop.f32.mrf.mxu1 }
 0x436   : > { %v4705_v11 = vadd.f32 %v6317_v7, %v4441_v20  ;;  %v4725_v30 = vadd.f32 %v9208_v59, %v4702_v35  ;;  %v4759_v1 = vmul.f32 0.01, %v4727_v56  ;;  %vm4743_vm13 = vcmp.gt.f32.partialorder %v4727_v56, 0.0 }
 0x437   : > { %v4642_v18 = vpop.f32.mrf.mxu1 }
 0x438   : > { %v4728_v9 = vadd.f32 %v9208_v59, %v4705_v11  ;;  %v4703_v52 = vadd.f32 %v4642_v18, %v4433_v55  ;;  %v4757_v46 = vmul.f32 0.01, %v4725_v30  ;;  %vm4741_vm15 = vcmp.gt.f32.partialorder %v4725_v30, 0.0 }
 0x439   : > { %v6320_v53 = vpop.f32.mrf.mxu1  ;;  %v4775_v32 = vsel %vm4743_vm13, %v4727_v56, %v4759_v1  ;;  %vm4907_vm13 = vcmask 1042434  }
 0x43a   : > { %vm4744_vm11 = vcmp.gt.f32.partialorder %v4728_v9, 0.0  ;;  %v4760_v10 = vmul.f32 0.01, %v4728_v9  ;;  %v4708_v26 = vadd.f32 %v6320_v53, %v4454_v22  ;;  %v4726_v39 = vadd.f32 %v9208_v59, %v4703_v52 }
 0x43b   : > { %v4655_v16 = vpop.f32.mrf.mxu1  ;;  %v4773_v2 = vsel %vm4741_vm15, %v4725_v30, %v4757_v46  ;;  %v4465_v30 = vadd.f32 %v4464_v43, %v9192_v17  ;;  %vm4909_vm15 = vcmask 1043459  }
 0x43c   : > { %v4731_v28 = vadd.f32 %v9208_v59, %v4708_v26  ;;  %v4706_v0 = vadd.f32 %v4655_v16, %v4446_v5  ;;  %v4776_v29 = vsel %vm4744_vm11, %v4728_v9, %v4760_v10  ;;  %vm4742_vm0 = vcmp.gt.f32.partialorder %v4726_v39, 0.0  ;;  %v4477_v5 = vpop.f32.mrf.mxu0 }
 0x43d   : > { %v4758_v21 = vmul.f32 0.01, %v4726_v39  ;;  %v6321_v58 = vpop.f32.mrf.mxu1  ;;  %v4796_v25 = vadd.f32 %v4776_v29, %v4775_v32  ;;  %v4486_v16 = vadd.f32 %v6304_v12, %v9197_v48  ;;  %v4478_v17 = vadd.f32 %v4477_v5, %v9199_v23 }
 0x43e   : > { %v4709_v31 = vadd.f32 %v6321_v58, %v4457_v24  ;;  %v4729_v15 = vadd.f32 %v9208_v59, %v4706_v0  ;;  %v4763_v51 = vmul.f32 0.01, %v4731_v28  ;;  %vm4747_vm1 = vcmp.gt.f32.partialorder %v4731_v28, 0.0 }
 0x43f   : > { %v4774_v63 = vsel %vm4742_vm0, %v4726_v39, %v4758_v21  ;;  %v4658_v45 = vpop.f32.mrf.mxu1  ;;  %v4797_v60 = vrot.slane %v4796_v25, 4  ;;  %vm4905_vm11 = vcmask 1041409   ;;  %vm4911_vm0 = vcmask 1044484  }
 0x440   : > { %v4789_v61 = vadd.f32 %v4774_v63, %v4773_v2  ;;  %v4732_v40 = vadd.f32 %v9208_v59, %v4709_v31  ;;  %v4707_v8 = vadd.f32 %v4658_v45, %v4449_v50  ;;  %v4761_v49 = vmul.f32 0.01, %v4729_v15  ;;  %v6305_v50 = vpop.f32.mrf.mxu0 }
 0x441   : > { %v6324_v62 = vpop.f32.mrf.mxu1  ;;  %v4779_v41 = vsel %vm4747_vm1, %v4731_v28, %v4763_v51  ;;  %vm4745_vm4 = vcmp.gt.f32.partialorder %v4729_v15, 0.0  ;;  %v4798_v18 = vadd.f32 %v4797_v60, %v4796_v25  ;;  %vm4913_vm1 = vcmask 1045509  }
 0x442   : > { %v4790_v57 = vrot.slane %v4789_v61, 4  ;;  %v4712_v42 = vadd.f32 %v6324_v62, %v4470_v37  ;;  %vm4748_vm2 = vcmp.gt.f32.partialorder %v4732_v40, 0.0  ;;  %v4764_v38 = vmul.f32 0.01, %v4732_v40 }
 0x443   : > { %v4730_v34 = vadd.f32 %v9208_v59, %v4707_v8  ;;  %v4671_v6 = vpop.f32.mrf.mxu1  ;;  %v4777_v33 = vsel %vm4745_vm4, %v4729_v15, %v4761_v49  ;;  %v4799_v29 = vrot.slane %v4798_v18, 2  ;;  %vm4917_vm4 = vcmask 1047559  }
 0x444   : > { %v4791_v44 = vadd.f32 %v4790_v57, %v4789_v61  ;;  %v4780_v19 = vsel %vm4748_vm2, %v4732_v40, %v4764_v38  ;;  %v4735_v14 = vadd.f32 %v9208_v59, %v4712_v42  ;;  %v4710_v7 = vadd.f32 %v4671_v6, %v4462_v3  ;;  %v4480_v40 = vpop.f32.mrf.mxu0 }
 0x445   : > { %vm4746_vm5 = vcmp.gt.f32.partialorder %v4730_v34, 0.0  ;;  %v4762_v36 = vmul.f32 0.01, %v4730_v34  ;;  %v6325_v20 = vpop.f32.mrf.mxu1  ;;  %v4810_v35 = vadd.f32 %v4780_v19, %v4779_v41  ;;  %v4800_v61 = vadd.f32 %v4799_v29, %v4798_v18 }
 0x446   : > { %v4713_v55 = vadd.f32 %v6325_v20, %v4473_v4  ;;  %v4792_v9 = vrot.slane %v4791_v44, 2  ;;  %vm4751_vm6 = vcmp.gt.f32.partialorder %v4735_v14, 0.0  ;;  %v4767_v52 = vmul.f32 0.01, %v4735_v14 }
 0x447   : > { %v4778_v11 = vsel %vm4746_vm5, %v4730_v34, %v4762_v36  ;;  %v4674_v56 = vpop.f32.mrf.mxu1  ;;  %v4811_v10 = vrot.slane %v4810_v35, 4  ;;  %v4733_v24 = vadd.f32 %v9208_v59, %v4710_v7  ;;  %v4489_v57 = vadd.f32 %v6305_v50, %v9201_v27 }
 0x448   : > { %v4803_v22 = vadd.f32 %v4778_v11, %v4777_v33  ;;  %v4736_v53 = vadd.f32 %v9208_v59, %v4713_v55  ;;  %v4711_v1 = vadd.f32 %v4674_v56, %v4465_v30  ;;  %v4793_v21 = vadd.f32 %v4792_v9, %v4791_v44 }
 0x449   : > { %v6328_v47 = vpop.f32.mrf.mxu1  ;;  %v4783_v58 = vsel %vm4751_vm6, %v4735_v14, %v4767_v52  ;;  %v4812_v31 = vadd.f32 %v4811_v10, %v4810_v35  ;;  %v4765_v2 = vmul.f32 0.01, %v4733_v24  ;;  %vm4749_vm8 = vcmp.gt.f32.partialorder %v4733_v24, 0.0 }
 0x44a   : > { %v4804_v26 = vrot.slane %v4803_v22, 4  ;;  %vm4752_vm7 = vcmp.gt.f32.partialorder %v4736_v53, 0.0  ;;  %v4768_v46 = vmul.f32 0.01, %v4736_v53  ;;  %v4734_v0 = vadd.f32 %v9208_v59, %v4711_v1 }
 0x44b   : > { %v4687_v39 = vpop.f32.mrf.mxu1  ;;  %v4716_v48 = vadd.f32 %v6328_v47, %v4486_v16  ;;  %v4794_v8 = vrot.slane %v4793_v21, 1  ;;  %v4813_v62 = vrot.slane %v4812_v31, 2  ;;  %v4781_v43 = vsel %vm4749_vm8, %v4733_v24, %v4765_v2 }
 0x44c   : > { %v4805_v28 = vadd.f32 %v4804_v26, %v4803_v22  ;;  %v4784_v54 = vsel %vm4752_vm7, %v4736_v53, %v4768_v46  ;;  %vm4750_vm9 = vcmp.gt.f32.partialorder %v4734_v0, 0.0  ;;  %v4766_v45 = vmul.f32 0.01, %v4734_v0 }
 0x44d   : > { %v4824_v63 = vadd.f32 %v4784_v54, %v4783_v58  ;;  %v6329_v15 = vpop.f32.mrf.mxu1  ;;  %v4714_v25 = vadd.f32 %v4687_v39, %v4478_v17  ;;  %v4481_v42 = vadd.f32 %v4480_v40, %v9203_v13  ;;  %v4739_v38 = vadd.f32 %v9208_v59, %v4716_v48 }
 0x44e   : > { %v4806_v32 = vrot.slane %v4805_v28, 2  ;;  %v4782_v51 = vsel %vm4750_vm9, %v4734_v0, %v4766_v45  ;;  %v4717_v44 = vadd.f32 %v6329_v15, %v4489_v57  ;;  %v4801_v19 = vrot.slane %v4800_v61, 1 }
 0x44f   : > { %v4825_v23 = vrot.slane %v4824_v63, 4  ;;  %v4690_v4 = vpop.f32.mrf.mxu1  ;;  %v4817_v49 = vadd.f32 %v4782_v51, %v4781_v43  ;;  %v4737_v6 = vadd.f32 %v9208_v59, %v4714_v25  ;;  %v4795_v36 = vadd.f32 %v4794_v8, %v4793_v21 }
 0x450   : > { %v4807_v37 = vadd.f32 %v4806_v32, %v4805_v28  ;;  %v4715_v41 = vadd.f32 %v4690_v4, %v4481_v42  ;;  %v4814_v14 = vadd.f32 %v4813_v62, %v4812_v31  ;;  %v4771_v35 = vmul.f32 0.01, %v4739_v38 }
 0x451   : > { %v4826_v3 = vadd.f32 %v4825_v23, %v4824_v63  ;;  %v4818_v60 = vrot.slane %v4817_v49, 4  ;;  %v4740_v7 = vadd.f32 %v9208_v59, %v4717_v44  ;;  %vm4755_vm10 = vcmp.gt.f32.partialorder %v4739_v38, 0.0 }
 0x452   : > { %v4808_v34 = vrot.slane %v4807_v37, 1  ;;  %v4738_v27 = vadd.f32 %v9208_v59, %v4715_v41  ;;  %vm4753_vm3 = vcmp.gt.f32.partialorder %v4737_v6, 0.0  ;;  %v4769_v33 = vmul.f32 0.01, %v4737_v6 }
 0x453   : > { %v4827_v20 = vrot.slane %v4826_v3, 2  ;;  %v4819_v12 = vadd.f32 %v4818_v60, %v4817_v49  ;;  %vm4756_vm12 = vcmp.gt.f32.partialorder %v4740_v7, 0.0  ;;  %v4772_v55 = vmul.f32 0.01, %v4740_v7 }
 0x454   : > { %v4809_v13 = vadd.f32 %v4808_v34, %v4807_v37  ;;  %vm4754_vm14 = vcmp.gt.f32.partialorder %v4738_v27, 0.0  ;;  %v4802_v56 = vadd.f32 %v4801_v19, %v4800_v61  ;;  %v4815_v30 = vrot.slane %v4814_v14, 1 }
 0x455   : > { %v4820_v11 = vrot.slane %v4819_v12, 2  ;;  %v4828_v18 = vadd.f32 %v4827_v20, %v4826_v3  ;;  %v4770_v22 = vmul.f32 0.01, %v4738_v27  ;;  %v4787_v52 = vsel %vm4755_vm10, %v4739_v38, %v4771_v35 }
 0x456   : > { %v4788_v53 = vsel %vm4756_vm12, %v4740_v7, %v4772_v55  ;;  %v4845_v47 = vmul.f32 0.0625, %v4795_v36  ;;  %v4785_v5 = vsel %vm4753_vm3, %v4737_v6, %v4769_v33  ;;  %v4847_v59 = vmul.f32 0.0625, %v4809_v13  ;;  %v6722_v13 = vld [vmem:[%s9364_s14 + $0x90] ss:$8 sps:$4 sm:$0xff]   ;;  %v6724_v33 = vld [vmem:[%s9364_s14 + $0x94] ss:$8 sps:$4 sm:$0xff]  }
 0x457   : > { %v4821_v9 = vadd.f32 %v4820_v11, %v4819_v12  ;;  %v4838_v10 = vadd.f32 %v4788_v53, %v4787_v52  ;;  %v4786_v26 = vsel %vm4754_vm14, %v4738_v27, %v4770_v22  ;;  %v4846_v46 = vmul.f32 0.0625, %v4802_v56  ;;  %v6727_v11 = vld [vmem:[%s9364_s14 + $0x84] ss:$8 sps:$4 sm:$0xff]   ;;  %5282 = vmatprep.subr.bf16.mxu1 %v6724_v33  ;;  %v6725_v55 = vld [vmem:[%s9364_s14 + $0x80] ss:$8 sps:$4 sm:$0xff]   ;;  %v6728_v56 = vld [vmem:[%s9366_s16 + $0x78] sm:$0xff]  }
 0x458   : > { %v4831_v1 = vadd.f32 %v4786_v26, %v4785_v5  ;;  %v4816_v39 = vadd.f32 %v4815_v30, %v4814_v14  ;;  %v4829_v16 = vrot.slane %v4828_v18, 1  ;;  %v4853_v29 = vpack.c.bf16 %v4845_v47, %v4845_v47  ;;  %5283 = vmatpush2.bf16.msra.mxu1 %v6722_v13  ;;  %v6729_v30 = vld [vmem:[%s9366_s16 + $0x38] sm:$0xff]   ;;  %6056 = vmatprep.subr.bf16.mxu0 %v6728_v56  ;;  %v6731_v22 = vld [vmem:[%s9366_s16 + $0x30] sm:$0xff]   ;;  %v6733_v52 = vld [vmem:[%s9366_s16 + $0x28] sm:$0xff]  }
 0x459   : > { %v4822_v24 = vrot.slane %v4821_v9, 1  ;;  %v4839_v17 = vrot.slane %v4838_v10, 4  ;;  %v4855_v58 = vpack.c.bf16 %v4847_v59, %v4847_v59  ;;  %v4854_v31 = vpack.c.bf16 %v4846_v46, %v4846_v46  ;;  %5284 = vmatprep.subr.bf16.mxu1 %v6727_v11  ;;  %v6734_v53 = vld [vmem:[%s9366_s16 + $0x60] sm:$0xff]   ;;  %v6736_v5 = vld [vmem:[%s9366_s16 + $0x58] sm:$0xff]   ;;  %v6738_v26 = vld [vmem:[%s9366_s16 + $0x50] sm:$0xff]  }
 0x45a   : > { %v4832_v0 = vrot.slane %v4831_v1, 4  ;;  %v4848_v32 = vmul.f32 0.0625, %v4816_v39  ;;  %v4830_v2 = vadd.f32 %v4829_v16, %v4828_v18  ;;  %v4897_v45 = vunpack.c.l.b16 %v4853_v29  ;;  %v6730_v18 = vld [vmem:[%s9366_s16 + $0x70] sm:$0xff]   ;;  %v6735_v47 = vld [vmem:[%s9366_s16 + $0x20] sm:$0xff]  }
 0x45b   : > { %v4823_v28 = vadd.f32 %v4822_v24, %v4821_v9  ;;  %v4840_v21 = vadd.f32 %v4839_v17, %v4838_v10  ;;  %v4899_v37 = vunpack.c.l.b16 %v4855_v58  ;;  %v4898_v61 = vunpack.c.l.b16 %v4854_v31  ;;  %v6732_v9 = vld [vmem:[%s9366_s16 + $0x68] sm:$0xff]   ;;  %v6737_v10 = vld [vmem:[%s9366_s16 + $0x18] sm:$0xff]   ;;  %v6739_v59 = vld [vmem:[%s9366_s16 + $0x10] sm:$0xff]  }
 0x45c   : > { %v4833_v50 = vadd.f32 %v4832_v0, %v4831_v1  ;;  %v4856_v51 = vpack.c.bf16 %v4848_v32, %v4848_v32  ;;  %v4850_v40 = vmul.f32 0.0625, %v4830_v2  ;;  %vm4915_vm2 = vcmask 1046534   ;;  %5285 = vmatpush2.bf16.msra.mxu1 %v6725_v55  ;;  %v4877_v24 = vld [vmem:[%s9363_s13] sm:$0x3]  ;;  %v9533_v1 = vld [vmem:[#allocation30_spill] sm:$0xff]  ;;  %v9534_v39 = vld [vmem:[#allocation31_spill] sm:$0xff] }
 0x45d   : > { %v4849_v54 = vmul.f32 0.0625, %v4823_v28  ;;  %v4841_v63 = vrot.slane %v4840_v21, 2  ;;  %v4906_v43 = vsel %vm4905_vm11, %v4898_v61, %v4897_v45  ;;  %v4882_v46 = vrot.slane %v4877_v24, %v9533_v1  ;;  %v6741_v45 = vld [vmem:[%s9366_s16 + $0x8] sm:$0xff]  }
 0x45e   : > { %v4834_v15 = vrot.slane %v4833_v50, 2  ;;  %v4908_v4 = vsel %vm4907_vm13, %v4899_v37, %v4906_v43  ;;  %v4900_v49 = vunpack.c.l.b16 %v4856_v51  ;;  %v4858_v38 = vpack.c.bf16 %v4850_v40, %v4850_v40  ;;  %v6743_v37 = vld [vmem:[%s9366_s16] sm:$0xff]  }
 0x45f   : > { %v4842_v48 = vadd.f32 %v4841_v63, %v4840_v21  ;;  %v4857_v23 = vpack.c.bf16 %v4849_v54, %v4849_v54  ;;  %v4886_v16 = vrot.slane %v4877_v24, %v9534_v39 }
 0x460   : > { %v4835_v25 = vadd.f32 %v4834_v15, %v4833_v50  ;;  %v4910_v44 = vsel %vm4909_vm15, %v4900_v49, %v4908_v4  ;;  %v4902_v36 = vunpack.c.l.b16 %v4858_v38  ;;  %v6740_v15 = vld [vmem:[%s9366_s16 + $0x48] sm:$0xff]  }
 0x461   : > { %v4843_v8 = vrot.slane %v4842_v48, 1  ;;  %v4901_v57 = vunpack.c.l.b16 %v4857_v23  ;;  %v5082_v23 = vld [vmem:[%s9365_s15] sm:$0x3] }
 0x462   : > { %v4836_v62 = vrot.slane %v4835_v25, 1  ;;  %v5091_v61 = vrot.slane %v5082_v23, %v9534_v39 }
 0x463   : > { %v4844_v3 = vadd.f32 %v4843_v8, %v4842_v48  ;;  %v4912_v19 = vsel %vm4911_vm0, %v4901_v57, %v4910_v44  ;;  %v6742_v48 = vld [vmem:[%s9366_s16 + $0x40] sm:$0xff]  }
 0x464   : > { %v4837_v42 = vadd.f32 %v4836_v62, %v4835_v25  ;;  %v4914_v12 = vsel %vm4913_vm1, %v4902_v36, %v4912_v19  ;;  %v5087_v25 = vrot.slane %v5082_v23, %v9533_v1 }
 0x465   : > { %v4852_v34 = vmul.f32 0.0625, %v4844_v3 }
 0x466   : > { %v4851_v6 = vmul.f32 0.0625, %v4837_v42 }
 0x467   : > { %v4860_v60 = vpack.c.bf16 %v4852_v34, %v4852_v34  ;;  %v5909_v34 = vld [vmem:[%s9367_s17] ss:$0 sm:$0xff] }
 0x468   : > { %v4859_v41 = vpack.c.bf16 %v4851_v6, %v4851_v6 }
 0x469   : > { %v4904_v20 = vunpack.c.l.b16 %v4860_v60 }
 0x46a   : > { %v4903_v14 = vunpack.c.l.b16 %v4859_v41 }
 0x46c   : > { %v4916_v35 = vsel %vm4915_vm2, %v4903_v14, %v4914_v12 }
 0x46d   : > { %v4918_v7 = vsel %vm4917_vm4, %v4904_v20, %v4916_v35 }
 0x46e   : > { %v4919_v27 = vpack.c.b16 %v4918_v7, %v4918_v7 }
 0x470   : > { %5034 = vmatmul.mubr.bf16.vlgmr.msra.gmra.mxu0 %v4919_v27 }
 0x471   : > { %6057 = vmatpush3.bf16.msra.mxu0 %v6729_v30 }
 0x472   : > { %6058 = vmatprep.subr.bf16.mxu0 %v6730_v18 }
 0x475   : > { %6059 = vmatpush3.bf16.msra.mxu0 %v6731_v22 }
 0x476   : > { %6060 = vmatprep.subr.bf16.mxu0 %v6732_v9 }
 0x479   : > { %6061 = vmatpush3.bf16.msra.mxu0 %v6733_v52 }
 0x47a   : > { %6062 = vmatprep.subr.bf16.mxu0 %v6734_v53 }
 0x47d   : > { %6063 = vmatpush3.bf16.msra.mxu0 %v6735_v47 }
 0x47e   : > { %6064 = vmatprep.subr.bf16.mxu0 %v6736_v5 }
 0x481   : > { %6065 = vmatpush3.bf16.msra.mxu0 %v6737_v10 }
 0x482   : > { %6066 = vmatprep.subr.bf16.mxu0 %v6738_v26 }
 0x485   : > { %6067 = vmatpush3.bf16.msra.mxu0 %v6739_v59 }
 0x486   : > { %6068 = vmatprep.subr.bf16.mxu0 %v6740_v15 }
 0x489   : > { %6069 = vmatpush3.bf16.msra.mxu0 %v6741_v45 }
 0x48a   : > { %6070 = vmatprep.subr.bf16.mxu0 %v6742_v48 }
 0x48d   : > { %6071 = vmatpush3.bf16.msra.mxu0 %v6743_v37 }
 0x530   : > { %v5035_v17 = vpop.f32.mrf.mxu0 }
 0x531   : > { %v5036_v28 = vadd.f32 %v5035_v17, %v4882_v46 }
 0x532   : > { %v5037_v0 = vpop.f32.mrf.mxu0 }
 0x533   : > { %vm5042_vm5 = vcmp.gt.f32.partialorder %v5036_v28, 0.0  ;;  %v5044_v29 = vmul.f32 0.01, %v5036_v28  ;;  %v5038_v21 = vadd.f32 %v5037_v0, %v4886_v16 }
 0x534   : > { %v5039_v58 = vpop.f32.mrf.mxu0 }
 0x535   : > { %vm5043_vm6 = vcmp.gt.f32.partialorder %v5038_v21, 0.0  ;;  %v5045_v54 = vmul.f32 0.01, %v5038_v21  ;;  %v5046_v50 = vsel %vm5042_vm5, %v5036_v28, %v5044_v29 }
 0x536   : > { %v5040_v31 = vpop.f32.mrf.mxu0  ;;  %v5048_v63 = vpack.c.bf16 %v5046_v50, %v5046_v50 }
 0x537   : > { %v5047_v32 = vsel %vm5043_vm6, %v5038_v21, %v5045_v54 }
 0x538   : > { %v5049_v2 = vpack.c.bf16 %v5047_v32, %v5047_v32 }
 0x53a   : > { %5286 = vmatprep.mubr.bf16.mxu1 %v5049_v2 }
 0x53b   : > { %5287 = vmatmul.mubr.bf16.vlgmr.msra.gmra.mxu1 %v5048_v63 }
 0x5fb   : > { %v5288_v51 = vpop.f32.mrf.mxu1 }
 0x5fc   : > { %v5289_v40 = vadd.f32 %v5288_v51, %v5087_v25 }
 0x5fd   : > { %v5290_v8 = vpop.f32.mrf.mxu1 }
 0x5fe   : > { %v5291_v62 = vadd.f32 %v5290_v8, %v5091_v61  ;;  %v5295_v43 = vmax.f32 %v5289_v40, 0.0 }
 0x5ff   : > { %v5292_v3 = vpop.f32.mrf.mxu1 }
 0x600   : > { %v5296_v4 = vmax.f32 %v5291_v62, 0.0  ;;  %v5297_v49 = vpack.c.bf16 %v5295_v43, %v5295_v43 }
 0x601   : > { %v5293_v57 = vpop.f32.mrf.mxu1 }
 0x602   : > { %v5298_v42 = vpack.c.bf16 %v5296_v4, %v5296_v4 }
 0x604   : > { %5466 = vmatprep.mubr.bf16.mxu0 %v5298_v42 }
 0x605   : > { %5467 = vmatmul.mubr.bf16.vlgmr.msra.gmra.mxu0 %v5297_v49 }
 0x6c5   : > { %v6072_v38 = vpop.f32.mrf.mxu0 }
 0x6c7   : > { %v6073_v6 = vpop.f32.mrf.mxu0 }
 0x6c8   : > { %v6074_v60 = vadd.f32 %v6073_v6, %v6072_v38 }
 0x6c9   : > { %v6075_v44 = vpop.f32.mrf.mxu0 }
 0x6ca   : > { %v5469_v41 = vadd.f32 %v6074_v60, %v5909_v34 }
 0x6cb   : > { %v6076_v19 = vpop.f32.mrf.mxu0 }
 0x6cc   : > { %v5474_v36 = vsub.f32 0.0, %v5469_v41 }
 0x6ce   : > { %v5475_v14 = vmul.f32 1.442695, %v5474_v36 }
 0x6d0   : > { %6744 = vpow2.f32 %v5475_v14 }
 0x6dd   : > { %v6745_v20 = vpop.eup %6744 }
 0x6de   : > { %v5477_v12 = vadd.f32 1.0, %v6745_v20 }
 0x6e0   : > { %6746 = vrcp.f32 %v5477_v12 }
 0x6ed   : > { %v6747_v35 = vpop.eup %6746 }
 0x6ee   : > { %5480 = vst [vmem:[%s656_s24] sm:$0xff] %v6747_v35 }
 0x6ef   : > { %6891 = shalt.err (!%p6888_p0)
}
 0x6f0   : > { %s6892_s18 = scalar_lea.hbm %s9315_s27, 128  ;;  %s6896_s24 = scalar_lea.hbm %s9535_s25, 256 }
 0x6f1   : > { %p6893_p3 = scmp.ne.s32.totalorder %s9315_s27, %s6892_s18  ;;  %p6897_p12 = scmp.lt.s32.totalorder %s9315_s27, %s9535_s25 }
 0x6f2   : > { %p6898_p10 = scmp.lt.s32.totalorder %s6896_s24, %s6892_s18 }
 0x6f3   : > { %p6894_p1 = pnand %p6893_p3, %p7095_p5 }
 0x6f4   : > { %p6899_p4 = por %p6898_p10, %p6897_p12 }
 0x6f5   : > { %p6895_p2 = pneg %p6894_p1 }
 0x6f7   : > { %p6900_p7 = pnand %p6899_p4, %p6895_p2 }
 0x6f9   : > { %6903 = shalt.err (!%p6900_p7)
}
 0x6fa   : > { %6350 = dma.vmem_to_hbm [thread:$0]  (%p7095_p5), %s5496_s19, 128, %s9315_s27, %s5482_s30  }
 0x6fb PF: > { %s9536_s29 = sld [smem:[#allocation18_spill]] }
 0x6fc   : > { %s9537_s23 = sld [smem:[#allocation16_spill]] }
 0x701   : > { %p6382_p9 = scmp.ge.s32.totalorder %s9536_s29, 2 }
 0x702   : > { %s5507_s0 = sand.u32 1, %s9537_s23  }
 0x703   : > { %p6369_p8 = pnand %p6382_p9, %p7099_p6  ;;  %s5508_s22 = scalar_lea.sflag [#allocation4], %s5507_s0 }
 0x705   : > { %p6370_p11 = pneg %p6369_p8 }
 0x707   : > { %6933 = dma.done.wait (%p6370_p11), %s5508_s22, 128  }
 0x708   : > { %6935 = vsyncadd (%p6370_p11), %s5508_s22, 4294967168  ;;  %s9539_s30 = sld [smem:[#allocation19_spill]]  ;;  %s9542_s27 = smov %s6942_s28 }
 0x709   : > { %s9540_s18 = sld [smem:[#allocation17_spill]] }
 0x70a   : > { %s9541_s29 = sld [smem:[#allocation20_spill]] }
 0x70e   : > { %p31_p13 = scmp.ge.s32.totalorder %s9539_s30, 4  }
 0x70f   : > { %s9543_s28 = smov %s9540_s18 }
 0x710   :  { %33 = sbr.rel (!%p31_p13) target bundleno = 11 (0xb), region = 159 }
 0x715   :  { %5513 = vsyncpa [#allocation3], 1 }
 0x716   :  { %5515 = vsyncpa [#allocation3 + $0x1], 1 }
 0x717   :  { %5516 = vsyncpa [#allocation6], 1 }
 0x718   :  { %5517 = vsyncpa [#allocation9], 1 }
 0x719   :  { %5518 = vsyncpa [#allocation4], 1 }
 0x71a   :  { %5520 = vsyncpa [#allocation4 + $0x1], 1 }

</bundles_post_ra>
